<compile_context>
chip_gen: v6e
topology: v6e:2x2x1
jax: 0.10.0
libtpu: 0.0.40
codegen_flags: <defaults>
</compile_context>

<pallas_src>
import functools
import math

import jax
import jax.numpy as jnp
from jax import lax
from jax.experimental import pallas as pl
from jax.experimental.pallas import tpu as pltpu

_LN_EPS = 1e-5           # nn.LayerNorm default
_MASK_FILL = -1e9        # matches masked_fill(-1000000000.0)


# ---------------------------------------------------------------------------
# helpers
# ---------------------------------------------------------------------------
def _round_up(x, m):
    return (x + m - 1) // m * m


@functools.lru_cache(maxsize=None)
def _vmem_limit_bytes():
    cap = 128 * 1024 * 1024
    try:
        info = pltpu.get_tpu_info()
        cap = int(getattr(info, "vmem_capacity_bytes", cap)) or cap
    except Exception:
        pass
    # leave ~20% headroom for compiler scratch; never ask for more than 100 MiB
    return int(min(cap * 4 // 5, 100 * 1024 * 1024))


def _compiler_params(sem):
    return pltpu.CompilerParams(dimension_semantics=sem,
                                vmem_limit_bytes=_vmem_limit_bytes())


def _pad_rows(a, n_pad):
    n = a.shape[0]
    if n == n_pad:
        return a
    return jnp.pad(a, ((0, n_pad - n), (0, 0)))


def _row_tile(n, tm):
    # Rows hold bf16 blocks -> round tiles to 16 (2 rows per packed sublane).
    n16 = _round_up(n, 16)
    tm = max(16, min(tm, n16))
    tm = _round_up(tm, 16)
    # Prefer >= 2 row tiles so both v7x TensorCores get work.
    if n16 // tm < 2 and n16 >= 32:
        tm = _round_up(n16 // 2, 16)
    n_pad = _round_up(n16, tm)
    return tm, n_pad


def _pick_q_tile(S, tq):
    tq = max(16, (min(tq, S) // 16) * 16)
    if S % tq:
        tq = S                       # full-extent block is always legal
    return tq


def _pick_ff_tile(d_ff_pad, tkf):
    # d_ff_pad is a multiple of 128 (prepare_params), so 128 always divides.
    tkf = max(128, (min(tkf, d_ff_pad) // 128) * 128)
    while d_ff_pad % tkf:
        tkf -= 128
    return tkf


def _layernorm_f32(x, g, b):
    mu = jnp.mean(x, axis=-1, keepdims=True)
    xc = x - mu
    var = jnp.mean(xc * xc, axis=-1, keepdims=True)
    return xc * lax.rsqrt(var + _LN_EPS) * g + b


# ---------------------------------------------------------------------------
# kernels
# ---------------------------------------------------------------------------
def _ln_qkv_kernel(x_ref, g_ref, b_ref, wqkv_ref, bqkv_ref,
                   q_ref, k_ref, v_ref, *, d_model):
    # x_ref: (tm, D) f32 residual stream; wqkv_ref: (D, 3D) bf16 K-major with
    # 1/sqrt(d_k) pre-folded into the Q columns.  One LN pass + one MXU matmul.
    xn = _layernorm_f32(x_ref[...], g_ref[...], b_ref[...]).astype(wqkv_ref.dtype)
    qkv = jnp.dot(xn, wqkv_ref[...],
                  preferred_element_type=jnp.float32) + bqkv_ref[...]
    q_ref[...] = qkv[:, :d_model].astype(q_ref.dtype)
    k_ref[...] = qkv[:, d_model:2 * d_model].astype(k_ref.dtype)
    v_ref[...] = qkv[:, 2 * d_model:].astype(v_ref.dtype)


def _attn_kernel(q_ref, k_ref, v_ref, bias_ref, o_ref, *, num_heads, d_k):
    # q_ref: (1, tq, D) bf16 (scale already folded in), k/v_ref: (1, S, D) bf16,
    # bias_ref: (1, 1, S) f32 key-padding bias, o_ref: (1, tq, D) bf16.
    # Heads are slices of the lane axis; the per-head loop keeps layout fixed
    # and the final store is one lane-dense (tq, D) write.
    # TODO(synk): for very long S add KV tiling (online softmax) on top of the
    # query tiling done by the grid.
    bias = bias_ref[0]                             # (1, S)
    q_all = q_ref[0]                               # (tq, D)
    k_all = k_ref[0]                               # (S, D)
    v_all = v_ref[0]
    ctx_heads = []
    for h in range(num_heads):
        lo = h * d_k
        q = q_all[:, lo:lo + d_k]
        k = k_all[:, lo:lo + d_k]
        v = v_all[:, lo:lo + d_k]
        s = lax.dot_general(q, k, (((1,), (1,)), ((), ())),
                            preferred_element_type=jnp.float32) + bias
        m = jnp.max(s, axis=-1, keepdims=True)
        p = jnp.exp(s - m)
        l = jnp.sum(p, axis=-1, keepdims=True)
        ctx = jnp.dot(p.astype(v.dtype), v, preferred_element_type=jnp.float32)
        # deferred normalization: one reciprocal per row (EUP) instead of
        # dividing the (tq,S) probability matrix (VPU).
        ctx_heads.append(ctx * pl.reciprocal(l, approx=True))
    o_ref[0] = jnp.concatenate(ctx_heads, axis=-1).astype(o_ref.dtype)


def _proj_ln_ffn_kernel(ctx_ref, x_ref, wo_ref, bo_ref, g2_ref, b2ln_ref,
                        w1_ref, b1_ref, w2_ref, b2_ref, o_ref, xn_ref):
    # grid = (row tiles, d_ff tiles).  At kk==0 the attention output projection
    # + first residual + LN2 run once per row tile (ctx/x/wo are resident
    # across kk); every kk streams one (D,tkf)/(tkf,D) FFN weight slice and
    # accumulates directly into the resident f32 output block.
    kk = pl.program_id(1)

    @pl.when(kk == 0)
    def _():
        x2 = (jnp.dot(ctx_ref[...], wo_ref[...],
                      preferred_element_type=jnp.float32)
              + bo_ref[...] + x_ref[...])
        xn_ref[...] = _layernorm_f32(x2, g2_ref[...],
                                     b2ln_ref[...]).astype(xn_ref.dtype)
        o_ref[...] = x2 + b2_ref[...]              # residual + b2, accumulate FFN on top

    h = jnp.dot(xn_ref[...], w1_ref[...],
                preferred_element_type=jnp.float32) + b1_ref[...]
    h = jnp.maximum(h, 0.0)                        # ReLU (f32 epilogue)
    o_ref[...] += jnp.dot(h.astype(w2_ref.dtype), w2_ref[...],
                          preferred_element_type=jnp.float32)


# ---------------------------------------------------------------------------
# pallas_call wrappers
# ---------------------------------------------------------------------------
def ln_qkv_proj(x2d_p, g, b, wqkv_t, bqkv, *, tm, d_model, compute_dtype):
    n_pad, d = x2d_p.shape
    row = pl.BlockSpec((tm, d), lambda i: (i, 0))
    const = lambda a: pl.BlockSpec(a.shape, lambda i: (0, 0))
    kern = functools.partial(_ln_qkv_kernel, d_model=d_model)
    return pl.pallas_call(
        kern,
        out_shape=tuple(jax.ShapeDtypeStruct((n_pad, d), compute_dtype)
                        for _ in range(3)),
        grid_spec=pltpu.PrefetchScalarGridSpec(
            num_scalar_prefetch=0,
            grid=(n_pad // tm,),
            in_specs=[row, const(g), const(b), const(wqkv_t), const(bqkv)],
            out_specs=(row, row, row)),
        compiler_params=_compiler_params(("parallel",)),
    )(x2d_p, g, b, wqkv_t, bqkv)


def mha_attention(q, k, v, bias, *, num_heads, tq):
    B, S, D = q.shape
    d_k = D // num_heads
    tq = _pick_q_tile(S, tq)
    q_spec = pl.BlockSpec((1, tq, D), lambda b, qi: (b, qi, 0))
    kv_spec = pl.BlockSpec((1, S, D), lambda b, qi: (b, 0, 0))
    bias_spec = pl.BlockSpec((1, 1, S), lambda b, qi: (b, 0, 0))
    kern = functools.partial(_attn_kernel, num_heads=num_heads, d_k=d_k)
    return pl.pallas_call(
        kern,
        out_shape=jax.ShapeDtypeStruct((B, S, D), q.dtype),
        grid_spec=pltpu.PrefetchScalarGridSpec(
            num_scalar_prefetch=0,
            grid=(B, S // tq),
            in_specs=[q_spec, kv_spec, kv_spec, bias_spec],
            out_specs=q_spec),
        compiler_params=_compiler_params(("parallel", "parallel")),
    )(q, k, v, bias)


def proj_ln_ffn_residual(ctx_p, x_p, params, *, tm, tkf, compute_dtype):
    n_pad, d = x_p.shape
    d_ff_pad = params["w1_t"].shape[1]
    tkf = _pick_ff_tile(d_ff_pad, tkf)
    row = pl.BlockSpec((tm, d), lambda i, kk: (i, 0))
    const = lambda a: pl.BlockSpec(a.shape, lambda i, kk: (0, 0))
    # TODO(synk): for very large d_model, stream wo_t/wqkv_t over a K axis (or
    # single-buffer them) so resident weight VMEM stays bounded on v7x.
    return pl.pallas_call(
        _proj_ln_ffn_kernel,
        out_shape=jax.ShapeDtypeStruct((n_pad, d), jnp.float32),
        grid_spec=pltpu.PrefetchScalarGridSpec(
            num_scalar_prefetch=0,
            grid=(n_pad // tm, d_ff_pad // tkf),
            in_specs=[
                row,                                            # ctx (bf16)
                row,                                            # x residual (f32)
                const(params["wo_t"]), const(params["bo"]),
                const(params["ln2_g"]), const(params["ln2_b"]),
                pl.BlockSpec((d, tkf), lambda i, kk: (0, kk)),  # W1^T slice
                pl.BlockSpec((1, tkf), lambda i, kk: (0, kk)),  # b1 slice
                pl.BlockSpec((tkf, d), lambda i, kk: (kk, 0)),  # W2^T slice
                const(params["b2"]),
            ],
            out_specs=row,
            scratch_shapes=[pltpu.VMEM((tm, d), compute_dtype)]),  # LN2(x2) cache
        compiler_params=_compiler_params(("parallel", "arbitrary")),
    )(ctx_p, x_p, params["wo_t"], params["bo"], params["ln2_g"],
      params["ln2_b"], params["w1_t"], params["b1"], params["w2_t"],
      params["b2"])


# ---------------------------------------------------------------------------
# parameter preparation + full layer
# ---------------------------------------------------------------------------
def prepare_params(raw, *, num_heads, compute_dtype=jnp.bfloat16):
    """Pre-transpose (K-major), pre-cast to bf16, concatenate QKV, fold the
    1/sqrt(d_k) scale into the Q columns, and zero-pad d_ff to a multiple of
    128 — all ONCE, outside the call path."""
    cd = compute_dtype
    d_model = raw["wq"].shape[0]
    inv = 1.0 / math.sqrt(d_model // num_heads)
    row = lambda v: v.reshape(1, -1).astype(jnp.float32)

    wqkv_t = jnp.concatenate(
        [raw["wq"].T * inv, raw["wk"].T, raw["wv"].T], axis=1).astype(cd)
    bqkv = jnp.concatenate(
        [raw["bq"] * inv, raw["bk"], raw["bv"]]).reshape(1, -1).astype(jnp.float32)

    d_ff = raw["w1"].shape[0]
    d_ff_pad = _round_up(d_ff, 128)
    w1_t, w2_t, b1 = raw["w1"].T, raw["w2"].T, raw["b1"]
    if d_ff_pad != d_ff:
        w1_t = jnp.pad(w1_t, ((0, 0), (0, d_ff_pad - d_ff)))
        w2_t = jnp.pad(w2_t, ((0, d_ff_pad - d_ff), (0, 0)))
        b1 = jnp.pad(b1, (0, d_ff_pad - d_ff))

    return {
        "ln1_g": row(raw["ln1_g"]), "ln1_b": row(raw["ln1_b"]),
        "ln2_g": row(raw["ln2_g"]), "ln2_b": row(raw["ln2_b"]),
        "wqkv_t": wqkv_t, "bqkv": bqkv,
        "wo_t": raw["wo"].T.astype(cd), "bo": row(raw["bo"]),
        "w1_t": w1_t.astype(cd), "b1": b1.reshape(1, -1).astype(jnp.float32),
        "w2_t": w2_t.astype(cd), "b2": row(raw["b2"]),
    }


def encoder_layer(x, mask, params, *, num_heads, tm=256, tkf=512, tq=256,
                  compute_dtype=jnp.bfloat16):
    """EncoderLayer.forward (inference): pre-LN MHA + pre-LN FFN, residuals.

    x: [B, S, d_model] float; mask: [B, S] bool (True = masked key) or None.
    """
    B, S, D = x.shape
    n = B * S
    tm, n_pad = _row_tile(n, tm)

    x2d_p = _pad_rows(x.reshape(n, D).astype(jnp.float32), n_pad)

    if mask is None:
        bias = jnp.zeros((B, 1, S), jnp.float32)
    else:
        bias = jnp.where(mask, _MASK_FILL, 0.0).astype(jnp.float32).reshape(B, 1, S)

    # ---- LN1 fused with combined Q/K/V projection (heads stay on lanes) ----
    q, k, v = ln_qkv_proj(x2d_p, params["ln1_g"], params["ln1_b"],
                          params["wqkv_t"], params["bqkv"],
                          tm=tm, d_model=D, compute_dtype=compute_dtype)

    def view(t):                 # free reshape; slice is a no-op unless padded
        return t[:n].reshape(B, S, D)

    ctx = mha_attention(view(q), view(k), view(v), bias,
                        num_heads=num_heads, tq=tq)

    # ---- Wo projection + residual + LN2 + d_ff-streamed FFN + residual ----
    # TODO(synk): drop1/drop2 (p=0.1) are training-time dropout; inference
    # semantics (identity) are implemented here.
    ctx2d_p = _pad_rows(ctx.reshape(n, D), n_pad)
    out = proj_ln_ffn_residual(ctx2d_p, x2d_p, params,
                               tm=tm, tkf=tkf, compute_dtype=compute_dtype)

    # TODO(synk): graphCal (element-equality co-activation graph, Python loops)
    # and eChoice (dynamic sub-network selection) are host-side, data-dependent
    # logic with no clean Pallas hot path; not implemented.
    return out[:n].reshape(B, S, D)


# ---------------------------------------------------------------------------
# pure-JAX reference (mirrors the kernel's bf16 cast points)
# ---------------------------------------------------------------------------
def ref_encoder_layer(x, mask, raw, *, num_heads, compute_dtype=jnp.bfloat16):
    cd = compute_dtype
    B, S, D = x.shape
    H = num_heads
    dk = D // H
    xf = x.astype(jnp.float32)

    def ln(a, g, b):
        mu = a.mean(-1, keepdims=True)
        c = a - mu
        var = (c * c).mean(-1, keepdims=True)
        return c * lax.rsqrt(var + _LN_EPS) * g + b

    def lin(a, w, b):
        return jnp.dot(a.astype(cd), w.T.astype(cd),
                       preferred_element_type=jnp.float32) + b

    xn1 = ln(xf, raw["ln1_g"], raw["ln1_b"]).astype(cd)
    q = lin(xn1, raw["wq"], raw["bq"]).astype(cd).reshape(B, S, H, dk).transpose(0, 2, 1, 3)
    k = lin(xn1, raw["wk"], raw["bk"]).astype(cd).reshape(B, S, H, dk).transpose(0, 2, 1, 3)
    v = lin(xn1, raw["wv"], raw["bv"]).astype(cd).reshape(B, S, H, dk).transpose(0, 2, 1, 3)
    bias = (jnp.zeros((B, 1, 1, S), jnp.float32) if mask is None
            else jnp.where(mask, _MASK_FILL, 0.0).astype(jnp.float32)[:, None, None, :])
    s = jnp.einsum("bhqd,bhkd->bhqk", q, k,
                   preferred_element_type=jnp.float32) / math.sqrt(dk) + bias
    a = jax.nn.softmax(s, axis=-1)
    ctx = jnp.einsum("bhqk,bhkd->bhqd", a.astype(cd), v,
                     preferred_element_type=jnp.float32).astype(cd)
    ctx = ctx.transpose(0, 2, 1, 3).reshape(B, S, D)
    x2 = lin(ctx, raw["wo"], raw["bo"]) + xf
    xn2 = ln(x2, raw["ln2_g"], raw["ln2_b"]).astype(cd)
    h = jnp.maximum(lin(xn2, raw["w1"], raw["b1"]), 0.0)
    return lin(h.astype(cd), raw["w2"], raw["b2"]) + x2


# ---------------------------------------------------------------------------
if __name__ == "__main__":
    # Small but lane-dense shapes (128-multiples) so every store is unmasked.
    batch, seq, d_model, num_heads, d_ff = 2, 128, 128, 4, 256

    key = jax.random.PRNGKey(0)
    ks = jax.random.split(key, 20)

    def uinit(k, shape, fan_in):
        lim = 1.0 / math.sqrt(fan_in)
        return jax.random.uniform(k, shape, jnp.float32, -lim, lim)

    x = jax.random.normal(ks[0], (batch, seq, d_model), jnp.float32)
    # Key-padding mask: batch 0 unmasked, batch 1 has its last 16 keys masked.
    mask = jnp.arange(seq)[None, :] >= jnp.array([[seq], [seq - 16]])

    raw = {
        "ln1_g": 1.0 + 0.1 * jax.random.normal(ks[1], (d_model,), jnp.float32),
        "ln1_b": 0.1 * jax.random.normal(ks[2], (d_model,), jnp.float32),
        "ln2_g": 1.0 + 0.1 * jax.random.normal(ks[3], (d_model,), jnp.float32),
        "ln2_b": 0.1 * jax.random.normal(ks[4], (d_model,), jnp.float32),
        "wq": uinit(ks[5], (d_model, d_model), d_model),
        "bq": uinit(ks[6], (d_model,), d_model),
        "wk": uinit(ks[7], (d_model, d_model), d_model),
        "bk": uinit(ks[8], (d_model,), d_model),
        "wv": uinit(ks[9], (d_model, d_model), d_model),
        "bv": uinit(ks[10], (d_model,), d_model),
        "wo": uinit(ks[11], (d_model, d_model), d_model),
        "bo": uinit(ks[12], (d_model,), d_model),
        "w1": uinit(ks[13], (d_ff, d_model), d_model),
        "b1": uinit(ks[14], (d_ff,), d_model),
        "w2": uinit(ks[15], (d_model, d_ff), d_ff),
        "b2": uinit(ks[16], (d_model,), d_ff),
    }

    params = prepare_params(raw, num_heads=num_heads, compute_dtype=jnp.bfloat16)
    fwd = jax.jit(functools.partial(encoder_layer, num_heads=num_heads,
                                    tm=256, tkf=512, tq=256,
                                    compute_dtype=jnp.bfloat16))
    out = jax.block_until_ready(fwd(x, mask, params))

    ref = ref_encoder_layer(x, mask, raw, num_heads=num_heads,
                            compute_dtype=jnp.bfloat16)
    assert out.shape == (batch, seq, d_model)
    err = float(jnp.max(jnp.abs(out - ref)))
    assert jnp.allclose(out, ref, atol=1e-2, rtol=1e-2), f"max abs err={err}"
    print("KERNEL_OK")
</pallas_src>

<mosaic_0001>
module attributes {stable_mosaic.version = 11 : i64} {
  func.func @_attn_kernel(%arg0: i32, %arg1: i32, %arg2: memref<1x128x128xbf16, #tpu.memory_space<vmem>>, %arg3: memref<1x128x128xbf16, #tpu.memory_space<vmem>>, %arg4: memref<1x128x128xbf16, #tpu.memory_space<vmem>>, %arg5: memref<1x1x128xf32, #tpu.memory_space<vmem>>, %arg6: memref<1x128x128xbf16, #tpu.memory_space<vmem>>) attributes {dimension_semantics = [#tpu.dimension_semantics<parallel>, #tpu.dimension_semantics<parallel>], iteration_bounds = array<i64: 2, 1>, scalar_prefetch = 0 : i64, scratch_operands = 0 : i64, tpu.core_type = #tpu.core_type<tc>, window_params = [{transform_indices = @transform_0, window_bounds = array<i64: 1, 128, 128>}, {transform_indices = @transform_1, window_bounds = array<i64: 1, 128, 128>}, {transform_indices = @transform_2, window_bounds = array<i64: 1, 128, 128>}, {transform_indices = @transform_3, window_bounds = array<i64: 1, 1, 128>}, {transform_indices = @transform_4, window_bounds = array<i64: 1, 128, 128>}]} {
    %c0 = arith.constant 0 : index
    %c0_0 = arith.constant 0 : index
    %c0_1 = arith.constant 0 : index
    %0 = vector.load %arg5[%c0, %c0_0, %c0_1] : memref<1x1x128xf32, #tpu.memory_space<vmem>>, vector<1x1x128xf32>
    %1 = vector.shape_cast %0 : vector<1x1x128xf32> to vector<1x128xf32>
    %c0_2 = arith.constant 0 : index
    %c0_3 = arith.constant 0 : index
    %c0_4 = arith.constant 0 : index
    %2 = vector.load %arg2[%c0_2, %c0_3, %c0_4] : memref<1x128x128xbf16, #tpu.memory_space<vmem>>, vector<1x128x128xbf16>
    %3 = vector.shape_cast %2 : vector<1x128x128xbf16> to vector<128x128xbf16>
    %c0_5 = arith.constant 0 : index
    %c0_6 = arith.constant 0 : index
    %c0_7 = arith.constant 0 : index
    %4 = vector.load %arg3[%c0_5, %c0_6, %c0_7] : memref<1x128x128xbf16, #tpu.memory_space<vmem>>, vector<1x128x128xbf16>
    %5 = vector.shape_cast %4 : vector<1x128x128xbf16> to vector<128x128xbf16>
    %c0_8 = arith.constant 0 : index
    %c0_9 = arith.constant 0 : index
    %c0_10 = arith.constant 0 : index
    %6 = vector.load %arg4[%c0_8, %c0_9, %c0_10] : memref<1x128x128xbf16, #tpu.memory_space<vmem>>, vector<1x128x128xbf16>
    %7 = vector.shape_cast %6 : vector<1x128x128xbf16> to vector<128x128xbf16>
    %8 = vector.extract_strided_slice %3 {offsets = [0, 0], sizes = [128, 32], strides = [1, 1]} : vector<128x128xbf16> to vector<128x32xbf16>
    %9 = vector.extract_strided_slice %5 {offsets = [0, 0], sizes = [128, 32], strides = [1, 1]} : vector<128x128xbf16> to vector<128x32xbf16>
    %10 = vector.extract_strided_slice %7 {offsets = [0, 0], sizes = [128, 32], strides = [1, 1]} : vector<128x128xbf16> to vector<128x32xbf16>
    %cst = arith.constant dense<0.000000e+00> : vector<128x128xf32>
    %11 = tpu.matmul %8, %9, %cst {dimension_numbers = #tpu.dot_dimension_numbers<[1], [1], [0], [0], [0, 0, 1, 0], [], []>} : vector<128x32xbf16>, vector<128x32xbf16>, vector<128x128xf32> -> vector<128x128xf32>
    %12 = vector.broadcast %1 : vector<1x128xf32> to vector<128x128xf32>
    %13 = arith.addf %11, %12 : vector<128x128xf32>
    %cst_11 = arith.constant dense<0xFF800000> : vector<128xf32>
    %14 = vector.multi_reduction <maximumf>, %13, %cst_11 [1] : vector<128x128xf32> to vector<128xf32>
    %15 = vector.shape_cast %14 : vector<128xf32> to vector<128x1xf32>
    %16 = vector.broadcast %15 : vector<128x1xf32> to vector<128x128xf32>
    %17 = arith.subf %13, %16 : vector<128x128xf32>
    %18 = math.exp %17 : vector<128x128xf32>
    %cst_12 = arith.constant dense<0.000000e+00> : vector<128xf32>
    %19 = vector.multi_reduction <add>, %18, %cst_12 [1] : vector<128x128xf32> to vector<128xf32>
    %20 = vector.shape_cast %19 : vector<128xf32> to vector<128x1xf32>
    %21 = arith.truncf %18 : vector<128x128xf32> to vector<128x128xbf16>
    %cst_13 = arith.constant dense<0.000000e+00> : vector<128x32xf32>
    %22 = tpu.matmul %21, %10, %cst_13 {dimension_numbers = #tpu.dot_dimension_numbers<[1], [0], [0], [1], [0, 0, 1, 1], [], []>} : vector<128x128xbf16>, vector<128x32xbf16>, vector<128x32xf32> -> vector<128x32xf32>
    %23 = tpu.reciprocal %20 {approx = true} : vector<128x1xf32> -> vector<128x1xf32>
    %24 = vector.broadcast %23 : vector<128x1xf32> to vector<128x32xf32>
    %25 = arith.mulf %22, %24 : vector<128x32xf32>
    %26 = vector.extract_strided_slice %3 {offsets = [0, 32], sizes = [128, 32], strides = [1, 1]} : vector<128x128xbf16> to vector<128x32xbf16>
    %27 = vector.extract_strided_slice %5 {offsets = [0, 32], sizes = [128, 32], strides = [1, 1]} : vector<128x128xbf16> to vector<128x32xbf16>
    %28 = vector.extract_strided_slice %7 {offsets = [0, 32], sizes = [128, 32], strides = [1, 1]} : vector<128x128xbf16> to vector<128x32xbf16>
    %cst_14 = arith.constant dense<0.000000e+00> : vector<128x128xf32>
    %29 = tpu.matmul %26, %27, %cst_14 {dimension_numbers = #tpu.dot_dimension_numbers<[1], [1], [0], [0], [0, 0, 1, 0], [], []>} : vector<128x32xbf16>, vector<128x32xbf16>, vector<128x128xf32> -> vector<128x128xf32>
    %30 = vector.broadcast %1 : vector<1x128xf32> to vector<128x128xf32>
    %31 = arith.addf %29, %30 : vector<128x128xf32>
    %cst_15 = arith.constant dense<0xFF800000> : vector<128xf32>
    %32 = vector.multi_reduction <maximumf>, %31, %cst_15 [1] : vector<128x128xf32> to vector<128xf32>
    %33 = vector.shape_cast %32 : vector<128xf32> to vector<128x1xf32>
    %34 = vector.broadcast %33 : vector<128x1xf32> to vector<128x128xf32>
    %35 = arith.subf %31, %34 : vector<128x128xf32>
    %36 = math.exp %35 : vector<128x128xf32>
    %cst_16 = arith.constant dense<0.000000e+00> : vector<128xf32>
    %37 = vector.multi_reduction <add>, %36, %cst_16 [1] : vector<128x128xf32> to vector<128xf32>
    %38 = vector.shape_cast %37 : vector<128xf32> to vector<128x1xf32>
    %39 = arith.truncf %36 : vector<128x128xf32> to vector<128x128xbf16>
    %cst_17 = arith.constant dense<0.000000e+00> : vector<128x32xf32>
    %40 = tpu.matmul %39, %28, %cst_17 {dimension_numbers = #tpu.dot_dimension_numbers<[1], [0], [0], [1], [0, 0, 1, 1], [], []>} : vector<128x128xbf16>, vector<128x32xbf16>, vector<128x32xf32> -> vector<128x32xf32>
    %41 = tpu.reciprocal %38 {approx = true} : vector<128x1xf32> -> vector<128x1xf32>
    %42 = vector.broadcast %41 : vector<128x1xf32> to vector<128x32xf32>
    %43 = arith.mulf %40, %42 : vector<128x32xf32>
    %44 = vector.extract_strided_slice %3 {offsets = [0, 64], sizes = [128, 32], strides = [1, 1]} : vector<128x128xbf16> to vector<128x32xbf16>
    %45 = vector.extract_strided_slice %5 {offsets = [0, 64], sizes = [128, 32], strides = [1, 1]} : vector<128x128xbf16> to vector<128x32xbf16>
    %46 = vector.extract_strided_slice %7 {offsets = [0, 64], sizes = [128, 32], strides = [1, 1]} : vector<128x128xbf16> to vector<128x32xbf16>
    %cst_18 = arith.constant dense<0.000000e+00> : vector<128x128xf32>
    %47 = tpu.matmul %44, %45, %cst_18 {dimension_numbers = #tpu.dot_dimension_numbers<[1], [1], [0], [0], [0, 0, 1, 0], [], []>} : vector<128x32xbf16>, vector<128x32xbf16>, vector<128x128xf32> -> vector<128x128xf32>
    %48 = vector.broadcast %1 : vector<1x128xf32> to vector<128x128xf32>
    %49 = arith.addf %47, %48 : vector<128x128xf32>
    %cst_19 = arith.constant dense<0xFF800000> : vector<128xf32>
    %50 = vector.multi_reduction <maximumf>, %49, %cst_19 [1] : vector<128x128xf32> to vector<128xf32>
    %51 = vector.shape_cast %50 : vector<128xf32> to vector<128x1xf32>
    %52 = vector.broadcast %51 : vector<128x1xf32> to vector<128x128xf32>
    %53 = arith.subf %49, %52 : vector<128x128xf32>
    %54 = math.exp %53 : vector<128x128xf32>
    %cst_20 = arith.constant dense<0.000000e+00> : vector<128xf32>
    %55 = vector.multi_reduction <add>, %54, %cst_20 [1] : vector<128x128xf32> to vector<128xf32>
    %56 = vector.shape_cast %55 : vector<128xf32> to vector<128x1xf32>
    %57 = arith.truncf %54 : vector<128x128xf32> to vector<128x128xbf16>
    %cst_21 = arith.constant dense<0.000000e+00> : vector<128x32xf32>
    %58 = tpu.matmul %57, %46, %cst_21 {dimension_numbers = #tpu.dot_dimension_numbers<[1], [0], [0], [1], [0, 0, 1, 1], [], []>} : vector<128x128xbf16>, vector<128x32xbf16>, vector<128x32xf32> -> vector<128x32xf32>
    %59 = tpu.reciprocal %56 {approx = true} : vector<128x1xf32> -> vector<128x1xf32>
    %60 = vector.broadcast %59 : vector<128x1xf32> to vector<128x32xf32>
    %61 = arith.mulf %58, %60 : vector<128x32xf32>
    %62 = vector.extract_strided_slice %3 {offsets = [0, 96], sizes = [128, 32], strides = [1, 1]} : vector<128x128xbf16> to vector<128x32xbf16>
    %63 = vector.extract_strided_slice %5 {offsets = [0, 96], sizes = [128, 32], strides = [1, 1]} : vector<128x128xbf16> to vector<128x32xbf16>
    %64 = vector.extract_strided_slice %7 {offsets = [0, 96], sizes = [128, 32], strides = [1, 1]} : vector<128x128xbf16> to vector<128x32xbf16>
    %cst_22 = arith.constant dense<0.000000e+00> : vector<128x128xf32>
    %65 = tpu.matmul %62, %63, %cst_22 {dimension_numbers = #tpu.dot_dimension_numbers<[1], [1], [0], [0], [0, 0, 1, 0], [], []>} : vector<128x32xbf16>, vector<128x32xbf16>, vector<128x128xf32> -> vector<128x128xf32>
    %66 = vector.broadcast %1 : vector<1x128xf32> to vector<128x128xf32>
    %67 = arith.addf %65, %66 : vector<128x128xf32>
    %cst_23 = arith.constant dense<0xFF800000> : vector<128xf32>
    %68 = vector.multi_reduction <maximumf>, %67, %cst_23 [1] : vector<128x128xf32> to vector<128xf32>
    %69 = vector.shape_cast %68 : vector<128xf32> to vector<128x1xf32>
    %70 = vector.broadcast %69 : vector<128x1xf32> to vector<128x128xf32>
    %71 = arith.subf %67, %70 : vector<128x128xf32>
    %72 = math.exp %71 : vector<128x128xf32>
    %cst_24 = arith.constant dense<0.000000e+00> : vector<128xf32>
    %73 = vector.multi_reduction <add>, %72, %cst_24 [1] : vector<128x128xf32> to vector<128xf32>
    %74 = vector.shape_cast %73 : vector<128xf32> to vector<128x1xf32>
    %75 = arith.truncf %72 : vector<128x128xf32> to vector<128x128xbf16>
    %cst_25 = arith.constant dense<0.000000e+00> : vector<128x32xf32>
    %76 = tpu.matmul %75, %64, %cst_25 {dimension_numbers = #tpu.dot_dimension_numbers<[1], [0], [0], [1], [0, 0, 1, 1], [], []>} : vector<128x128xbf16>, vector<128x32xbf16>, vector<128x32xf32> -> vector<128x32xf32>
    %77 = tpu.reciprocal %74 {approx = true} : vector<128x1xf32> -> vector<128x1xf32>
    %78 = vector.broadcast %77 : vector<128x1xf32> to vector<128x32xf32>
    %79 = arith.mulf %76, %78 : vector<128x32xf32>
    %80 = tpu.concatenate %25, %43, %61, %79 in 1 : vector<128x32xf32>, vector<128x32xf32>, vector<128x32xf32>, vector<128x32xf32> -> vector<128x128xf32>
    %81 = arith.truncf %80 : vector<128x128xf32> to vector<128x128xbf16>
    %c0_26 = arith.constant 0 : index
    %c0_27 = arith.constant 0 : index
    %c0_28 = arith.constant 0 : index
    %82 = vector.load %arg6[%c0_26, %c0_27, %c0_28] : memref<1x128x128xbf16, #tpu.memory_space<vmem>>, vector<1x128x128xbf16>
    %83 = vector.shape_cast %82 : vector<1x128x128xbf16> to vector<128x128xbf16>
    %84 = vector.shape_cast %81 : vector<128x128xbf16> to vector<1x128x128xbf16>
    tpu.vector_store %arg6[%c0_26, %c0_27, %c0_28], %84 {strides = array<i32>} : memref<1x128x128xbf16, #tpu.memory_space<vmem>>, vector<1x128x128xbf16>,
    return
  }
  func.func @transform_0(%arg0: i32, %arg1: i32) -> (i32, i32, i32) {
    %c0_i32 = arith.constant 0 : i32
    %c0_i32_0 = arith.constant 0 : i32
    return %arg0, %arg1, %c0_i32 : i32, i32, i32
  }
  func.func @transform_1(%arg0: i32, %arg1: i32) -> (i32, i32, i32) {
    %c0_i32 = arith.constant 0 : i32
    %c0_i32_0 = arith.constant 0 : i32
    %c0_i32_1 = arith.constant 0 : i32
    return %arg0, %c0_i32, %c0_i32_0 : i32, i32, i32
  }
  func.func @transform_2(%arg0: i32, %arg1: i32) -> (i32, i32, i32) {
    %c0_i32 = arith.constant 0 : i32
    %c0_i32_0 = arith.constant 0 : i32
    %c0_i32_1 = arith.constant 0 : i32
    return %arg0, %c0_i32, %c0_i32_0 : i32, i32, i32
  }
  func.func @transform_3(%arg0: i32, %arg1: i32) -> (i32, i32, i32) {
    %c0_i32 = arith.constant 0 : i32
    %c0_i32_0 = arith.constant 0 : i32
    %c0_i32_1 = arith.constant 0 : i32
    return %arg0, %c0_i32, %c0_i32_0 : i32, i32, i32
  }
  func.func @transform_4(%arg0: i32, %arg1: i32) -> (i32, i32, i32) {
    %c0_i32 = arith.constant 0 : i32
    %c0_i32_0 = arith.constant 0 : i32
    return %arg0, %arg1, %c0_i32 : i32, i32, i32
  }
}

module attributes {stable_mosaic.version = 11 : i64} {
  func.func @_proj_ln_ffn_kernel(%arg0: i32, %arg1: i32, %arg2: memref<128x128xbf16, #tpu.memory_space<vmem>>, %arg3: memref<128x128xf32, #tpu.memory_space<vmem>>, %arg4: memref<128x128xbf16, #tpu.memory_space<vmem>>, %arg5: memref<1x128xf32, #tpu.memory_space<vmem>>, %arg6: memref<1x128xf32, #tpu.memory_space<vmem>>, %arg7: memref<1x128xf32, #tpu.memory_space<vmem>>, %arg8: memref<128x256xbf16, #tpu.memory_space<vmem>>, %arg9: memref<1x256xf32, #tpu.memory_space<vmem>>, %arg10: memref<256x128xbf16, #tpu.memory_space<vmem>>, %arg11: memref<1x128xf32, #tpu.memory_space<vmem>>, %arg12: memref<128x128xf32, #tpu.memory_space<vmem>>, %arg13: memref<128x128xbf16, #tpu.memory_space<vmem>>) attributes {dimension_semantics = [#tpu.dimension_semantics<parallel>, #tpu.dimension_semantics<arbitrary>], iteration_bounds = array<i64: 2, 1>, scalar_prefetch = 0 : i64, scratch_operands = 1 : i64, tpu.core_type = #tpu.core_type<tc>, window_params = [{transform_indices = @transform_0, window_bounds = array<i64: 128, 128>}, {transform_indices = @transform_1, window_bounds = array<i64: 128, 128>}, {pipeline_mode = #tpu.pipeline_mode<synchronous>, transform_indices = @transform_2, window_bounds = array<i64: 128, 128>}, {pipeline_mode = #tpu.pipeline_mode<synchronous>, transform_indices = @transform_3, window_bounds = array<i64: 1, 128>}, {pipeline_mode = #tpu.pipeline_mode<synchronous>, transform_indices = @transform_4, window_bounds = array<i64: 1, 128>}, {pipeline_mode = #tpu.pipeline_mode<synchronous>, transform_indices = @transform_5, window_bounds = array<i64: 1, 128>}, {transform_indices = @transform_6, window_bounds = array<i64: 128, 256>}, {transform_indices = @transform_7, window_bounds = array<i64: 1, 256>}, {transform_indices = @transform_8, window_bounds = array<i64: 256, 128>}, {pipeline_mode = #tpu.pipeline_mode<synchronous>, transform_indices = @transform_9, window_bounds = array<i64: 1, 128>}, {transform_indices = @transform_10, window_bounds = array<i64: 128, 128>}]} {
    %c0_i32 = arith.constant 0 : i32
    %0 = arith.cmpi eq, %arg1, %c0_i32 : i32
    %1 = arith.extui %0 : i1 to i32
    %c0_i32_0 = arith.constant 0 : i32
    %2 = arith.cmpi ne, %1, %c0_i32_0 : i32
    scf.if %2 {
      %c0_14 = arith.constant 0 : index
      %c0_15 = arith.constant 0 : index
      %17 = vector.load %arg2[%c0_14, %c0_15] : memref<128x128xbf16, #tpu.memory_space<vmem>>, vector<128x128xbf16>
      %c0_16 = arith.constant 0 : index
      %c0_17 = arith.constant 0 : index
      %18 = vector.load %arg4[%c0_16, %c0_17] : memref<128x128xbf16, #tpu.memory_space<vmem>>, vector<128x128xbf16>
      %cst_18 = arith.constant dense<0.000000e+00> : vector<128x128xf32>
      %19 = tpu.matmul %17, %18, %cst_18 {dimension_numbers = #tpu.dot_dimension_numbers<[1], [0], [0], [1], [0, 0, 1, 1], [], []>} : vector<128x128xbf16>, vector<128x128xbf16>, vector<128x128xf32> -> vector<128x128xf32>
      %c0_19 = arith.constant 0 : index
      %c0_20 = arith.constant 0 : index
      %20 = vector.load %arg5[%c0_19, %c0_20] : memref<1x128xf32, #tpu.memory_space<vmem>>, vector<1x128xf32>
      %21 = vector.broadcast %20 : vector<1x128xf32> to vector<128x128xf32>
      %22 = arith.addf %19, %21 : vector<128x128xf32>
      %c0_21 = arith.constant 0 : index
      %c0_22 = arith.constant 0 : index
      %23 = vector.load %arg3[%c0_21, %c0_22] : memref<128x128xf32, #tpu.memory_space<vmem>>, vector<128x128xf32>
      %24 = arith.addf %22, %23 : vector<128x128xf32>
      %c0_23 = arith.constant 0 : index
      %c0_24 = arith.constant 0 : index
      %25 = vector.load %arg6[%c0_23, %c0_24] : memref<1x128xf32, #tpu.memory_space<vmem>>, vector<1x128xf32>
      %c0_25 = arith.constant 0 : index
      %c0_26 = arith.constant 0 : index
      %26 = vector.load %arg7[%c0_25, %c0_26] : memref<1x128xf32, #tpu.memory_space<vmem>>, vector<1x128xf32>
      %cst_27 = arith.constant dense<0.000000e+00> : vector<128xf32>
      %27 = vector.multi_reduction <add>, %24, %cst_27 [1] : vector<128x128xf32> to vector<128xf32>
      %28 = vector.shape_cast %27 : vector<128xf32> to vector<128x1xf32>
      %cst_28 = arith.constant 1.280000e+02 : f32
      %29 = vector.broadcast %cst_28 : f32 to vector<128x1xf32>
      %30 = arith.divf %28, %29 : vector<128x1xf32>
      %31 = vector.broadcast %30 : vector<128x1xf32> to vector<128x128xf32>
      %32 = arith.subf %24, %31 : vector<128x128xf32>
      %33 = arith.mulf %32, %32 : vector<128x128xf32>
      %cst_29 = arith.constant dense<0.000000e+00> : vector<128xf32>
      %34 = vector.multi_reduction <add>, %33, %cst_29 [1] : vector<128x128xf32> to vector<128xf32>
      %35 = vector.shape_cast %34 : vector<128xf32> to vector<128x1xf32>
      %cst_30 = arith.constant 1.280000e+02 : f32
      %36 = vector.broadcast %cst_30 : f32 to vector<128x1xf32>
      %37 = arith.divf %35, %36 : vector<128x1xf32>
      %cst_31 = arith.constant 9.99999974E-6 : f32
      %38 = vector.broadcast %cst_31 : f32 to vector<128x1xf32>
      %39 = arith.addf %37, %38 : vector<128x1xf32>
      %40 = math.rsqrt %39 : vector<128x1xf32>
      %41 = vector.broadcast %40 : vector<128x1xf32> to vector<128x128xf32>
      %42 = arith.mulf %32, %41 : vector<128x128xf32>
      %43 = vector.broadcast %25 : vector<1x128xf32> to vector<128x128xf32>
      %44 = arith.mulf %42, %43 : vector<128x128xf32>
      %45 = vector.broadcast %26 : vector<1x128xf32> to vector<128x128xf32>
      %46 = arith.addf %44, %45 : vector<128x128xf32>
      %47 = arith.truncf %46 : vector<128x128xf32> to vector<128x128xbf16>
      %c0_32 = arith.constant 0 : index
      %c0_33 = arith.constant 0 : index
      %48 = vector.load %arg13[%c0_32, %c0_33] : memref<128x128xbf16, #tpu.memory_space<vmem>>, vector<128x128xbf16>
      tpu.vector_store %arg13[%c0_32, %c0_33], %47 {strides = array<i32>} : memref<128x128xbf16, #tpu.memory_space<vmem>>, vector<128x128xbf16>,
      %c0_34 = arith.constant 0 : index
      %c0_35 = arith.constant 0 : index
      %49 = vector.load %arg11[%c0_34, %c0_35] : memref<1x128xf32, #tpu.memory_space<vmem>>, vector<1x128xf32>
      %50 = vector.broadcast %49 : vector<1x128xf32> to vector<128x128xf32>
      %51 = arith.addf %24, %50 : vector<128x128xf32>
      %c0_36 = arith.constant 0 : index
      %c0_37 = arith.constant 0 : index
      %52 = vector.load %arg12[%c0_36, %c0_37] : memref<128x128xf32, #tpu.memory_space<vmem>>, vector<128x128xf32>
      tpu.vector_store %arg12[%c0_36, %c0_37], %51 {strides = array<i32>} : memref<128x128xf32, #tpu.memory_space<vmem>>, vector<128x128xf32>,
    } else {
    }
    %c0 = arith.constant 0 : index
    %c0_1 = arith.constant 0 : index
    %3 = vector.load %arg13[%c0, %c0_1] : memref<128x128xbf16, #tpu.memory_space<vmem>>, vector<128x128xbf16>
    %c0_2 = arith.constant 0 : index
    %c0_3 = arith.constant 0 : index
    %4 = vector.load %arg8[%c0_2, %c0_3] : memref<128x256xbf16, #tpu.memory_space<vmem>>, vector<128x256xbf16>
    %cst = arith.constant dense<0.000000e+00> : vector<128x256xf32>
    %5 = tpu.matmul %3, %4, %cst {dimension_numbers = #tpu.dot_dimension_numbers<[1], [0], [0], [1], [0, 0, 1, 1], [], []>} : vector<128x128xbf16>, vector<128x256xbf16>, vector<128x256xf32> -> vector<128x256xf32>
    %c0_4 = arith.constant 0 : index
    %c0_5 = arith.constant 0 : index
    %6 = vector.load %arg9[%c0_4, %c0_5] : memref<1x256xf32, #tpu.memory_space<vmem>>, vector<1x256xf32>
    %7 = vector.broadcast %6 : vector<1x256xf32> to vector<128x256xf32>
    %8 = arith.addf %5, %7 : vector<128x256xf32>
    %cst_6 = arith.constant 0.000000e+00 : f32
    %9 = vector.broadcast %cst_6 : f32 to vector<128x256xf32>
    %10 = arith.maximumf %8, %9 : vector<128x256xf32>
    %c0_7 = arith.constant 0 : index
    %c0_8 = arith.constant 0 : index
    %11 = vector.load %arg12[%c0_7, %c0_8] : memref<128x128xf32, #tpu.memory_space<vmem>>, vector<128x128xf32>
    %12 = arith.truncf %10 : vector<128x256xf32> to vector<128x256xbf16>
    %c0_9 = arith.constant 0 : index
    %c0_10 = arith.constant 0 : index
    %13 = vector.load %arg10[%c0_9, %c0_10] : memref<256x128xbf16, #tpu.memory_space<vmem>>, vector<256x128xbf16>
    %cst_11 = arith.constant dense<0.000000e+00> : vector<128x128xf32>
    %14 = tpu.matmul %12, %13, %cst_11 {dimension_numbers = #tpu.dot_dimension_numbers<[1], [0], [0], [1], [0, 0, 1, 1], [], []>} : vector<128x256xbf16>, vector<256x128xbf16>, vector<128x128xf32> -> vector<128x128xf32>
    %15 = arith.addf %11, %14 : vector<128x128xf32>
    %c0_12 = arith.constant 0 : index
    %c0_13 = arith.constant 0 : index
    %16 = vector.load %arg12[%c0_12, %c0_13] : memref<128x128xf32, #tpu.memory_space<vmem>>, vector<128x128xf32>
    tpu.vector_store %arg12[%c0_12, %c0_13], %15 {strides = array<i32>} : memref<128x128xf32, #tpu.memory_space<vmem>>, vector<128x128xf32>,
    return
  }
  func.func @transform_0(%arg0: i32, %arg1: i32) -> (i32, i32) {
    %c0_i32 = arith.constant 0 : i32
    %c0_i32_0 = arith.constant 0 : i32
    return %arg0, %c0_i32 : i32, i32
  }
  func.func @transform_1(%arg0: i32, %arg1: i32) -> (i32, i32) {
    %c0_i32 = arith.constant 0 : i32
    %c0_i32_0 = arith.constant 0 : i32
    return %arg0, %c0_i32 : i32, i32
  }
  func.func @transform_2(%arg0: i32, %arg1: i32) -> (i32, i32) {
    %c0_i32 = arith.constant 0 : i32
    %c0_i32_0 = arith.constant 0 : i32
    %c0_i32_1 = arith.constant 0 : i32
    return %c0_i32, %c0_i32_0 : i32, i32
  }
  func.func @transform_3(%arg0: i32, %arg1: i32) -> (i32, i32) {
    %c0_i32 = arith.constant 0 : i32
    %c0_i32_0 = arith.constant 0 : i32
    %c0_i32_1 = arith.constant 0 : i32
    return %c0_i32, %c0_i32_0 : i32, i32
  }
  func.func @transform_4(%arg0: i32, %arg1: i32) -> (i32, i32) {
    %c0_i32 = arith.constant 0 : i32
    %c0_i32_0 = arith.constant 0 : i32
    %c0_i32_1 = arith.constant 0 : i32
    return %c0_i32, %c0_i32_0 : i32, i32
  }
  func.func @transform_5(%arg0: i32, %arg1: i32) -> (i32, i32) {
    %c0_i32 = arith.constant 0 : i32
    %c0_i32_0 = arith.constant 0 : i32
    %c0_i32_1 = arith.constant 0 : i32
    return %c0_i32, %c0_i32_0 : i32, i32
  }
  func.func @transform_6(%arg0: i32, %arg1: i32) -> (i32, i32) {
    %c0_i32 = arith.constant 0 : i32
    %c0_i32_0 = arith.constant 0 : i32
    return %c0_i32, %arg1 : i32, i32
  }
  func.func @transform_7(%arg0: i32, %arg1: i32) -> (i32, i32) {
    %c0_i32 = arith.constant 0 : i32
    %c0_i32_0 = arith.constant 0 : i32
    return %c0_i32, %arg1 : i32, i32
  }
  func.func @transform_8(%arg0: i32, %arg1: i32) -> (i32, i32) {
    %c0_i32 = arith.constant 0 : i32
    %c0_i32_0 = arith.constant 0 : i32
    return %arg1, %c0_i32 : i32, i32
  }
  func.func @transform_9(%arg0: i32, %arg1: i32) -> (i32, i32) {
    %c0_i32 = arith.constant 0 : i32
    %c0_i32_0 = arith.constant 0 : i32
    %c0_i32_1 = arith.constant 0 : i32
    return %c0_i32, %c0_i32_0 : i32, i32
  }
  func.func @transform_10(%arg0: i32, %arg1: i32) -> (i32, i32) {
    %c0_i32 = arith.constant 0 : i32
    %c0_i32_0 = arith.constant 0 : i32
    return %arg0, %c0_i32 : i32, i32
  }
}

module attributes {stable_mosaic.version = 11 : i64} {
  func.func @_ln_qkv_kernel(%arg0: i32, %arg1: memref<128x128xf32, #tpu.memory_space<vmem>>, %arg2: memref<1x128xf32, #tpu.memory_space<vmem>>, %arg3: memref<1x128xf32, #tpu.memory_space<vmem>>, %arg4: memref<128x384xbf16, #tpu.memory_space<vmem>>, %arg5: memref<1x384xf32, #tpu.memory_space<vmem>>, %arg6: memref<128x128xbf16, #tpu.memory_space<vmem>>, %arg7: memref<128x128xbf16, #tpu.memory_space<vmem>>, %arg8: memref<128x128xbf16, #tpu.memory_space<vmem>>) attributes {dimension_semantics = [#tpu.dimension_semantics<parallel>], iteration_bounds = array<i64: 2>, scalar_prefetch = 0 : i64, scratch_operands = 0 : i64, tpu.core_type = #tpu.core_type<tc>, window_params = [{transform_indices = @transform_0, window_bounds = array<i64: 128, 128>}, {pipeline_mode = #tpu.pipeline_mode<synchronous>, transform_indices = @transform_1, window_bounds = array<i64: 1, 128>}, {pipeline_mode = #tpu.pipeline_mode<synchronous>, transform_indices = @transform_2, window_bounds = array<i64: 1, 128>}, {pipeline_mode = #tpu.pipeline_mode<synchronous>, transform_indices = @transform_3, window_bounds = array<i64: 128, 384>}, {pipeline_mode = #tpu.pipeline_mode<synchronous>, transform_indices = @transform_4, window_bounds = array<i64: 1, 384>}, {transform_indices = @transform_5, window_bounds = array<i64: 128, 128>}, {transform_indices = @transform_6, window_bounds = array<i64: 128, 128>}, {transform_indices = @transform_7, window_bounds = array<i64: 128, 128>}]} {
    %c0 = arith.constant 0 : index
    %c0_0 = arith.constant 0 : index
    %0 = vector.load %arg1[%c0, %c0_0] : memref<128x128xf32, #tpu.memory_space<vmem>>, vector<128x128xf32>
    %c0_1 = arith.constant 0 : index
    %c0_2 = arith.constant 0 : index
    %1 = vector.load %arg2[%c0_1, %c0_2] : memref<1x128xf32, #tpu.memory_space<vmem>>, vector<1x128xf32>
    %c0_3 = arith.constant 0 : index
    %c0_4 = arith.constant 0 : index
    %2 = vector.load %arg3[%c0_3, %c0_4] : memref<1x128xf32, #tpu.memory_space<vmem>>, vector<1x128xf32>
    %cst = arith.constant dense<0.000000e+00> : vector<128xf32>
    %3 = vector.multi_reduction <add>, %0, %cst [1] : vector<128x128xf32> to vector<128xf32>
    %4 = vector.shape_cast %3 : vector<128xf32> to vector<128x1xf32>
    %cst_5 = arith.constant 1.280000e+02 : f32
    %5 = vector.broadcast %cst_5 : f32 to vector<128x1xf32>
    %6 = arith.divf %4, %5 : vector<128x1xf32>
    %7 = vector.broadcast %6 : vector<128x1xf32> to vector<128x128xf32>
    %8 = arith.subf %0, %7 : vector<128x128xf32>
    %9 = arith.mulf %8, %8 : vector<128x128xf32>
    %cst_6 = arith.constant dense<0.000000e+00> : vector<128xf32>
    %10 = vector.multi_reduction <add>, %9, %cst_6 [1] : vector<128x128xf32> to vector<128xf32>
    %11 = vector.shape_cast %10 : vector<128xf32> to vector<128x1xf32>
    %cst_7 = arith.constant 1.280000e+02 : f32
    %12 = vector.broadcast %cst_7 : f32 to vector<128x1xf32>
    %13 = arith.divf %11, %12 : vector<128x1xf32>
    %cst_8 = arith.constant 9.99999974E-6 : f32
    %14 = vector.broadcast %cst_8 : f32 to vector<128x1xf32>
    %15 = arith.addf %13, %14 : vector<128x1xf32>
    %16 = math.rsqrt %15 : vector<128x1xf32>
    %17 = vector.broadcast %16 : vector<128x1xf32> to vector<128x128xf32>
    %18 = arith.mulf %8, %17 : vector<128x128xf32>
    %19 = vector.broadcast %1 : vector<1x128xf32> to vector<128x128xf32>
    %20 = arith.mulf %18, %19 : vector<128x128xf32>
    %21 = vector.broadcast %2 : vector<1x128xf32> to vector<128x128xf32>
    %22 = arith.addf %20, %21 : vector<128x128xf32>
    %23 = arith.truncf %22 : vector<128x128xf32> to vector<128x128xbf16>
    %c0_9 = arith.constant 0 : index
    %c0_10 = arith.constant 0 : index
    %24 = vector.load %arg4[%c0_9, %c0_10] : memref<128x384xbf16, #tpu.memory_space<vmem>>, vector<128x384xbf16>
    %cst_11 = arith.constant dense<0.000000e+00> : vector<128x384xf32>
    %25 = tpu.matmul %23, %24, %cst_11 {dimension_numbers = #tpu.dot_dimension_numbers<[1], [0], [0], [1], [0, 0, 1, 1], [], []>} : vector<128x128xbf16>, vector<128x384xbf16>, vector<128x384xf32> -> vector<128x384xf32>
    %c0_12 = arith.constant 0 : index
    %c0_13 = arith.constant 0 : index
    %26 = vector.load %arg5[%c0_12, %c0_13] : memref<1x384xf32, #tpu.memory_space<vmem>>, vector<1x384xf32>
    %27 = vector.broadcast %26 : vector<1x384xf32> to vector<128x384xf32>
    %28 = arith.addf %25, %27 : vector<128x384xf32>
    %29 = vector.extract_strided_slice %28 {offsets = [0, 0], sizes = [128, 128], strides = [1, 1]} : vector<128x384xf32> to vector<128x128xf32>
    %30 = arith.truncf %29 : vector<128x128xf32> to vector<128x128xbf16>
    %c0_14 = arith.constant 0 : index
    %c0_15 = arith.constant 0 : index
    %31 = vector.load %arg6[%c0_14, %c0_15] : memref<128x128xbf16, #tpu.memory_space<vmem>>, vector<128x128xbf16>
    tpu.vector_store %arg6[%c0_14, %c0_15], %30 {strides = array<i32>} : memref<128x128xbf16, #tpu.memory_space<vmem>>, vector<128x128xbf16>,
    %32 = vector.extract_strided_slice %28 {offsets = [0, 128], sizes = [128, 128], strides = [1, 1]} : vector<128x384xf32> to vector<128x128xf32>
    %33 = arith.truncf %32 : vector<128x128xf32> to vector<128x128xbf16>
    %c0_16 = arith.constant 0 : index
    %c0_17 = arith.constant 0 : index
    %34 = vector.load %arg7[%c0_16, %c0_17] : memref<128x128xbf16, #tpu.memory_space<vmem>>, vector<128x128xbf16>
    tpu.vector_store %arg7[%c0_16, %c0_17], %33 {strides = array<i32>} : memref<128x128xbf16, #tpu.memory_space<vmem>>, vector<128x128xbf16>,
    %35 = vector.extract_strided_slice %28 {offsets = [0, 256], sizes = [128, 128], strides = [1, 1]} : vector<128x384xf32> to vector<128x128xf32>
    %36 = arith.truncf %35 : vector<128x128xf32> to vector<128x128xbf16>
    %c0_18 = arith.constant 0 : index
    %c0_19 = arith.constant 0 : index
    %37 = vector.load %arg8[%c0_18, %c0_19] : memref<128x128xbf16, #tpu.memory_space<vmem>>, vector<128x128xbf16>
    tpu.vector_store %arg8[%c0_18, %c0_19], %36 {strides = array<i32>} : memref<128x128xbf16, #tpu.memory_space<vmem>>, vector<128x128xbf16>,
    return
  }
  func.func @transform_0(%arg0: i32) -> (i32, i32) {
    %c0_i32 = arith.constant 0 : i32
    %c0_i32_0 = arith.constant 0 : i32
    return %arg0, %c0_i32 : i32, i32
  }
  func.func @transform_1(%arg0: i32) -> (i32, i32) {
    %c0_i32 = arith.constant 0 : i32
    %c0_i32_0 = arith.constant 0 : i32
    %c0_i32_1 = arith.constant 0 : i32
    return %c0_i32, %c0_i32_0 : i32, i32
  }
  func.func @transform_2(%arg0: i32) -> (i32, i32) {
    %c0_i32 = arith.constant 0 : i32
    %c0_i32_0 = arith.constant 0 : i32
    %c0_i32_1 = arith.constant 0 : i32
    return %c0_i32, %c0_i32_0 : i32, i32
  }
  func.func @transform_3(%arg0: i32) -> (i32, i32) {
    %c0_i32 = arith.constant 0 : i32
    %c0_i32_0 = arith.constant 0 : i32
    %c0_i32_1 = arith.constant 0 : i32
    return %c0_i32, %c0_i32_0 : i32, i32
  }
  func.func @transform_4(%arg0: i32) -> (i32, i32) {
    %c0_i32 = arith.constant 0 : i32
    %c0_i32_0 = arith.constant 0 : i32
    %c0_i32_1 = arith.constant 0 : i32
    return %c0_i32, %c0_i32_0 : i32, i32
  }
  func.func @transform_5(%arg0: i32) -> (i32, i32) {
    %c0_i32 = arith.constant 0 : i32
    %c0_i32_0 = arith.constant 0 : i32
    return %arg0, %c0_i32 : i32, i32
  }
  func.func @transform_6(%arg0: i32) -> (i32, i32) {
    %c0_i32 = arith.constant 0 : i32
    %c0_i32_0 = arith.constant 0 : i32
    return %arg0, %c0_i32 : i32, i32
  }
  func.func @transform_7(%arg0: i32) -> (i32, i32) {
    %c0_i32 = arith.constant 0 : i32
    %c0_i32_0 = arith.constant 0 : i32
    return %arg0, %c0_i32 : i32, i32
  }
}

</mosaic_0001>

<bundles_post_ra>
// kernel: encoder_layer.3
= control target key start
LH: loop header
LB: loop body
LE: loop exit
PB: predicated region body
PF: predicated region fallthrough
CT: control target
= control target key end

     0   :  { %13 = vsyncpa [#allocation3], 0  ;;  %s2356_s0 = inlined_call_operand.hbm [shape: f32[256,128], index: 0, kind: input, shape index: {}]   ;;  %s2357_s1 = inlined_call_operand.vmem [shape: f32[1,128], index: 1, kind: input, shape index: {}]   ;;  %s2358_s2 = inlined_call_operand.vmem [shape: f32[1,128], index: 2, kind: input, shape index: {}]   ;;  %s2359_s3 = inlined_call_operand.hbm [shape: bf16[128,384], index: 3, kind: input, shape index: {}]   ;;  %s2360_s4 = inlined_call_operand.vmem [shape: f32[1,384], index: 4, kind: input, shape index: {}]   ;;  %s2361_s5 = inlined_call_operand.vmem [shape: bf16[256,128], index: 5, kind: output, shape index: {0}]   ;;  %s2362_s6 = inlined_call_operand.vmem [shape: bf16[256,128], index: 6, kind: output, shape index: {1}]   ;;  %s2363_s7 = inlined_call_operand.vmem [shape: bf16[256,128], index: 7, kind: output, shape index: {2}]  }
   0x1   :  { %15 = vsyncpa [#allocation3 + $0x1], 0 }
   0x2   :  { %16 = vsyncpa [#allocation5], 0  ;;  %s1954_s24 = smov 0   ;;  %s1956_s25 = smov 0  }
   0x3   :  { %s1958_s26 = smov 0   ;;  %s1960_s27 = smov 0  }
   0x4 LB: > { %s1363_s28 = sadd.s32 4294967295, %s1905_s27   ;;  %p42_p0 = scmp.ne.s32.totalorder %s1897_s25, %s1893_s24  ;;  %s1905_s27 = sphi %s1960_s27, %s2379_s27   ;;  %s1901_s26 = sphi %s1958_s26, %s2378_s26   ;;  %s1897_s25 = sphi %s1956_s25, %s2377_s25   ;;  %s1893_s24 = sphi %s1954_s24, %s2376_s24  }
   0x5   : > { %p1976_p1 = scmp.eq.s32.totalorder %s1363_s28, 0  ;;  %p1365_p2 = scmp.ge.s32.totalorder %s1905_s27, 1 }
   0x6   : > { %p215_p3 = scmp.lt.s32.totalorder %s1905_s27, 3  ;;  %s1907_s9 = smov [#allocation4]  }
   0x7   : > { %s2368_s29 = scalar_select %p1976_p1, 1, 0 }
   0x8   : > { %p1984_p4 = por %p1976_p1, %p42_p0  ;;  %p1988_p5 = pnand %p1365_p2, %p215_p3 }
   0x9   : > { %s233_s10 = sshll.u32 %s1907_s9, 4  ;;  %s2001_s12 = sadd.s32 1, %s1905_s27   ;;  %s234_s10 = int_to_ptr.vmem [resolvable:$true] %s233_s10 }
   0xa   : > { %s2369_s30 = scalar_select %p1984_p4, 1, 0 }
   0xb   : > { %s2370_s8 = scalar_select %p1988_p5, 1, 0 }
   0xc   : > { %p1700_p6 = pneg %p1988_p5  ;;  %s29_s13 = sadd.s32 1, %s1901_s26 }
   0xd   : > { %s26_s14 = ssub.s32 %s1905_s27, %s2001_s12  ;;  %s1824_s15 = scalar_lea.vmem %s234_s10, 3072 }
   0xe   : > { %p1996_p7 = pnand %p1700_p6, %p1976_p1  ;;  %p1825_p9 = scmp.ne.s32.totalorder %s234_s10, %s1824_s15 }
   0xf   : > { %p1832_p12 = scmp.lt.s32.totalorder %s234_s10, %s234_s10  ;;  %p1833_p13 = scmp.lt.s32.totalorder %s1824_s15, %s1824_s15 }
  0x10   : > { %p1815_p8 = pneg %p1996_p7 }
  0x11   : > { %p1834_p0 = por %p1833_p13, %p1832_p12 }
  0x12   : > { %p1827_p10 = pnand %p1825_p9, %p1815_p8 }
  0x14   : > { %p1828_p11 = pneg %p1827_p10 }
  0x16   : > { %p1835_p2 = pnand %p1834_p0, %p1828_p11 }
  0x18   : > { %1838 = shalt.err (!%p1835_p2)
}
  0x19   : > { %s1908_s16 = smov 192   ;;  %s1909_s17 = smov 12  }
  0x1a   : > { %1703 = dma.hbm_to_vmem [thread:$0]  (!%p1996_p7), %s2359_s3, 3072, %s234_s10, [#allocation5], %s1908_s16, %s1908_s16, %s1909_s17  }
  0x1b   : > { %p27_p3 = scmp.eq.s32.totalorder %s26_s14, 0  ;;  %p36_p6 = scmp.ne.s32.totalorder %s1901_s26, %s1897_s25 }
  0x1c   : > { %p37_p8 = scmp.eq.s32.totalorder %s1905_s27, 0  ;;  %p1709_p9 = scmp.lt.s32.totalorder %s1905_s27, 2 }
  0x1d   : > { %s2018_s20 = scalar_select %p27_p3, %s1901_s26, %s29_s13  }
  0x1e   : > { %p38_p10 = por %p37_p8, %p36_p6  ;;  %s250_s21 = sand.u32 1, %s1901_s26  }
  0x1f   : > { %s1368_s22 = sshll.u32 %s250_s21, 7  ;;  %s1456_s23 = sshll.u32 %s1905_s27, 11 }
  0x20   : > { %s2025_s15 = scalar_lea.hbm %s2356_s0, %s1456_s23  ;;  %s254_s11 = scalar_lea.vmem [#allocation2], %s1368_s22 }
  0x21   : > { %s261_s10 = sshll.u32 %s254_s11, 4  ;;  %p2029_p7 = pnand %p1709_p9, %p38_p10  ;;  %s2027_s10 = int_to_ptr.vmem [resolvable:$true] %s261_s10 }
  0x22   : > { %s2033_s13 = scalar_lea.sflag [#allocation3], %s250_s21  ;;  %s1839_s16 = scalar_lea.hbm %s2025_s15, 2048 }
  0x23   : > { %p1840_p11 = scmp.ne.s32.totalorder %s2025_s15, %s1839_s16  ;;  %p1841_p12 = pneg %p2029_p7 }
  0x24   : > { %s1844_s19 = scalar_lea.hbm %s2356_s0, 4096  ;;  %p1845_p2 = scmp.lt.s32.totalorder %s2025_s15, %s2356_s0 }
  0x25   : > { %p1842_p13 = pnand %p1841_p12, %p1840_p11  ;;  %p1846_p3 = scmp.lt.s32.totalorder %s1844_s19, %s1839_s16 }
  0x27   : > { %p1843_p0 = pneg %p1842_p13  ;;  %p1847_p6 = por %p1846_p3, %p1845_p2 }
  0x29   : > { %p1848_p8 = pnand %p1847_p6, %p1843_p0 }
  0x2b   : > { %1851 = shalt.err (!%p1848_p8)
}
  0x2c   : > { %s1852_s21 = scalar_lea.vmem %s2027_s10, 2048  ;;  %s1910_s24 = smov [#allocation2]  }
  0x2d   : > { %p1853_p9 = scmp.ne.s32.totalorder %s2027_s10, %s1852_s21  ;;  %s1857_s9 = sshll.u32 %s1910_s24, 4  ;;  %s1858_s9 = int_to_ptr.vmem [resolvable:$false] %s1857_s9 }
  0x2e   : > { %s1859_s11 = scalar_lea.vmem %s1858_s9, 4096  ;;  %p1860_p13 = scmp.lt.s32.totalorder %s2027_s10, %s1858_s9 }
  0x2f   : > { %p1855_p10 = pnand %p1853_p9, %p1841_p12  ;;  %p1861_p1 = scmp.lt.s32.totalorder %s1859_s11, %s1852_s21 }
  0x31   : > { %p1856_p11 = pneg %p1855_p10  ;;  %p1862_p4 = por %p1861_p1, %p1860_p13 }
  0x33   : > { %p1863_p5 = pnand %p1862_p4, %p1856_p11 }
  0x35   : > { %1866 = shalt.err (!%p1863_p5)
}
  0x36   : > { %s1911_s16 = smov 128   ;;  %s1912_s17 = smov 8  }
  0x37   : > { %1707 = dma.hbm_to_vmem [thread:$0]  (!%p2029_p7), %s2025_s15, 2048, %s2027_s10, %s2033_s13, %s1911_s16, %s1911_s16, %s1912_s17  }
  0x38   : > { %p2373_p12 = scmp.ne.s32.totalorder %s2370_s8, 0 }
  0x39   : > { %s275_s18 = sand.u32 (!%p2373_p12), 1, %s1897_s25   ;;  %p2374_p1 = scmp.ne.s32.totalorder (!%p2373_p12), %s2369_s30, 0 }
  0x3a   : > { %273 = sbr.rel (%p2373_p12) target bundleno = 640 (0x280), region = 40  ;;  %s1372_s19 = sshll.u32 (!%p2373_p12), %s275_s18, 7 }
  0x3b   : > { %s276_s22 = scalar_lea.sflag (!%p2373_p12), [#allocation3], %s275_s18  ;;  %s2057_s23 = scalar_lea.vmem (!%p2373_p12), [#allocation2], %s1372_s19 }
  0x3f   : > { %1884 = dma.done.wait (%p2374_p1), %s276_s22, 2048  }
  0x40   : > { %1886 = vsyncadd (%p2374_p1), %s276_s22, 4294965248  ;;  %p2375_p4 = scmp.ne.s32.totalorder %s2368_s29, 0 }
  0x42   : > { %1888 = dma.done.wait (%p2375_p4), [#allocation5], 3072  }
  0x43   : > { %1890 = vsyncadd (%p2375_p4), [#allocation5], 4294964224  ;;  %v344_v0 = vld [vmem:[%s2057_s23] sm:$0xff]  ;;  %v346_v1 = vld [vmem:[%s2057_s23 + $0x10] sm:$0xff]  ;;  %s1374_s10 = sshll.u32 %s1363_s28, 4 }
  0x44   : > { %362 = vadd.xlane.f32.xlu0 %v344_v0  ;;  %366 = vadd.xlane.f32.xlu1 %v346_v1  ;;  %v345_v2 = vld [vmem:[%s2057_s23 + $0x8] sm:$0xff]  ;;  %v347_v3 = vld [vmem:[%s2057_s23 + $0x18] sm:$0xff]  ;;  %v348_v4 = vld [vmem:[%s2057_s23 + $0x20] sm:$0xff]  ;;  %p326_p5 = scmp.lt.s32.totalorder %s1374_s10, 31 }
  0x45   : > { %v349_v5 = vld [vmem:[%s2057_s23 + $0x28] sm:$0xff]  ;;  %v350_v6 = vld [vmem:[%s2057_s23 + $0x30] sm:$0xff]  ;;  %v351_v7 = vld [vmem:[%s2057_s23 + $0x38] sm:$0xff] }
  0x46   : > { %v2076_v8 = vld [vmem:[%s2057_s23 + $0x40] sm:$0xff]  ;;  %v2079_v9 = vld [vmem:[%s2057_s23 + $0x48] sm:$0xff]  ;;  %v2084_v10 = vld [vmem:[%s2057_s23 + $0x50] sm:$0xff]  ;;  %s2381_s10 = smov (!%p326_p5, %s1374_s10), 31 }
  0x47   : > { %v2087_v11 = vld [vmem:[%s2057_s23 + $0x58] sm:$0xff]  ;;  %v2092_v12 = vld [vmem:[%s2057_s23 + $0x60] sm:$0xff]  ;;  %v2095_v13 = vld [vmem:[%s2057_s23 + $0x68] sm:$0xff]  ;;  %s1375_s21 = sshll.u32 %s2381_s10, 2 }
  0x48   : > { %364 = vadd.xlane.f32.xlu0 %v345_v2  ;;  %368 = vadd.xlane.f32.xlu1 %v347_v3  ;;  %v2100_v14 = vld [vmem:[%s2057_s23 + $0x70] sm:$0xff]  ;;  %v2103_v15 = vld [vmem:[%s2057_s23 + $0x78] sm:$0xff]  ;;  %s2259_s24 = scalar_lea.vmem %s2361_s5, %s1375_s21  ;;  %s2268_s16 = scalar_lea.vmem %s2362_s6, %s1375_s21 }
  0x49   : > { %v1749_v16 = vld [vmem:[#allocation4 + $0xac] ss:$12 sps:$4 sm:$0xff]   ;;  %v1751_v17 = vld [vmem:[#allocation4 + $0xa8] ss:$12 sps:$4 sm:$0xff]   ;;  %v1754_v54 = vld [vmem:[#allocation4 + $0xb0] ss:$12 sps:$4 sm:$0xff]   ;;  %s2277_s19 = scalar_lea.vmem %s2363_s7, %s1375_s21 }
  0x4a   : > { %768 = vmatprep.subr.bf16.mxu0 %v1749_v16  ;;  %v1752_v53 = vld [vmem:[#allocation4 + $0x94] ss:$12 sps:$4 sm:$0xff]   ;;  %v1755_v55 = vld [vmem:[#allocation4 + $0x90] ss:$12 sps:$4 sm:$0xff]   ;;  %1662 = vmatprep.subr.bf16.mxu1 %v1754_v54 }
  0x4b   : > { %769 = vmatpush1.bf16.msra.mxu0 %v1751_v17  ;;  %1663 = vmatpush3.bf16.msra.mxu1 %v1754_v54  ;;  %v1762_v17 = vld [vmem:[#allocation4 + $0x80] ss:$12 sps:$4 sm:$0xff]  }
  0x4c   : > { %370 = vadd.xlane.f32.xlu0 %v348_v4  ;;  %372 = vadd.xlane.f32.xlu1 %v349_v5 }
  0x4d   : > { %770 = vmatprep.subr.bf16.mxu0 %v1752_v53 }
  0x4f   : > { %771 = vmatpush1.bf16.msra.mxu0 %v1755_v55 }
  0x50   : > { %374 = vadd.xlane.f32.xlu0 %v350_v6  ;;  %376 = vadd.xlane.f32.xlu1 %v351_v7 }
  0x54   : > { %378 = vadd.xlane.f32.xlu0 %v2076_v8  ;;  %380 = vadd.xlane.f32.xlu1 %v2079_v9 }
  0x58   : > { %382 = vadd.xlane.f32.xlu0 %v2084_v10  ;;  %384 = vadd.xlane.f32.xlu1 %v2087_v11 }
  0x5c   : > { %386 = vadd.xlane.f32.xlu0 %v2092_v12  ;;  %388 = vadd.xlane.f32.xlu1 %v2095_v13 }
  0x60   : > { %390 = vadd.xlane.f32.xlu0 %v2100_v14  ;;  %392 = vadd.xlane.f32.xlu1 %v2103_v15 }
  0xcd   : > { %v363_v18 = vpop.xlane.xlu0 %362  ;;  %v367_v19 = vpop.xlane.xlu1 %366 }
  0xce   : > { %v395_v20 = vmul.f32 0.0078125, %v363_v18  ;;  %v397_v21 = vmul.f32 0.0078125, %v367_v19 }
  0xd0   : > { %v2107_v22 = vsub.f32 %v344_v0, %v395_v20  ;;  %v2109_v23 = vsub.f32 %v346_v1, %v397_v21  ;;  %v1756_v0 = vld [vmem:[#allocation4 + $0x7c] ss:$12 sps:$4 sm:$0xff]   ;;  %v1758_v1 = vld [vmem:[#allocation4 + $0x98] ss:$12 sps:$4 sm:$0xff]   ;;  %v1763_v20 = vld [vmem:[#allocation4 + $0x60] ss:$12 sps:$4 sm:$0xff]  }
  0xd1   : > { %v365_v24 = vpop.xlane.xlu0 %364  ;;  %v369_v25 = vpop.xlane.xlu1 %368  ;;  %772 = vmatprep.subr.bf16.mxu0 %v1756_v0  ;;  %1664 = vmatprep.subr.bf16.mxu1 %v1758_v1 }
  0xd2   : > { %v396_v26 = vmul.f32 0.0078125, %v365_v24  ;;  %v427_v27 = vmul.f32 %v2107_v22, %v2107_v22  ;;  %v398_v28 = vmul.f32 0.0078125, %v369_v25  ;;  %v429_v31 = vmul.f32 %v2109_v23, %v2109_v23  ;;  %1665 = vmatpush3.bf16.msra.mxu1 %v1758_v1 }
  0xd3   : > { %1666 = vmatprep.subr.bf16.mxu1 %v1762_v17 }
  0xd4   : > { %v2113_v29 = vsub.f32 %v345_v2, %v396_v26  ;;  %443 = vadd.xlane.f32.xlu0 %v427_v27  ;;  %v2115_v30 = vsub.f32 %v347_v3, %v398_v28  ;;  %v1766_v28 = vld [vmem:[#allocation4 + $0x68] ss:$12 sps:$4 sm:$0xff]  }
  0xd5   : > { %v371_v32 = vpop.xlane.xlu0 %370  ;;  %v373_v33 = vpop.xlane.xlu1 %372 }
  0xd6   : > { %v399_v34 = vmul.f32 0.0078125, %v371_v32  ;;  %v428_v35 = vmul.f32 %v2113_v29, %v2113_v29  ;;  %v400_v36 = vmul.f32 0.0078125, %v373_v33  ;;  %v430_v39 = vmul.f32 %v2115_v30, %v2115_v30  ;;  %1667 = vmatpush3.bf16.msra.mxu1 %v1762_v17  ;;  %v1767_v33 = vld [vmem:[#allocation4 + $0x48] ss:$12 sps:$4 sm:$0xff]  }
  0xd7   : > { %1668 = vmatprep.subr.bf16.mxu1 %v1766_v28 }
  0xd8   : > { %v2121_v37 = vsub.f32 %v348_v4, %v399_v34  ;;  %447 = vadd.xlane.f32.xlu0 %v429_v31  ;;  %445 = vadd.xlane.f32.xlu1 %v428_v35  ;;  %v2123_v38 = vsub.f32 %v349_v5, %v400_v36  ;;  %v1759_v5 = vld [vmem:[#allocation4 + $0x78] ss:$12 sps:$4 sm:$0xff]   ;;  %v1768_v35 = vld [vmem:[#allocation4 + $0x34] ss:$12 sps:$4 sm:$0xff]   ;;  %v1770_v36 = vld [vmem:[#allocation4 + $0x50] ss:$12 sps:$4 sm:$0xff]  }
  0xd9   : > { %v375_v40 = vpop.xlane.xlu0 %374  ;;  %v377_v41 = vpop.xlane.xlu1 %376  ;;  %773 = vmatpush1.bf16.msra.mxu0 %v1759_v5 }
  0xda   : > { %v401_v42 = vmul.f32 0.0078125, %v375_v40  ;;  %v431_v43 = vmul.f32 %v2121_v37, %v2121_v37  ;;  %v402_v44 = vmul.f32 0.0078125, %v377_v41  ;;  %v432_v47 = vmul.f32 %v2123_v38, %v2123_v38  ;;  %1669 = vmatpush3.bf16.msra.mxu1 %v1766_v28  ;;  %v1774_v40 = vld [vmem:[#allocation4 + $0x38] ss:$12 sps:$4 sm:$0xff]  }
  0xdb   : > { %1670 = vmatprep.subr.bf16.mxu1 %v1770_v36  ;;  %v1775_v41 = vld [vmem:[#allocation4 + $0x18] ss:$12 sps:$4 sm:$0xff]  }
  0xdc   : > { %v2129_v45 = vsub.f32 %v350_v6, %v401_v42  ;;  %449 = vadd.xlane.f32.xlu1 %v430_v39  ;;  %451 = vadd.xlane.f32.xlu0 %v431_v43  ;;  %v2131_v46 = vsub.f32 %v351_v7, %v402_v44  ;;  %v1772_v39 = vld [vmem:[#allocation4 + $0x1c] ss:$12 sps:$4 sm:$0xff]   ;;  %v1776_v42 = vld [vmem:[#allocation4 + $0x4] ss:$12 sps:$4 sm:$0xff]   ;;  %v1778_v43 = vld [vmem:[#allocation4 + $0x20] ss:$12 sps:$4 sm:$0xff]  }
  0xdd   : > { %v379_v48 = vpop.xlane.xlu0 %378  ;;  %v381_v49 = vpop.xlane.xlu1 %380  ;;  %v1779_v44 = vld [vmem:[#allocation4] ss:$12 sps:$4 sm:$0xff]  }
  0xde   : > { %v403_v50 = vmul.f32 0.0078125, %v379_v48  ;;  %v433_v51 = vmul.f32 %v2129_v45, %v2129_v45  ;;  %v404_v52 = vmul.f32 0.0078125, %v381_v49  ;;  %v434_v58 = vmul.f32 %v2131_v46, %v2131_v46  ;;  %1671 = vmatpush3.bf16.msra.mxu1 %v1770_v36 }
  0xdf   : > { %1672 = vmatprep.subr.bf16.mxu1 %v1774_v40  ;;  %v1913_v48 = vmov 0  }
  0xe0   : > { %v2138_v56 = vsub.f32 %v2076_v8, %v403_v50  ;;  %453 = vadd.xlane.f32.xlu1 %v432_v47  ;;  %455 = vadd.xlane.f32.xlu0 %v433_v51  ;;  %v2141_v57 = vsub.f32 %v2079_v9, %v404_v52  ;;  %v1780_v47 = vld [vmem:[#allocation4 + $0x8] ss:$12 sps:$4 sm:$0xff]  }
  0xe1   : > { %v383_v59 = vpop.xlane.xlu0 %382  ;;  %v385_v60 = vpop.xlane.xlu1 %384  ;;  %800 = vmatprep.mubr.bf16.mxu0 %v1913_v48 }
  0xe2   : > { %v405_v61 = vmul.f32 0.0078125, %v383_v59  ;;  %v435_v62 = vmul.f32 %v2138_v56, %v2138_v56  ;;  %v406_v63 = vmul.f32 0.0078125, %v385_v60  ;;  %v436_v4 = vmul.f32 %v2141_v57, %v2141_v57  ;;  %1673 = vmatpush3.bf16.msra.mxu1 %v1774_v40 }
  0xe3   : > { %1674 = vmatprep.subr.bf16.mxu1 %v1778_v43 }
  0xe4   : > { %v2148_v2 = vsub.f32 %v2084_v10, %v405_v61  ;;  %457 = vadd.xlane.f32.xlu1 %v434_v58  ;;  %459 = vadd.xlane.f32.xlu0 %v435_v62  ;;  %v2151_v3 = vsub.f32 %v2087_v11, %v406_v63  ;;  %v1760_v10 = vld [vmem:[#allocation4 + $0x64] ss:$12 sps:$4 sm:$0xff]  }
  0xe5   : > { %v387_v6 = vpop.xlane.xlu0 %386  ;;  %v389_v7 = vpop.xlane.xlu1 %388  ;;  %774 = vmatprep.subr.bf16.mxu0 %v1760_v10 }
  0xe6   : > { %v407_v8 = vmul.f32 0.0078125, %v387_v6  ;;  %v437_v9 = vmul.f32 %v2148_v2, %v2148_v2  ;;  %v408_v16 = vmul.f32 0.0078125, %v389_v7  ;;  %v438_v19 = vmul.f32 %v2151_v3, %v2151_v3  ;;  %775 = vmatpush1.bf16.msra.mxu0 %v1763_v20  ;;  %1675 = vmatpush3.bf16.msra.mxu1 %v1778_v43 }
  0xe7   : > { %1676 = vmatprep.subr.bf16.mxu1 %v1780_v47 }
  0xe8   : > { %v2158_v11 = vsub.f32 %v2092_v12, %v407_v8  ;;  %461 = vadd.xlane.f32.xlu1 %v436_v4  ;;  %463 = vadd.xlane.f32.xlu0 %v437_v9  ;;  %v2161_v18 = vsub.f32 %v2095_v13, %v408_v16  ;;  %v1764_v12 = vld [vmem:[#allocation4 + $0x4c] ss:$12 sps:$4 sm:$0xff]  }
  0xe9   : > { %v391_v21 = vpop.xlane.xlu0 %390  ;;  %v393_v24 = vpop.xlane.xlu1 %392  ;;  %776 = vmatprep.subr.bf16.mxu0 %v1764_v12 }
  0xea   : > { %v409_v25 = vmul.f32 0.0078125, %v391_v21  ;;  %v439_v26 = vmul.f32 %v2158_v11, %v2158_v11  ;;  %v410_v27 = vmul.f32 0.0078125, %v393_v24  ;;  %v440_v32 = vmul.f32 %v2161_v18, %v2161_v18  ;;  %777 = vmatpush1.bf16.msra.mxu0 %v1767_v33  ;;  %1677 = vmatpush3.bf16.msra.mxu1 %v1780_v47 }
  0xeb   : > { %778 = vmatprep.subr.bf16.mxu0 %v1768_v35 }
  0xec   : > { %v2168_v13 = vsub.f32 %v2100_v14, %v409_v25  ;;  %465 = vadd.xlane.f32.xlu1 %v438_v19  ;;  %467 = vadd.xlane.f32.xlu0 %v439_v26  ;;  %v2171_v31 = vsub.f32 %v2103_v15, %v410_v27  ;;  %v1771_v15 = vld [vmem:[#allocation4 + $0x30] ss:$12 sps:$4 sm:$0xff]   ;;  %v2183_v25 = vld [vmem:[%s2357_s1] ss:$0 sm:$0xff] }
  0xee   : > { %v441_v34 = vmul.f32 %v2168_v13, %v2168_v13  ;;  %v442_v14 = vmul.f32 %v2171_v31, %v2171_v31  ;;  %779 = vmatpush1.bf16.msra.mxu0 %v1771_v15  ;;  %v2190_v15 = vld [vmem:[%s2358_s2] ss:$0 sm:$0xff] }
  0xef   : > { %780 = vmatprep.subr.bf16.mxu0 %v1772_v39 }
  0xf0   : > { %469 = vadd.xlane.f32.xlu1 %v440_v32  ;;  %471 = vadd.xlane.f32.xlu0 %v441_v34 }
  0xf2   : > { %781 = vmatpush1.bf16.msra.mxu0 %v1775_v41 }
  0xf3   : > { %782 = vmatprep.subr.bf16.mxu0 %v1776_v42 }
  0xf4   : > { %473 = vadd.xlane.f32.xlu1 %v442_v14 }
  0xf6   : > { %783 = vmatpush1.bf16.msra.mxu0 %v1779_v44 }
 0x15d   : > { %v444_v49 = vpop.xlane.xlu0 %443 }
 0x15e   : > { %v475_v50 = vmul.f32 0.0078125, %v444_v49 }
 0x160   : > { %v491_v51 = vadd.f32 1e-05, %v475_v50 }
 0x161   : > { %v446_v52 = vpop.xlane.xlu1 %445  ;;  %v448_v53 = vpop.xlane.xlu0 %447 }
 0x162   : > { %1781 = vrsqrt.f32 %v491_v51  ;;  %v476_v54 = vmul.f32 0.0078125, %v446_v52  ;;  %v477_v55 = vmul.f32 0.0078125, %v448_v53 }
 0x164   : > { %v492_v58 = vadd.f32 1e-05, %v476_v54  ;;  %v493_v59 = vadd.f32 1e-05, %v477_v55 }
 0x165   : > { %v450_v60 = vpop.xlane.xlu1 %449  ;;  %v452_v61 = vpop.xlane.xlu0 %451 }
 0x166   : > { %1783 = vrsqrt.f32 %v492_v58  ;;  %v478_v62 = vmul.f32 0.0078125, %v450_v60  ;;  %v479_v63 = vmul.f32 0.0078125, %v452_v61 }
 0x167   : > { %1785 = vrsqrt.f32 %v493_v59 }
 0x168   : > { %v494_v0 = vadd.f32 1e-05, %v478_v62  ;;  %v495_v1 = vadd.f32 1e-05, %v479_v63 }
 0x169   : > { %v454_v4 = vpop.xlane.xlu1 %453  ;;  %v456_v5 = vpop.xlane.xlu0 %455 }
 0x16a   : > { %1787 = vrsqrt.f32 %v494_v0  ;;  %v480_v6 = vmul.f32 0.0078125, %v454_v4  ;;  %v481_v7 = vmul.f32 0.0078125, %v456_v5 }
 0x16b   : > { %1789 = vrsqrt.f32 %v495_v1 }
 0x16c   : > { %v496_v8 = vadd.f32 1e-05, %v480_v6  ;;  %v497_v9 = vadd.f32 1e-05, %v481_v7 }
 0x16d   : > { %v458_v16 = vpop.xlane.xlu1 %457  ;;  %v460_v10 = vpop.xlane.xlu0 %459 }
 0x16e   : > { %1791 = vrsqrt.f32 %v496_v8  ;;  %v482_v17 = vmul.f32 0.0078125, %v458_v16  ;;  %v483_v19 = vmul.f32 0.0078125, %v460_v10 }
 0x16f   : > { %v1782_v20 = vpop.eup %1781  ;;  %1793 = vrsqrt.f32 %v497_v9 }
 0x170   : > { %v498_v21 = vadd.f32 1e-05, %v482_v17  ;;  %v499_v24 = vadd.f32 1e-05, %v483_v19  ;;  %v523_v26 = vmul.f32 %v1782_v20, %v2107_v22 }
 0x171   : > { %v462_v27 = vpop.xlane.xlu1 %461  ;;  %v464_v12 = vpop.xlane.xlu0 %463 }
 0x172   : > { %1795 = vrsqrt.f32 %v498_v21  ;;  %v484_v28 = vmul.f32 0.0078125, %v462_v27  ;;  %v485_v32 = vmul.f32 0.0078125, %v464_v12  ;;  %v545_v34 = vmul.f32 %v2183_v25, %v523_v26 }
 0x173   : > { %v1784_v33 = vpop.eup %1783  ;;  %1797 = vrsqrt.f32 %v499_v24 }
 0x174   : > { %v1786_v35 = vpop.eup %1785  ;;  %v500_v36 = vadd.f32 1e-05, %v484_v28  ;;  %v501_v14 = vadd.f32 1e-05, %v485_v32  ;;  %v524_v39 = vmul.f32 %v1784_v33, %v2113_v29  ;;  %v567_v49 = vadd.f32 %v2190_v15, %v545_v34 }
 0x175   : > { %v466_v22 = vpop.xlane.xlu1 %465  ;;  %v468_v40 = vpop.xlane.xlu0 %467  ;;  %v525_v41 = vmul.f32 %v1786_v35, %v2109_v23 }
 0x176   : > { %1799 = vrsqrt.f32 %v500_v36  ;;  %v486_v42 = vmul.f32 0.0078125, %v466_v22  ;;  %v487_v43 = vmul.f32 0.0078125, %v468_v40  ;;  %v546_v44 = vmul.f32 %v2183_v25, %v524_v39 }
 0x177   : > { %v1788_v47 = vpop.eup %1787  ;;  %1801 = vrsqrt.f32 %v501_v14  ;;  %v547_v23 = vmul.f32 %v2183_v25, %v525_v41 }
 0x178   : > { %v1790_v50 = vpop.eup %1789  ;;  %v502_v51 = vadd.f32 1e-05, %v486_v42  ;;  %v503_v52 = vadd.f32 1e-05, %v487_v43  ;;  %v568_v53 = vadd.f32 %v2190_v15, %v546_v44  ;;  %v526_v29 = vmul.f32 %v1788_v47, %v2115_v30 }
 0x179   : > { %v470_v54 = vpop.xlane.xlu1 %469  ;;  %v472_v55 = vpop.xlane.xlu0 %471  ;;  %v527_v58 = vmul.f32 %v1790_v50, %v2121_v37  ;;  %v569_v37 = vadd.f32 %v2190_v15, %v547_v23 }
 0x17a   : > { %1803 = vrsqrt.f32 %v502_v51  ;;  %v488_v59 = vmul.f32 0.0078125, %v470_v54  ;;  %v489_v60 = vmul.f32 0.0078125, %v472_v55  ;;  %v583_v61 = vpack.c.bf16 %v568_v53, %v567_v49 }
 0x17b   : > { %v1792_v62 = vpop.eup %1791  ;;  %1805 = vrsqrt.f32 %v503_v52  ;;  %v548_v63 = vmul.f32 %v2183_v25, %v526_v29  ;;  %v549_v5 = vmul.f32 %v2183_v25, %v527_v58 }
 0x17c   : > { %v1794_v0 = vpop.eup %1793  ;;  %v504_v1 = vadd.f32 1e-05, %v488_v59  ;;  %v505_v4 = vadd.f32 1e-05, %v489_v60  ;;  %801 = vmatmul.mubr.bf16.vlgmr.msra.gmra.mxu0 %v583_v61  ;;  %1678 = vmatprep.mubr.bf16.mxu1 %v583_v61  ;;  %v528_v30 = vmul.f32 %v1792_v62, %v2123_v38 }
 0x17d   : > { %v474_v6 = vpop.xlane.xlu1 %473  ;;  %v570_v7 = vadd.f32 %v2190_v15, %v548_v63  ;;  %810 = vmatprep.mubr.bf16.mxu0 %v1913_v48  ;;  %v529_v8 = vmul.f32 %v1794_v0, %v2129_v45  ;;  %v571_v21 = vadd.f32 %v2190_v15, %v549_v5  ;;  %v623_v63 = vld [vmem:[%s2360_s4] sm:$0x7] }
 0x17e   : > { %1807 = vrsqrt.f32 %v504_v1  ;;  %v490_v9 = vmul.f32 0.0078125, %v474_v6  ;;  %v550_v16 = vmul.f32 %v2183_v25, %v528_v30 }
 0x17f   : > { %v1796_v10 = vpop.eup %1795  ;;  %1809 = vrsqrt.f32 %v505_v4  ;;  %v584_v17 = vpack.c.bf16 %v570_v7, %v569_v37  ;;  %v551_v38 = vmul.f32 %v2183_v25, %v529_v8 }
 0x180   : > { %v1798_v19 = vpop.eup %1797  ;;  %v506_v20 = vadd.f32 1e-05, %v490_v9  ;;  %v572_v24 = vadd.f32 %v2190_v15, %v550_v16  ;;  %v530_v26 = vmul.f32 %v1796_v10, %v2131_v46 }
 0x181   : > { %1679 = vmatmul.mubr.bf16.vlgmr.msra.gmra.mxu1 %v584_v17  ;;  %v531_v45 = vmul.f32 %v1798_v19, %v2138_v56  ;;  %v573_v32 = vadd.f32 %v2190_v15, %v551_v38 }
 0x182   : > { %1811 = vrsqrt.f32 %v506_v20  ;;  %v585_v27 = vpack.c.bf16 %v572_v24, %v571_v21  ;;  %v552_v12 = vmul.f32 %v2183_v25, %v530_v26 }
 0x183   : > { %v1800_v28 = vpop.eup %1799  ;;  %v553_v36 = vmul.f32 %v2183_v25, %v531_v45 }
 0x184   : > { %v1802_v33 = vpop.eup %1801  ;;  %811 = vmatmul.mubr.bf16.gmra.mxu0 %v584_v17  ;;  %1682 = vmatprep.mubr.bf16.mxu1 %v585_v27  ;;  %v574_v34 = vadd.f32 %v2190_v15, %v552_v12  ;;  %v532_v35 = vmul.f32 %v1800_v28, %v2141_v57 }
 0x185   : > { %820 = vmatprep.mubr.bf16.mxu0 %v1913_v48  ;;  %v533_v46 = vmul.f32 %v1802_v33, %v2148_v2  ;;  %v575_v41 = vadd.f32 %v2190_v15, %v553_v36 }
 0x186   : > { %v586_v56 = vpack.c.bf16 %v574_v34, %v573_v32  ;;  %v554_v14 = vmul.f32 %v2183_v25, %v532_v35 }
 0x187   : > { %v1804_v39 = vpop.eup %1803  ;;  %v555_v22 = vmul.f32 %v2183_v25, %v533_v46 }
 0x188   : > { %v1806_v40 = vpop.eup %1805  ;;  %v576_v42 = vadd.f32 %v2190_v15, %v554_v14  ;;  %v534_v43 = vmul.f32 %v1804_v39, %v2151_v3 }
 0x189   : > { %1683 = vmatmul.mubr.bf16.gmra.mxu1 %v586_v56  ;;  %v535_v57 = vmul.f32 %v1806_v40, %v2158_v11  ;;  %v577_v49 = vadd.f32 %v2190_v15, %v555_v22 }
 0x18a   : > { %v587_v44 = vpack.c.bf16 %v576_v42, %v575_v41  ;;  %v556_v47 = vmul.f32 %v2183_v25, %v534_v43 }
 0x18b   : > { %v1808_v2 = vpop.eup %1807  ;;  %v557_v53 = vmul.f32 %v2183_v25, %v535_v57 }
 0x18c   : > { %v1810_v50 = vpop.eup %1809  ;;  %821 = vmatmul.mubr.bf16.gmra.mxu0 %v585_v27  ;;  %1686 = vmatprep.mubr.bf16.mxu1 %v587_v44  ;;  %v578_v51 = vadd.f32 %v2190_v15, %v556_v47  ;;  %v536_v52 = vmul.f32 %v1808_v2, %v2161_v18 }
 0x18d   : > { %830 = vmatprep.mubr.bf16.mxu0 %v1913_v48  ;;  %v537_v3 = vmul.f32 %v1810_v50, %v2168_v13  ;;  %v579_v55 = vadd.f32 %v2190_v15, %v557_v53 }
 0x18e   : > { %v588_v11 = vpack.c.bf16 %v578_v51, %v577_v49  ;;  %v558_v29 = vmul.f32 %v2183_v25, %v536_v52 }
 0x18f   : > { %v1812_v54 = vpop.eup %1811  ;;  %v559_v59 = vmul.f32 %v2183_v25, %v537_v3 }
 0x190   : > { %v580_v23 = vadd.f32 %v2190_v15, %v558_v29  ;;  %v538_v58 = vmul.f32 %v1812_v54, %v2171_v31  ;;  %v625_v31 = vlaneseq }
 0x191   : > { %1687 = vmatmul.mubr.bf16.gmra.mxu1 %v588_v11  ;;  %v581_v13 = vadd.f32 %v2190_v15, %v559_v59 }
 0x192   : > { %v589_v18 = vpack.c.bf16 %v580_v23, %v579_v55  ;;  %v560_v60 = vmul.f32 %v2183_v25, %v538_v58  ;;  %v626_v25 = vshrl.u32 %v625_v31, 7 }
 0x194   : > { %831 = vmatmul.mubr.bf16.gmra.mxu0 %v586_v56  ;;  %1690 = vmatprep.mubr.bf16.mxu1 %v589_v18  ;;  %v582_v61 = vadd.f32 %v2190_v15, %v560_v60  ;;  %v627_v15 = vsub.s32 0, %v626_v25  ;;  %v631_v0 = vsub.s32 1, %v626_v25  ;;  %v635_v5 = vsub.s32 2, %v626_v25 }
 0x195   : > { %840 = vmatprep.mubr.bf16.mxu0 %v1913_v48 }
 0x196   : > { %v590_v62 = vpack.c.bf16 %v582_v61, %v581_v13  ;;  %v2250_v4 = vrot.slane %v623_v63, %v627_v15  ;;  %v2252_v6 = vrot.slane %v623_v63, %v631_v0  ;;  %v2261_v9 = vrot.slane %v623_v63, %v635_v5 }
 0x199   : > { %1691 = vmatmul.mubr.bf16.gmra.mxu1 %v590_v62 }
 0x19c   : > { %841 = vmatmul.mubr.bf16.gmra.mxu0 %v587_v44 }
 0x19d   : > { %850 = vmatprep.mubr.bf16.mxu0 %v1913_v48 }
 0x1a4   : > { %851 = vmatmul.mubr.bf16.gmra.mxu0 %v588_v11 }
 0x1a5   : > { %860 = vmatprep.mubr.bf16.mxu0 %v1913_v48 }
 0x1ac   : > { %861 = vmatmul.mubr.bf16.gmra.mxu0 %v589_v18 }
 0x1ad   : > { %870 = vmatprep.mubr.bf16.mxu0 %v1913_v48 }
 0x1b4   : > { %871 = vmatmul.mubr.bf16.gmra.mxu0 %v590_v62 }
 0x23c   : > { %v802_v1 = vpop.f32.mrf.mxu0 }
 0x23d   : > { %v803_v37 = vadd.f32 %v802_v1, %v2250_v4 }
 0x23e   : > { %v804_v30 = vpop.f32.mrf.mxu0 }
 0x23f   : > { %v805_v10 = vadd.f32 %v804_v30, %v2252_v6 }
 0x240   : > { %v806_v48 = vpop.f32.mrf.mxu0 }
 0x241   : > { %v807_v7 = vadd.f32 %v806_v48, %v2250_v4  ;;  %v1680_v8 = vpop.f32.mrf.mxu1 }
 0x242   : > { %v808_v16 = vpop.f32.mrf.mxu0  ;;  %v924_v26 = vadd.f32 %v1680_v8, %v2261_v9 }
 0x243   : > { %v1508_v17 = vpack.c.bf16 %v807_v7, %v803_v37  ;;  %v809_v38 = vadd.f32 %v808_v16, %v2252_v6  ;;  %v915_v19 = vpop.f32.mrf.mxu1 }
 0x244   : > { %v812_v20 = vpop.f32.mrf.mxu0  ;;  %v916_v28 = vadd.f32 %v915_v19, %v2261_v9 }
 0x245   : > { %1509 = vst [vmem:[%s2259_s24] sm:$0xff] %v1508_v17   ;;  %v1548_v21 = vpack.c.bf16 %v809_v38, %v805_v10  ;;  %v1681_v24 = vpop.f32.mrf.mxu1  ;;  %v813_v35 = vadd.f32 %v812_v20, %v2250_v4 }
 0x246   : > { %v927_v45 = vadd.f32 %v1681_v24, %v2261_v9  ;;  %v814_v27 = vpop.f32.mrf.mxu0 }
 0x247   : > { %1549 = vst [vmem:[%s2268_s16] sm:$0xff] %v1548_v21   ;;  %v918_v12 = vpop.f32.mrf.mxu1  ;;  %v815_v39 = vadd.f32 %v814_v27, %v2252_v6 }
 0x248   : > { %v1593_v32 = vpack.c.bf16 %v927_v45, %v924_v26  ;;  %v919_v33 = vadd.f32 %v918_v12, %v2261_v9  ;;  %v816_v34 = vpop.f32.mrf.mxu0 }
 0x249   : > { %v817_v36 = vadd.f32 %v816_v34, %v2250_v4  ;;  %v1684_v46 = vpop.f32.mrf.mxu1 }
 0x24a   : > { %1639 = vst [vmem:[%s2277_s19 + $0x8] sm:$0xff] %v1593_v32   ;;  %v1588_v56 = vpack.c.bf16 %v919_v33, %v916_v28  ;;  %v818_v14 = vpop.f32.mrf.mxu0  ;;  %v940_v44 = vadd.f32 %v1684_v46, %v2261_v9 }
 0x24b   : > { %v1513_v22 = vpack.c.bf16 %v817_v36, %v813_v35  ;;  %v819_v40 = vadd.f32 %v818_v14, %v2252_v6  ;;  %v931_v41 = vpop.f32.mrf.mxu1 }
 0x24c   : > { %1589 = vst [vmem:[%s2277_s19] sm:$0xff] %v1588_v56   ;;  %v822_v42 = vpop.f32.mrf.mxu0  ;;  %v932_v50 = vadd.f32 %v931_v41, %v2261_v9 }
 0x24d   : > { %1625 = vst [vmem:[%s2259_s24 + $0x8] sm:$0xff] %v1513_v22   ;;  %v1553_v43 = vpack.c.bf16 %v819_v40, %v815_v39  ;;  %v1685_v57 = vpop.f32.mrf.mxu1  ;;  %v823_v3 = vadd.f32 %v822_v42, %v2250_v4 }
 0x24e   : > { %v943_v47 = vadd.f32 %v1685_v57, %v2261_v9  ;;  %v824_v2 = vpop.f32.mrf.mxu0 }
 0x24f   : > { %1632 = vst [vmem:[%s2268_s16 + $0x8] sm:$0xff] %v1553_v43   ;;  %v934_v49 = vpop.f32.mrf.mxu1  ;;  %v825_v23 = vadd.f32 %v824_v2, %v2252_v6 }
 0x250   : > { %v1603_v51 = vpack.c.bf16 %v943_v47, %v940_v44  ;;  %v935_v52 = vadd.f32 %v934_v49, %v2261_v9  ;;  %v826_v53 = vpop.f32.mrf.mxu0 }
 0x251   : > { %v827_v11 = vadd.f32 %v826_v53, %v2250_v4  ;;  %v1688_v29 = vpop.f32.mrf.mxu1 }
 0x252   : > { %1641 = vst [vmem:[%s2277_s19 + $0x18] sm:$0xff] %v1603_v51   ;;  %v1598_v54 = vpack.c.bf16 %v935_v52, %v932_v50  ;;  %v828_v55 = vpop.f32.mrf.mxu0  ;;  %v956_v62 = vadd.f32 %v1688_v29, %v2261_v9 }
 0x253   : > { %v1518_v58 = vpack.c.bf16 %v827_v11, %v823_v3  ;;  %v829_v59 = vadd.f32 %v828_v55, %v2252_v6  ;;  %v947_v18 = vpop.f32.mrf.mxu1 }
 0x254   : > { %1640 = vst [vmem:[%s2277_s19 + $0x10] sm:$0xff] %v1598_v54   ;;  %v832_v60 = vpop.f32.mrf.mxu0  ;;  %v948_v63 = vadd.f32 %v947_v18, %v2261_v9 }
 0x255   : > { %1626 = vst [vmem:[%s2259_s24 + $0x10] sm:$0xff] %v1518_v58   ;;  %v1558_v13 = vpack.c.bf16 %v829_v59, %v825_v23  ;;  %v1689_v61 = vpop.f32.mrf.mxu1  ;;  %v833_v5 = vadd.f32 %v832_v60, %v2250_v4 }
 0x256   : > { %v959_v31 = vadd.f32 %v1689_v61, %v2261_v9  ;;  %v834_v25 = vpop.f32.mrf.mxu0 }
 0x257   : > { %1633 = vst [vmem:[%s2268_s16 + $0x10] sm:$0xff] %v1558_v13   ;;  %v950_v15 = vpop.f32.mrf.mxu1  ;;  %v835_v16 = vadd.f32 %v834_v25, %v2252_v6 }
 0x258   : > { %v1613_v0 = vpack.c.bf16 %v959_v31, %v956_v62  ;;  %v951_v1 = vadd.f32 %v950_v15, %v2261_v9  ;;  %v836_v30 = vpop.f32.mrf.mxu0 }
 0x259   : > { %v837_v48 = vadd.f32 %v836_v30, %v2250_v4  ;;  %v1692_v37 = vpop.f32.mrf.mxu1 }
 0x25a   : > { %1643 = vst [vmem:[%s2277_s19 + $0x28] sm:$0xff] %v1613_v0   ;;  %v1608_v7 = vpack.c.bf16 %v951_v1, %v948_v63  ;;  %v838_v8 = vpop.f32.mrf.mxu0  ;;  %v972_v24 = vadd.f32 %v1692_v37, %v2261_v9 }
 0x25b   : > { %v1523_v10 = vpack.c.bf16 %v837_v48, %v833_v5  ;;  %v839_v17 = vadd.f32 %v838_v8, %v2252_v6  ;;  %v963_v38 = vpop.f32.mrf.mxu1 }
 0x25c   : > { %1642 = vst [vmem:[%s2277_s19 + $0x20] sm:$0xff] %v1608_v7   ;;  %v842_v19 = vpop.f32.mrf.mxu0  ;;  %v964_v12 = vadd.f32 %v963_v38, %v2261_v9 }
 0x25d   : > { %1627 = vst [vmem:[%s2259_s24 + $0x18] sm:$0xff] %v1523_v10   ;;  %v1563_v20 = vpack.c.bf16 %v839_v17, %v835_v16  ;;  %v1693_v21 = vpop.f32.mrf.mxu1  ;;  %v843_v34 = vadd.f32 %v842_v19, %v2250_v4 }
 0x25e   : > { %v975_v26 = vadd.f32 %v1693_v21, %v2261_v9  ;;  %v844_v45 = vpop.f32.mrf.mxu0 }
 0x25f   : > { %1634 = vst [vmem:[%s2268_s16 + $0x18] sm:$0xff] %v1563_v20   ;;  %v966_v27 = vpop.f32.mrf.mxu1  ;;  %v845_v56 = vadd.f32 %v844_v45, %v2252_v6 }
 0x260   : > { %v1623_v28 = vpack.c.bf16 %v975_v26, %v972_v24  ;;  %v967_v32 = vadd.f32 %v966_v27, %v2261_v9  ;;  %v846_v33 = vpop.f32.mrf.mxu0 }
 0x261   : > { %v847_v35 = vadd.f32 %v846_v33, %v2250_v4 }
 0x262   : > { %1645 = vst [vmem:[%s2277_s19 + $0x38] sm:$0xff] %v1623_v28   ;;  %v1618_v36 = vpack.c.bf16 %v967_v32, %v964_v12  ;;  %v848_v46 = vpop.f32.mrf.mxu0 }
 0x263   : > { %v1528_v14 = vpack.c.bf16 %v847_v35, %v843_v34  ;;  %v849_v39 = vadd.f32 %v848_v46, %v2252_v6 }
 0x264   : > { %1644 = vst [vmem:[%s2277_s19 + $0x30] sm:$0xff] %v1618_v36   ;;  %v852_v22 = vpop.f32.mrf.mxu0 }
 0x265   : > { %1628 = vst [vmem:[%s2259_s24 + $0x20] sm:$0xff] %v1528_v14   ;;  %v1568_v40 = vpack.c.bf16 %v849_v39, %v845_v56  ;;  %v853_v42 = vadd.f32 %v852_v22, %v2250_v4 }
 0x266   : > { %v854_v9 = vpop.f32.mrf.mxu0 }
 0x267   : > { %1635 = vst [vmem:[%s2268_s16 + $0x20] sm:$0xff] %v1568_v40   ;;  %v855_v44 = vadd.f32 %v854_v9, %v2252_v6 }
 0x268   : > { %v856_v41 = vpop.f32.mrf.mxu0 }
 0x269   : > { %v857_v43 = vadd.f32 %v856_v41, %v2250_v4 }
 0x26a   : > { %v858_v57 = vpop.f32.mrf.mxu0 }
 0x26b   : > { %v1533_v47 = vpack.c.bf16 %v857_v43, %v853_v42  ;;  %v859_v2 = vadd.f32 %v858_v57, %v2252_v6 }
 0x26c   : > { %v862_v49 = vpop.f32.mrf.mxu0 }
 0x26d   : > { %1629 = vst [vmem:[%s2259_s24 + $0x28] sm:$0xff] %v1533_v47   ;;  %v1573_v50 = vpack.c.bf16 %v859_v2, %v855_v44  ;;  %v863_v53 = vadd.f32 %v862_v49, %v2250_v4 }
 0x26e   : > { %v864_v51 = vpop.f32.mrf.mxu0 }
 0x26f   : > { %1636 = vst [vmem:[%s2268_s16 + $0x28] sm:$0xff] %v1573_v50   ;;  %v865_v29 = vadd.f32 %v864_v51, %v2252_v6 }
 0x270   : > { %v866_v52 = vpop.f32.mrf.mxu0 }
 0x271   : > { %v867_v3 = vadd.f32 %v866_v52, %v2250_v4 }
 0x272   : > { %v868_v11 = vpop.f32.mrf.mxu0 }
 0x273   : > { %v1538_v54 = vpack.c.bf16 %v867_v3, %v863_v53  ;;  %v869_v55 = vadd.f32 %v868_v11, %v2252_v6 }
 0x274   : > { %v872_v23 = vpop.f32.mrf.mxu0 }
 0x275   : > { %1630 = vst [vmem:[%s2259_s24 + $0x30] sm:$0xff] %v1538_v54   ;;  %v1578_v58 = vpack.c.bf16 %v869_v55, %v865_v29  ;;  %v873_v60 = vadd.f32 %v872_v23, %v2250_v4 }
 0x276   : > { %v874_v59 = vpop.f32.mrf.mxu0 }
 0x277   : > { %1637 = vst [vmem:[%s2268_s16 + $0x30] sm:$0xff] %v1578_v58   ;;  %v875_v62 = vadd.f32 %v874_v59, %v2252_v6 }
 0x278   : > { %v876_v18 = vpop.f32.mrf.mxu0 }
 0x279   : > { %v877_v13 = vadd.f32 %v876_v18, %v2250_v4 }
 0x27a   : > { %v878_v61 = vpop.f32.mrf.mxu0 }
 0x27b   : > { %v1543_v31 = vpack.c.bf16 %v877_v13, %v873_v60  ;;  %v879_v25 = vadd.f32 %v878_v61, %v2252_v6 }
 0x27d   : > { %1631 = vst [vmem:[%s2259_s24 + $0x38] sm:$0xff] %v1543_v31   ;;  %v1583_v15 = vpack.c.bf16 %v879_v25, %v875_v62 }
 0x27f   : > { %1638 = vst [vmem:[%s2268_s16 + $0x38] sm:$0xff] %v1583_v15  }
 0x280 PF: > { %p19_p7 = scmp.ge.s32.totalorder %s2001_s12, 4   ;;  %s2376_s24 = smov %s1897_s25 }
 0x281   : > { %s2377_s25 = smov %s1901_s26  ;;  %s2378_s26 = smov %s2018_s20 }
 0x282   : > { %s2379_s27 = smov %s2001_s12  ;;  %21 = sbr.rel (!%p19_p7) target bundleno = 4 (0x4), region = 108 }
 0x287   :  { %1274 = vsyncpa [#allocation3], 1 }
 0x288   :  { %1276 = vsyncpa [#allocation3 + $0x1], 1 }
 0x289   :  { %1277 = vsyncpa [#allocation5], 1 }

// kernel: encoder_layer.5
= control target key start
LH: loop header
LB: loop body
LE: loop exit
PB: predicated region body
PF: predicated region fallthrough
CT: control target
= control target key end

     0   :  { %s3040_s0 = inlined_call_operand.vmem [shape: bf16[256,128], index: 0, kind: input, shape index: {}]   ;;  %s3041_s1 = inlined_call_operand.vmem [shape: f32[256,128], index: 1, kind: input, shape index: {}]   ;;  %s3042_s2 = inlined_call_operand.vmem [shape: bf16[128,128], index: 2, kind: input, shape index: {}]   ;;  %s3043_s3 = inlined_call_operand.vmem [shape: f32[1,128], index: 3, kind: input, shape index: {}]   ;;  %s3044_s4 = inlined_call_operand.vmem [shape: f32[1,128], index: 4, kind: input, shape index: {}]   ;;  %s3045_s5 = inlined_call_operand.vmem [shape: f32[1,128], index: 5, kind: input, shape index: {}]   ;;  %s3046_s6 = inlined_call_operand.vmem [shape: bf16[128,256], index: 6, kind: input, shape index: {}]   ;;  %s3047_s7 = inlined_call_operand.vmem [shape: f32[1,256], index: 7, kind: input, shape index: {}]   ;;  %s3048_s8 = inlined_call_operand.vmem [shape: bf16[256,128], index: 8, kind: input, shape index: {}]   ;;  %s3049_s9 = inlined_call_operand.vmem [shape: f32[1,128], index: 9, kind: input, shape index: {}]   ;;  %s3050_s10 = inlined_call_operand.hbm [shape: f32[256,128], index: 10, kind: output, shape index: {}]  }
   0x1   :  { %3052 = sst [smem:[#allocation6_spill]] %s3040_s0 }
   0x2   :  { %15 = vsyncpa [#allocation4], 0 }
   0x3   :  { %17 = vsyncpa [#allocation4 + $0x1], 0  ;;  %s2390_s13 = smov 0   ;;  %s2392_s14 = smov 0  }
   0x4   :  { %s2394_s15 = smov 0   ;;  %s2396_s16 = smov 0  }
   0x5   :  { %s2398_s17 = smov 0   ;;  %s2400_s18 = smov 0  }
   0x6 LB: > { %s1813_s19 = sadd.s32 4294967295, %s2329_s18   ;;  %s1814_s20 = sadd.s32 4294967294, %s2329_s18   ;;  %s2329_s18 = sphi %s2400_s18, %s23_s18   ;;  %s2325_s17 = sphi %s2398_s17, %s3061_s17   ;;  %s2321_s16 = sphi %s2396_s16, %s3060_s16   ;;  %s2317_s15 = sphi %s2394_s15, %s3059_s15   ;;  %s2313_s14 = sphi %s2392_s14, %s3058_s14   ;;  %s2309_s13 = sphi %s2390_s13, %s3057_s13  }
   0x7   : > { %s35_s21 = sadd.s32 1, %s2325_s17  ;;  %s277_s22 = sadd.s32 1, %s2317_s15 }
   0x8   : > { %p37_p0 = scmp.ge.s32.totalorder %s35_s21, 2  ;;  %p287_p1 = scmp.ne.s32.totalorder %s2317_s15, %s2313_s14 }
   0x9   : > { %p288_p2 = scmp.eq.s32.totalorder %s1813_s19, 1  ;;  %p293_p3 = scmp.ne.s32.totalorder %s2313_s14, %s2309_s13 }
   0xa   : > { %s3063_s21 = smov (%p37_p0, %s35_s21), 0  ;;  %p294_p5 = scmp.eq.s32.totalorder %s1814_s20, 1 }
   0xb   : > { %p2430_p4 = por %p288_p2, %p287_p1  ;;  %s274_s24 = ssub.s32 %s2325_s17, %s3063_s21 }
   0xc   : > { %p1820_p6 = scmp.ge.s32.totalorder %s2329_s18, 1  ;;  %p275_p7 = scmp.eq.s32.totalorder %s274_s24, 0 }
   0xd   : > { %p2437_p8 = por %p294_p5, %p293_p3  ;;  %p371_p9 = scmp.lt.s32.totalorder %s2329_s18, 3 }
   0xe   : > { %s2443_s26 = scalar_select %p275_p7, %s2317_s15, %s277_s22  }
   0xf   : > { %p372_p10 = pnand %p1820_p6, %p371_p9 }
  0x10   : > { %s1822_s29 = sshll.u32 (!%p372_p10), %s2321_s16, 4  ;;  %s3055_s0 = sld [smem:[#allocation6_spill]] (!%p372_p10) }
  0x11   : > { %375 = sbr.rel (%p372_p10) target bundleno = 1053 (0x41d), region = 60  ;;  %p429_p11 = scmp.lt.s32.totalorder (!%p372_p10), %s1822_s29, 31 }
  0x12   : > { %s3051_s22 = sand.u32 (!%p372_p10), 1, %s2313_s14   ;;  %s1923_s28 = sshll.u32 (!%p372_p10), %s2321_s16, 11 }
  0x13   : > { %s3056_s30 = sand.u32 (!%p372_p10), 1, %s2313_s14   ;;  %s2332_s19 = smov (!%p372_p10), [#allocation3]  }
  0x14   : > { %s2995_s12 = scalar_lea.sflag (!%p372_p10), [#allocation4], %s3056_s30 }
  0x16   : > { %v2157_v0 = vld [vmem:[%s3042_s2 + $0x38] sm:$0xff]   ;;  %v2158_v1 = vld [vmem:[%s3042_s2 + $0x30] sm:$0xff]   ;;  %s3065_s29 = smov (!%p429_p11, %s1822_s29), 31  ;;  %v2159_v2 = vld [vmem:[%s3042_s2 + $0x28] sm:$0xff]  }
  0x17   : > { %2051 = vmatprep.subr.bf16.mxu0 %v2157_v0  ;;  %s1823_s20 = sshll.u32 %s3065_s29, 2  ;;  %v2160_v3 = vld [vmem:[%s3042_s2 + $0x20] sm:$0xff]   ;;  %v2161_v5 = vld [vmem:[%s3042_s2 + $0x18] sm:$0xff]   ;;  %v2162_v6 = vld [vmem:[%s3042_s2 + $0x10] sm:$0xff]   ;;  %s1825_s11 = sshll.u32 %s3065_s29, 3 }
  0x18   : > { %2052 = vmatpush3.bf16.msra.mxu0 %v2157_v0  ;;  %s2461_s27 = scalar_lea.vmem %s3055_s0, %s1823_s20  ;;  %v2163_v7 = vld [vmem:[%s3042_s2 + $0x8] sm:$0xff]   ;;  %v2164_v8 = vld [vmem:[%s3042_s2] sm:$0xff]   ;;  %s2490_s20 = scalar_lea.vmem %s3041_s1, %s1825_s11 }
  0x19   : > { %2053 = vmatprep.subr.bf16.mxu0 %v2158_v1  ;;  %v2165_v4 = vld [vmem:[%s2461_s27] sm:$0xff]   ;;  %v2166_v9 = vld [vmem:[%s2461_s27 + $0x8] sm:$0xff]   ;;  %v2167_v10 = vld [vmem:[%s2461_s27 + $0x10] sm:$0xff]   ;;  %s2988_s29 = scalar_lea.hbm %s3050_s10, %s1923_s28 }
  0x1a   : > { %2067 = vmatprep.mubr.bf16.mxu0 %v2165_v4  ;;  %v2168_v11 = vld [vmem:[%s2461_s27 + $0x18] sm:$0xff]   ;;  %v2169_v12 = vld [vmem:[%s2461_s27 + $0x20] sm:$0xff]   ;;  %v2170_v13 = vld [vmem:[%s2461_s27 + $0x28] sm:$0xff]  }
  0x1b   : > { %v2171_v14 = vld [vmem:[%s2461_s27 + $0x30] sm:$0xff]   ;;  %v2172_v15 = vld [vmem:[%s2461_s27 + $0x38] sm:$0xff]   ;;  %v2496_v16 = vld [vmem:[%s3043_s3] ss:$0 sm:$0xff]  ;;  %s1821_s27 = sshll.u32 %s3051_s22, 7 }
  0x1c   : > { %2054 = vmatpush3.bf16.msra.mxu0 %v2158_v1  ;;  %v697_v18 = vld [vmem:[%s2490_s20 + $0x10] sm:$0xff]  ;;  %v2505_v20 = vld [vmem:[%s3049_s9] ss:$0 sm:$0xff]  ;;  %v698_v26 = vld [vmem:[%s2490_s20 + $0x18] sm:$0xff]  ;;  %s2519_s11 = scalar_lea.vmem [#allocation3], %s1821_s27 }
  0x1d   : > { %2055 = vmatprep.subr.bf16.mxu0 %v2159_v2  ;;  %v695_v22 = vld [vmem:[%s2490_s20] sm:$0xff]  ;;  %v696_v31 = vld [vmem:[%s2490_s20 + $0x8] sm:$0xff]  ;;  %v701_v36 = vld [vmem:[%s2490_s20 + $0x30] sm:$0xff]  ;;  %s1689_s27 = sshll.u32 %s2519_s11, 4  ;;  %s2990_s27 = int_to_ptr.vmem [resolvable:$true] %s1689_s27 }
  0x1e   : > { %v699_v41 = vld [vmem:[%s2490_s20 + $0x20] sm:$0xff]  ;;  %v702_v46 = vld [vmem:[%s2490_s20 + $0x38] sm:$0xff]  ;;  %v700_v51 = vld [vmem:[%s2490_s20 + $0x28] sm:$0xff]  ;;  %s2253_s16 = scalar_lea.vmem %s2990_s27, 2048 }
  0x1f   : > { %v705_v56 = vld [vmem:[%s2490_s20 + $0x50] sm:$0xff]  ;;  %v703_v61 = vld [vmem:[%s2490_s20 + $0x40] sm:$0xff]  ;;  %p2254_p12 = scmp.ne.s32.totalorder %s2990_s27, %s2253_s16 }
  0x20   : > { %2056 = vmatpush3.bf16.msra.mxu0 %v2159_v2  ;;  %v706_v2 = vld [vmem:[%s2490_s20 + $0x58] sm:$0xff] }
  0x21   : > { %2057 = vmatprep.subr.bf16.mxu0 %v2160_v3  ;;  %p2255_p13 = pnand %p2254_p12, %p2430_p4 }
  0x23   : > { %p2256_p0 = pneg %p2255_p13 }
  0x24   : > { %2058 = vmatpush3.bf16.msra.mxu0 %v2160_v3 }
  0x25   : > { %2059 = vmatprep.subr.bf16.mxu0 %v2161_v5 }
  0x28   : > { %2060 = vmatpush3.bf16.msra.mxu0 %v2161_v5 }
  0x29   : > { %2061 = vmatprep.subr.bf16.mxu0 %v2162_v6 }
  0x2c   : > { %2062 = vmatpush3.bf16.msra.mxu0 %v2162_v6 }
  0x2d   : > { %2063 = vmatprep.subr.bf16.mxu0 %v2163_v7 }
  0x30   : > { %2064 = vmatpush3.bf16.msra.mxu0 %v2163_v7  ;;  %v704_v7 = vld [vmem:[%s2490_s20 + $0x48] sm:$0xff] }
  0x31   : > { %2065 = vmatprep.subr.bf16.mxu0 %v2164_v8 }
  0x34   : > { %2066 = vmatpush3.bf16.msra.mxu0 %v2164_v8 }
  0x37   : > { %2068 = vmatmul.mubr.bf16.vlgmr.msra.gmra.mxu0 %v2166_v9 }
  0x38   : > { %2071 = vmatprep.mubr.bf16.mxu0 %v2167_v10 }
  0x3f   : > { %2072 = vmatmul.mubr.bf16.gmra.mxu0 %v2168_v11 }
  0x40   : > { %2075 = vmatprep.mubr.bf16.mxu0 %v2169_v12  ;;  %v709_v12 = vld [vmem:[%s2490_s20 + $0x70] sm:$0xff] }
  0x47   : > { %2076 = vmatmul.mubr.bf16.gmra.mxu0 %v2170_v13 }
  0x48   : > { %2079 = vmatprep.mubr.bf16.mxu0 %v2171_v14 }
  0x4f   : > { %2080 = vmatmul.mubr.bf16.gmra.mxu0 %v2172_v15 }
  0xf7   : > { %v2069_v17 = vpop.f32.mrf.mxu0 }
  0xf8   : > { %v641_v19 = vadd.f32 %v2069_v17, %v2496_v16 }
  0xf9   : > { %v632_v21 = vpop.f32.mrf.mxu0 }
  0xfa   : > { %v2508_v23 = vadd.f32 %v697_v18, %v641_v19  ;;  %v633_v24 = vadd.f32 %v2496_v16, %v632_v21  ;;  %v707_v18 = vld [vmem:[%s2490_s20 + $0x60] sm:$0xff] }
  0xfb   : > { %v2070_v25 = vpop.f32.mrf.mxu0 }
  0xfc   : > { %v1039_v27 = vadd.f32 %v2505_v20, %v2508_v23  ;;  %v2514_v28 = vadd.f32 %v695_v22, %v633_v24  ;;  %v644_v29 = vadd.f32 %v2070_v25, %v2496_v16  ;;  %733 = vadd.xlane.f32.xlu1 %v2508_v23  ;;  %v710_v25 = vld [vmem:[%s2490_s20 + $0x78] sm:$0xff] }
  0xfd   : > { %v635_v30 = vpop.f32.mrf.mxu0 }
  0xfe   : > { %1055 = vst [vmem:[%s2519_s11 + $0x10] sm:$0xff] %v1039_v27  ;;  %v1037_v32 = vadd.f32 %v2505_v20, %v2514_v28  ;;  %v2524_v33 = vadd.f32 %v698_v26, %v644_v29  ;;  %v636_v34 = vadd.f32 %v2496_v16, %v635_v30  ;;  %729 = vadd.xlane.f32.xlu0 %v2514_v28 }
  0xff   : > { %v2073_v35 = vpop.f32.mrf.mxu0 }
 0x100   : > { %1053 = vst [vmem:[%s2519_s11] sm:$0xff] %v1037_v32  ;;  %v1040_v37 = vadd.f32 %v2505_v20, %v2524_v33  ;;  %v2532_v38 = vadd.f32 %v696_v31, %v636_v34  ;;  %v657_v39 = vadd.f32 %v2073_v35, %v2496_v16  ;;  %735 = vadd.xlane.f32.xlu1 %v2524_v33  ;;  %v708_v31 = vld [vmem:[%s2490_s20 + $0x68] sm:$0xff]  ;;  %s2257_s20 = sshll.u32 %s2332_s19, 4  ;;  %s2258_s20 = int_to_ptr.vmem [resolvable:$false] %s2257_s20 }
 0x101   : > { %v648_v40 = vpop.f32.mrf.mxu0  ;;  %s2259_s24 = scalar_lea.vmem %s2258_s20, 4096  ;;  %p2260_p1 = scmp.lt.s32.totalorder %s2990_s27, %s2258_s20 }
 0x102   : > { %1056 = vst [vmem:[%s2519_s11 + $0x18] sm:$0xff] %v1040_v37  ;;  %v1038_v42 = vadd.f32 %v2505_v20, %v2532_v38  ;;  %v2540_v43 = vadd.f32 %v701_v36, %v657_v39  ;;  %v649_v44 = vadd.f32 %v2496_v16, %v648_v40  ;;  %731 = vadd.xlane.f32.xlu0 %v2532_v38  ;;  %p2261_p2 = scmp.lt.s32.totalorder %s2259_s24, %s2253_s16 }
 0x103   : > { %v2074_v45 = vpop.f32.mrf.mxu0 }
 0x104   : > { %1054 = vst [vmem:[%s2519_s11 + $0x8] sm:$0xff] %v1038_v42  ;;  %v1043_v47 = vadd.f32 %v2505_v20, %v2540_v43  ;;  %v2548_v48 = vadd.f32 %v699_v41, %v649_v44  ;;  %v660_v49 = vadd.f32 %v2074_v45, %v2496_v16  ;;  %p2262_p3 = por %p2261_p2, %p2260_p1 }
 0x105   : > { %v651_v50 = vpop.f32.mrf.mxu0 }
 0x106   : > { %1059 = vst [vmem:[%s2519_s11 + $0x30] sm:$0xff] %v1043_v47  ;;  %v1041_v52 = vadd.f32 %v2505_v20, %v2548_v48  ;;  %v2555_v53 = vadd.f32 %v702_v46, %v660_v49  ;;  %v652_v54 = vadd.f32 %v2496_v16, %v651_v50  ;;  %737 = vadd.xlane.f32.xlu0 %v2548_v48  ;;  %p2263_p5 = pnand %p2262_p3, %p2256_p0 }
 0x107   : > { %v2077_v55 = vpop.f32.mrf.mxu0 }
 0x108   : > { %1057 = vst [vmem:[%s2519_s11 + $0x20] sm:$0xff] %v1041_v52  ;;  %v1044_v57 = vadd.f32 %v2505_v20, %v2555_v53  ;;  %v2563_v58 = vadd.f32 %v700_v51, %v652_v54  ;;  %v673_v59 = vadd.f32 %v2077_v55, %v2496_v16 }
 0x109   : > { %v664_v60 = vpop.f32.mrf.mxu0 }
 0x10a   : > { %1060 = vst [vmem:[%s2519_s11 + $0x38] sm:$0xff] %v1044_v57  ;;  %v1042_v62 = vadd.f32 %v2505_v20, %v2563_v58  ;;  %v2570_v63 = vadd.f32 %v705_v56, %v673_v59  ;;  %v665_v0 = vadd.f32 %v2496_v16, %v664_v60  ;;  %739 = vadd.xlane.f32.xlu1 %v2563_v58 }
 0x10b   : > { %741 = vadd.xlane.f32.xlu0 %v2540_v43  ;;  %v2078_v1 = vpop.f32.mrf.mxu0 }
 0x10c   : > { %1058 = vst [vmem:[%s2519_s11 + $0x28] sm:$0xff] %v1042_v62  ;;  %v1047_v3 = vadd.f32 %v2505_v20, %v2570_v63  ;;  %v2579_v4 = vadd.f32 %v703_v61, %v665_v0  ;;  %v676_v5 = vadd.f32 %v2078_v1, %v2496_v16 }
 0x10d   : > { %v667_v6 = vpop.f32.mrf.mxu0 }
 0x10e   : > { %1063 = vst [vmem:[%s2519_s11 + $0x50] sm:$0xff] %v1047_v3  ;;  %v1045_v8 = vadd.f32 %v2505_v20, %v2579_v4  ;;  %v2586_v9 = vadd.f32 %v706_v2, %v676_v5  ;;  %v668_v10 = vadd.f32 %v2496_v16, %v667_v6  ;;  %743 = vadd.xlane.f32.xlu1 %v2555_v53 }
 0x10f   : > { %745 = vadd.xlane.f32.xlu0 %v2579_v4  ;;  %v2081_v11 = vpop.f32.mrf.mxu0 }
 0x110   : > { %1061 = vst [vmem:[%s2519_s11 + $0x40] sm:$0xff] %v1045_v8  ;;  %v1048_v13 = vadd.f32 %v2505_v20, %v2586_v9  ;;  %v2595_v14 = vadd.f32 %v704_v7, %v668_v10  ;;  %v689_v15 = vadd.f32 %v2081_v11, %v2496_v16 }
 0x111   : > { %v680_v17 = vpop.f32.mrf.mxu0 }
 0x112   : > { %1064 = vst [vmem:[%s2519_s11 + $0x58] sm:$0xff] %v1048_v13  ;;  %v1046_v19 = vadd.f32 %v2505_v20, %v2595_v14  ;;  %v2602_v21 = vadd.f32 %v709_v12, %v689_v15  ;;  %v681_v22 = vadd.f32 %v2496_v16, %v680_v17  ;;  %747 = vadd.xlane.f32.xlu1 %v2595_v14 }
 0x113   : > { %749 = vadd.xlane.f32.xlu0 %v2570_v63  ;;  %v2082_v24 = vpop.f32.mrf.mxu0 }
 0x114   : > { %1062 = vst [vmem:[%s2519_s11 + $0x48] sm:$0xff] %v1046_v19  ;;  %v1051_v26 = vadd.f32 %v2505_v20, %v2602_v21  ;;  %v2611_v27 = vadd.f32 %v707_v18, %v681_v22  ;;  %v692_v29 = vadd.f32 %v2082_v24, %v2496_v16  ;;  %v2175_v19 = vld [vmem:[%s3046_s6 + $0x70] ss:$8 sps:$4 sm:$0xff]  }
 0x115   : > { %v683_v30 = vpop.f32.mrf.mxu0 }
 0x116   : > { %1067 = vst [vmem:[%s2519_s11 + $0x70] sm:$0xff] %v1051_v26  ;;  %v1049_v32 = vadd.f32 %v2505_v20, %v2611_v27  ;;  %v2618_v34 = vadd.f32 %v710_v25, %v692_v29  ;;  %v684_v35 = vadd.f32 %v2496_v16, %v683_v30  ;;  %751 = vadd.xlane.f32.xlu1 %v2586_v9  ;;  %v2176_v29 = vld [vmem:[%s3046_s6 + $0x64] ss:$8 sps:$4 sm:$0xff]  }
 0x117   : > { %753 = vadd.xlane.f32.xlu0 %v2611_v27 }
 0x118   : > { %1065 = vst [vmem:[%s2519_s11 + $0x60] sm:$0xff] %v1049_v32  ;;  %v1052_v36 = vadd.f32 %v2505_v20, %v2618_v34  ;;  %v2626_v37 = vadd.f32 %v708_v31, %v684_v35  ;;  %v2178_v32 = vld [vmem:[%s3046_s6 + $0x60] ss:$8 sps:$4 sm:$0xff]  }
 0x11a   : > { %1068 = vst [vmem:[%s2519_s11 + $0x78] sm:$0xff] %v1052_v36  ;;  %v1050_v39 = vadd.f32 %v2505_v20, %v2626_v37  ;;  %755 = vadd.xlane.f32.xlu1 %v2626_v37 }
 0x11b   : > { %757 = vadd.xlane.f32.xlu0 %v2602_v21 }
 0x11c   : > { %1066 = vst [vmem:[%s2519_s11 + $0x68] sm:$0xff] %v1050_v39 }
 0x11e   : > { %759 = vadd.xlane.f32.xlu1 %v2618_v34 }
 0x185   : > { %v734_v16 = vpop.xlane.xlu1 %733 }
 0x186   : > { %v764_v41 = vmul.f32 0.0078125, %v734_v16 }
 0x187   : > { %v730_v40 = vpop.xlane.xlu0 %729 }
 0x188   : > { %v762_v42 = vmul.f32 0.0078125, %v730_v40  ;;  %v2639_v47 = vsub.f32 %v2508_v23, %v764_v41  ;;  %v2179_v40 = vld [vmem:[%s3046_s6 + $0x54] ss:$8 sps:$4 sm:$0xff]  }
 0x189   : > { %v736_v44 = vpop.xlane.xlu1 %735 }
 0x18a   : > { %v2636_v45 = vsub.f32 %v2514_v28, %v762_v42  ;;  %v765_v20 = vmul.f32 0.0078125, %v736_v44  ;;  %v796_v28 = vmul.f32 %v2639_v47, %v2639_v47  ;;  %v2181_v42 = vld [vmem:[%s3046_s6 + $0x50] ss:$8 sps:$4 sm:$0xff]  }
 0x18b   : > { %v732_v46 = vpop.xlane.xlu0 %731 }
 0x18c   : > { %v763_v49 = vmul.f32 0.0078125, %v732_v46  ;;  %v794_v50 = vmul.f32 %v2636_v45, %v2636_v45  ;;  %v2647_v54 = vsub.f32 %v2524_v33, %v765_v20  ;;  %v2182_v20 = vld [vmem:[%s3046_s6 + $0x44] ss:$8 sps:$4 sm:$0xff]  }
 0x18e   : > { %v2644_v51 = vsub.f32 %v2532_v38, %v763_v49  ;;  %810 = vadd.xlane.f32.xlu0 %v794_v50  ;;  %v797_v33 = vmul.f32 %v2647_v54, %v2647_v54  ;;  %v2184_v49 = vld [vmem:[%s3046_s6 + $0x40] ss:$8 sps:$4 sm:$0xff]  }
 0x18f   : > { %v738_v52 = vpop.xlane.xlu0 %737 }
 0x190   : > { %v766_v55 = vmul.f32 0.0078125, %v738_v52  ;;  %v795_v23 = vmul.f32 %v2644_v51, %v2644_v51  ;;  %v2187_v52 = vld [vmem:[%s3046_s6 + $0x30] ss:$8 sps:$4 sm:$0xff]  }
 0x192   : > { %v2654_v56 = vsub.f32 %v2548_v48, %v766_v55  ;;  %814 = vadd.xlane.f32.xlu0 %v796_v28  ;;  %812 = vadd.xlane.f32.xlu1 %v795_v23  ;;  %v2188_v55 = vld [vmem:[%s3046_s6 + $0x24] ss:$8 sps:$4 sm:$0xff]   ;;  %v2190_v28 = vld [vmem:[%s3046_s6 + $0x20] ss:$8 sps:$4 sm:$0xff]   ;;  %v2191_v23 = vld [vmem:[%s3046_s6 + $0x14] ss:$8 sps:$4 sm:$0xff]  }
 0x193   : > { %v740_v57 = vpop.xlane.xlu1 %739 }
 0x194   : > { %v742_v38 = vpop.xlane.xlu0 %741  ;;  %v767_v59 = vmul.f32 0.0078125, %v740_v57  ;;  %v798_v61 = vmul.f32 %v2654_v56, %v2654_v56  ;;  %v2193_v57 = vld [vmem:[%s3046_s6 + $0x10] ss:$8 sps:$4 sm:$0xff]  }
 0x195   : > { %v768_v60 = vmul.f32 0.0078125, %v742_v38  ;;  %v2194_v38 = vld [vmem:[%s3046_s6 + $0x4] ss:$8 sps:$4 sm:$0xff]  }
 0x196   : > { %v2661_v62 = vsub.f32 %v2563_v58, %v767_v59  ;;  %816 = vadd.xlane.f32.xlu1 %v797_v33  ;;  %818 = vadd.xlane.f32.xlu0 %v798_v61  ;;  %v2196_v59 = vld [vmem:[%s3046_s6] ss:$8 sps:$4 sm:$0xff]   ;;  %v2205_v33 = vld [vmem:[%s3048_s8 + $0x78] sm:$0xff]  }
 0x197   : > { %v2664_v0 = vsub.f32 %v2540_v43, %v768_v60  ;;  %v744_v48 = vpop.xlane.xlu1 %743  ;;  %v2331_v60 = vmov 0   ;;  %v2770_v61 = vld [vmem:[%s3048_s8 + $0x38] sm:$0xff]   ;;  %1987 = vmatprep.subr.bf16.mxu0 %v2205_v33 }
 0x198   : > { %v746_v1 = vpop.xlane.xlu0 %745  ;;  %v769_v2 = vmul.f32 0.0078125, %v744_v48  ;;  %v799_v5 = vmul.f32 %v2661_v62, %v2661_v62  ;;  %1273 = vmatprep.mubr.bf16.mxu1 %v2331_v60  ;;  %v2775_v48 = vld [vmem:[%s3048_s8 + $0x70] sm:$0xff]   ;;  %1988 = vmatpush3.bf16.msra.mxu0 %v2770_v61 }
 0x199   : > { %v770_v3 = vmul.f32 0.0078125, %v746_v1  ;;  %v800_v6 = vmul.f32 %v2664_v0, %v2664_v0  ;;  %v2781_v1 = vld [vmem:[%s3048_s8 + $0x30] sm:$0xff]   ;;  %1989 = vmatprep.subr.bf16.mxu0 %v2775_v48 }
 0x19a   : > { %v2671_v7 = vsub.f32 %v2555_v53, %v769_v2  ;;  %820 = vadd.xlane.f32.xlu1 %v799_v5  ;;  %v2787_v2 = vld [vmem:[%s3048_s8 + $0x68] sm:$0xff]   ;;  %v2799_v5 = vld [vmem:[%s3048_s8 + $0x60] sm:$0xff]  }
 0x19b   : > { %v2674_v58 = vsub.f32 %v2579_v4, %v770_v3  ;;  %822 = vadd.xlane.f32.xlu0 %v800_v6  ;;  %v748_v43 = vpop.xlane.xlu1 %747  ;;  %v2173_v4 = vld [vmem:[%s3046_s6 + $0x74] ss:$8 sps:$4 sm:$0xff]   ;;  %v2793_v3 = vld [vmem:[%s3048_s8 + $0x28] sm:$0xff]   ;;  %v2805_v6 = vld [vmem:[%s3048_s8 + $0x20] sm:$0xff]  }
 0x19c   : > { %v750_v8 = vpop.xlane.xlu0 %749  ;;  %v771_v10 = vmul.f32 0.0078125, %v748_v43  ;;  %v801_v12 = vmul.f32 %v2671_v7, %v2671_v7  ;;  %1241 = vmatprep.subr.bf16.mxu1 %v2173_v4  ;;  %1990 = vmatpush3.bf16.msra.mxu0 %v2781_v1  ;;  %v2811_v43 = vld [vmem:[%s3048_s8 + $0x58] sm:$0xff]  }
 0x19d   : > { %v772_v11 = vmul.f32 0.0078125, %v750_v8  ;;  %v802_v13 = vmul.f32 %v2674_v58, %v2674_v58  ;;  %1242 = vmatpush1.bf16.msra.mxu1 %v2175_v19  ;;  %1991 = vmatprep.subr.bf16.mxu0 %v2787_v2  ;;  %v2817_v8 = vld [vmem:[%s3048_s8 + $0x18] sm:$0xff]  }
 0x19e   : > { %v2681_v15 = vsub.f32 %v2595_v14, %v771_v10  ;;  %824 = vadd.xlane.f32.xlu1 %v801_v12  ;;  %1243 = vmatprep.subr.bf16.mxu1 %v2176_v29 }
 0x19f   : > { %v2684_v53 = vsub.f32 %v2570_v63, %v772_v11  ;;  %826 = vadd.xlane.f32.xlu0 %v802_v13  ;;  %v752_v17 = vpop.xlane.xlu1 %751 }
 0x1a0   : > { %v754_v18 = vpop.xlane.xlu0 %753  ;;  %v773_v22 = vmul.f32 0.0078125, %v752_v17  ;;  %v803_v14 = vmul.f32 %v2681_v15, %v2681_v15  ;;  %1992 = vmatpush3.bf16.msra.mxu0 %v2793_v3 }
 0x1a1   : > { %v774_v24 = vmul.f32 0.0078125, %v754_v18  ;;  %v804_v63 = vmul.f32 %v2684_v53, %v2684_v53  ;;  %1244 = vmatpush1.bf16.msra.mxu1 %v2178_v32  ;;  %1993 = vmatprep.subr.bf16.mxu0 %v2799_v5 }
 0x1a2   : > { %v2697_v25 = vsub.f32 %v2586_v9, %v773_v22  ;;  %828 = vadd.xlane.f32.xlu1 %v803_v14  ;;  %1245 = vmatprep.subr.bf16.mxu1 %v2179_v40 }
 0x1a3   : > { %v2700_v26 = vsub.f32 %v2611_v27, %v774_v24  ;;  %830 = vadd.xlane.f32.xlu0 %v804_v63  ;;  %v756_v30 = vpop.xlane.xlu1 %755 }
 0x1a4   : > { %v758_v31 = vpop.xlane.xlu0 %757  ;;  %v775_v35 = vmul.f32 0.0078125, %v756_v30  ;;  %v805_v9 = vmul.f32 %v2697_v25, %v2697_v25  ;;  %1994 = vmatpush3.bf16.msra.mxu0 %v2805_v6 }
 0x1a5   : > { %v776_v36 = vmul.f32 0.0078125, %v758_v31  ;;  %v806_v27 = vmul.f32 %v2700_v26, %v2700_v26  ;;  %1246 = vmatpush1.bf16.msra.mxu1 %v2181_v42  ;;  %1995 = vmatprep.subr.bf16.mxu0 %v2811_v43 }
 0x1a6   : > { %v2713_v39 = vsub.f32 %v2626_v37, %v775_v35  ;;  %832 = vadd.xlane.f32.xlu1 %v805_v9  ;;  %1247 = vmatprep.subr.bf16.mxu1 %v2182_v20  ;;  %v2824_v20 = vld [vmem:[%s3044_s4] ss:$0 sm:$0xff] }
 0x1a7   : > { %v2716_v16 = vsub.f32 %v2602_v21, %v776_v36  ;;  %834 = vadd.xlane.f32.xlu0 %v806_v27  ;;  %v760_v41 = vpop.xlane.xlu1 %759 }
 0x1a8   : > { %v777_v44 = vmul.f32 0.0078125, %v760_v41  ;;  %v807_v46 = vmul.f32 %v2713_v39, %v2713_v39  ;;  %1996 = vmatpush3.bf16.msra.mxu0 %v2817_v8 }
 0x1a9   : > { %v808_v37 = vmul.f32 %v2716_v16, %v2716_v16  ;;  %1248 = vmatpush1.bf16.msra.mxu1 %v2184_v49 }
 0x1aa   : > { %v2729_v21 = vsub.f32 %v2618_v34, %v777_v44  ;;  %836 = vadd.xlane.f32.xlu1 %v807_v46  ;;  %v2185_v34 = vld [vmem:[%s3046_s6 + $0x34] ss:$8 sps:$4 sm:$0xff]  }
 0x1ab   : > { %838 = vadd.xlane.f32.xlu0 %v808_v37  ;;  %1249 = vmatprep.subr.bf16.mxu1 %v2185_v34 }
 0x1ac   : > { %v809_v50 = vmul.f32 %v2729_v21, %v2729_v21 }
 0x1ad   : > { %1250 = vmatpush1.bf16.msra.mxu1 %v2187_v52 }
 0x1ae   : > { %840 = vadd.xlane.f32.xlu1 %v809_v50  ;;  %1251 = vmatprep.subr.bf16.mxu1 %v2188_v55 }
 0x1b1   : > { %1252 = vmatpush1.bf16.msra.mxu1 %v2190_v28 }
 0x1b2   : > { %1253 = vmatprep.subr.bf16.mxu1 %v2191_v23 }
 0x1b5   : > { %1254 = vmatpush1.bf16.msra.mxu1 %v2193_v57 }
 0x1b6   : > { %1255 = vmatprep.subr.bf16.mxu1 %v2194_v38 }
 0x1b9   : > { %1256 = vmatpush1.bf16.msra.mxu1 %v2196_v59 }
 0x1ba   : > { %2083 = vmatprep.subr.bf16.mxu1 %v2205_v33  ;;  %v2831_v33 = vld [vmem:[%s3045_s5] ss:$0 sm:$0xff] }
 0x217   : > { %v811_v10 = vpop.xlane.xlu0 %810 }
 0x218   : > { %v842_v11 = vmul.f32 0.0078125, %v811_v10 }
 0x21a   : > { %v858_v12 = vadd.f32 1e-05, %v842_v11 }
 0x21b   : > { %v813_v13 = vpop.xlane.xlu1 %812  ;;  %v815_v4 = vpop.xlane.xlu0 %814 }
 0x21c   : > { %2221 = vrsqrt.f32 %v858_v12  ;;  %v843_v17 = vmul.f32 0.0078125, %v813_v13  ;;  %v844_v18 = vmul.f32 0.0078125, %v815_v4 }
 0x21e   : > { %v859_v19 = vadd.f32 1e-05, %v843_v17  ;;  %v860_v22 = vadd.f32 1e-05, %v844_v18 }
 0x21f   : > { %v817_v24 = vpop.xlane.xlu1 %816  ;;  %v819_v14 = vpop.xlane.xlu0 %818 }
 0x220   : > { %2223 = vrsqrt.f32 %v859_v19  ;;  %v845_v63 = vmul.f32 0.0078125, %v817_v24  ;;  %v846_v29 = vmul.f32 0.0078125, %v819_v14 }
 0x221   : > { %2225 = vrsqrt.f32 %v860_v22 }
 0x222   : > { %v861_v30 = vadd.f32 1e-05, %v845_v63  ;;  %v862_v31 = vadd.f32 1e-05, %v846_v29 }
 0x223   : > { %v821_v32 = vpop.xlane.xlu1 %820 }
 0x224   : > { %v823_v35 = vpop.xlane.xlu0 %822  ;;  %2227 = vrsqrt.f32 %v861_v30  ;;  %v847_v36 = vmul.f32 0.0078125, %v821_v32 }
 0x225   : > { %v848_v9 = vmul.f32 0.0078125, %v823_v35  ;;  %2229 = vrsqrt.f32 %v862_v31 }
 0x226   : > { %v863_v27 = vadd.f32 1e-05, %v847_v36 }
 0x227   : > { %v864_v40 = vadd.f32 1e-05, %v848_v9  ;;  %v825_v41 = vpop.xlane.xlu1 %824 }
 0x228   : > { %v827_v42 = vpop.xlane.xlu0 %826  ;;  %2231 = vrsqrt.f32 %v863_v27  ;;  %v849_v44 = vmul.f32 0.0078125, %v825_v41 }
 0x229   : > { %v850_v46 = vmul.f32 0.0078125, %v827_v42  ;;  %v2222_v37 = vpop.eup %2221  ;;  %2233 = vrsqrt.f32 %v864_v40 }
 0x22a   : > { %v890_v49 = vmul.f32 %v2222_v37, %v2636_v45  ;;  %v865_v50 = vadd.f32 1e-05, %v849_v44 }
 0x22b   : > { %v866_v34 = vadd.f32 1e-05, %v850_v46  ;;  %v829_v52 = vpop.xlane.xlu1 %828 }
 0x22c   : > { %v831_v55 = vpop.xlane.xlu0 %830  ;;  %2235 = vrsqrt.f32 %v865_v50  ;;  %v851_v28 = vmul.f32 0.0078125, %v829_v52  ;;  %v912_v38 = vmul.f32 %v2824_v20, %v890_v49 }
 0x22d   : > { %v852_v23 = vmul.f32 0.0078125, %v831_v55  ;;  %v2224_v57 = vpop.eup %2223  ;;  %2237 = vrsqrt.f32 %v866_v34 }
 0x22e   : > { %v2226_v59 = vpop.eup %2225  ;;  %v891_v10 = vmul.f32 %v2224_v57, %v2644_v51  ;;  %v867_v45 = vadd.f32 1e-05, %v851_v28  ;;  %v934_v24 = vadd.f32 %v2831_v33, %v912_v38 }
 0x22f   : > { %v868_v11 = vadd.f32 1e-05, %v852_v23  ;;  %v892_v12 = vmul.f32 %v2226_v59, %v2639_v47  ;;  %v833_v13 = vpop.xlane.xlu1 %832 }
 0x230   : > { %v835_v4 = vpop.xlane.xlu0 %834  ;;  %v913_v17 = vmul.f32 %v2824_v20, %v891_v10  ;;  %2239 = vrsqrt.f32 %v867_v45  ;;  %v853_v18 = vmul.f32 0.0078125, %v833_v13 }
 0x231   : > { %v854_v19 = vmul.f32 0.0078125, %v835_v4  ;;  %v2228_v22 = vpop.eup %2227  ;;  %v914_v14 = vmul.f32 %v2824_v20, %v892_v12  ;;  %2241 = vrsqrt.f32 %v868_v11 }
 0x232   : > { %v2230_v63 = vpop.eup %2229  ;;  %v935_v51 = vadd.f32 %v2831_v33, %v913_v17  ;;  %v893_v29 = vmul.f32 %v2228_v22, %v2647_v54  ;;  %v869_v30 = vadd.f32 1e-05, %v853_v18 }
 0x233   : > { %v870_v47 = vadd.f32 1e-05, %v854_v19  ;;  %v894_v31 = vmul.f32 %v2230_v63, %v2654_v56  ;;  %v837_v32 = vpop.xlane.xlu1 %836  ;;  %v936_v54 = vadd.f32 %v2831_v33, %v914_v14 }
 0x234   : > { %v839_v35 = vpop.xlane.xlu0 %838  ;;  %v1927_v36 = vpack.c.bf16 %v935_v51, %v934_v24  ;;  %v915_v9 = vmul.f32 %v2824_v20, %v893_v29  ;;  %2243 = vrsqrt.f32 %v869_v30  ;;  %v855_v27 = vmul.f32 0.0078125, %v837_v32 }
 0x235   : > { %v2232_v40 = vpop.eup %2231  ;;  %v916_v41 = vmul.f32 %v2824_v20, %v894_v31  ;;  %2245 = vrsqrt.f32 %v870_v47  ;;  %v856_v42 = vmul.f32 0.0078125, %v839_v35 }
 0x236   : > { %v2234_v44 = vpop.eup %2233  ;;  %1928 = vst [vmem:[#allocation2] sm:$0xff] %v1927_v36   ;;  %v937_v46 = vadd.f32 %v2831_v33, %v915_v9  ;;  %v895_v56 = vmul.f32 %v2232_v40, %v2661_v62  ;;  %v871_v37 = vadd.f32 1e-05, %v855_v27 }
 0x237   : > { %v896_v49 = vmul.f32 %v2234_v44, %v2664_v0  ;;  %v872_v50 = vadd.f32 1e-05, %v856_v42  ;;  %v841_v34 = vpop.xlane.xlu1 %840  ;;  %v938_v57 = vadd.f32 %v2831_v33, %v916_v41 }
 0x238   : > { %v1932_v52 = vpack.c.bf16 %v937_v46, %v936_v54  ;;  %v917_v55 = vmul.f32 %v2824_v20, %v895_v56  ;;  %2247 = vrsqrt.f32 %v871_v37  ;;  %v857_v28 = vmul.f32 0.0078125, %v841_v34  ;;  %v2216_v37 = vld [vmem:[%s3048_s8 + $0x10] sm:$0xff]   ;;  %v2220_v34 = vld [vmem:[%s3048_s8] sm:$0xff]  }
 0x239   : > { %v2236_v23 = vpop.eup %2235  ;;  %2249 = vrsqrt.f32 %v872_v50  ;;  %v918_v62 = vmul.f32 %v2824_v20, %v896_v49  ;;  %v2217_v49 = vld [vmem:[%s3048_s8 + $0x48] sm:$0xff]   ;;  %v2219_v50 = vld [vmem:[%s3048_s8 + $0x40] sm:$0xff]  }
 0x23a   : > { %v2238_v38 = vpop.eup %2237  ;;  %1964 = vst [vmem:[#allocation2 + $0x8] sm:$0xff] %v1932_v52   ;;  %v939_v59 = vadd.f32 %v2831_v33, %v917_v55  ;;  %v897_v10 = vmul.f32 %v2236_v23, %v2671_v7  ;;  %v873_v0 = vadd.f32 1e-05, %v857_v28  ;;  %v1103_v52 = vlaneseq }
 0x23b   : > { %v898_v45 = vmul.f32 %v2238_v38, %v2674_v58  ;;  %v940_v18 = vadd.f32 %v2831_v33, %v918_v62 }
 0x23c   : > { %v1937_v11 = vpack.c.bf16 %v939_v59, %v938_v57  ;;  %v919_v12 = vmul.f32 %v2824_v20, %v897_v10  ;;  %2251 = vrsqrt.f32 %v873_v0  ;;  %v1104_v55 = vshrl.u32 %v1103_v52, 7  ;;  %v1101_v57 = vld [vmem:[%s3047_s7] sm:$0x3] }
 0x23d   : > { %v2240_v13 = vpop.eup %2239  ;;  %v2197_v4 = vld [vmem:[#allocation2] sm:$0xff]   ;;  %v920_v22 = vmul.f32 %v2824_v20, %v898_v45 }
 0x23e   : > { %v2242_v17 = vpop.eup %2241  ;;  %1965 = vst [vmem:[#allocation2 + $0x10] sm:$0xff] %v1937_v11   ;;  %v941_v19 = vadd.f32 %v2831_v33, %v919_v12  ;;  %v899_v24 = vmul.f32 %v2240_v13, %v2681_v15  ;;  %1274 = vmatmul.mubr.bf16.vlgmr.msra.gmra.mxu1 %v2197_v4  ;;  %v1109_v28 = vsub.s32 1, %v1104_v55  ;;  %v1105_v23 = vsub.s32 0, %v1104_v55 }
 0x23f   : > { %v900_v7 = vmul.f32 %v2242_v17, %v2684_v53  ;;  %1283 = vmatprep.mubr.bf16.mxu1 %v2331_v60  ;;  %2091 = vmatpush3.bf16.msra.mxu1 %v2770_v61  ;;  %v942_v29 = vadd.f32 %v2831_v33, %v920_v22 }
 0x240   : > { %v1942_v58 = vpack.c.bf16 %v941_v19, %v940_v18  ;;  %v921_v14 = vmul.f32 %v2824_v20, %v899_v24  ;;  %2084 = vmatprep.subr.bf16.mxu1 %v2775_v48  ;;  %v2916_v59 = vrot.slane %v1101_v57, %v1109_v28  ;;  %v2918_v62 = vrot.slane %v1101_v57, %v1105_v23 }
 0x241   : > { %v2244_v63 = vpop.eup %2243  ;;  %v922_v15 = vmul.f32 %v2824_v20, %v900_v7  ;;  %v2198_v35 = vld [vmem:[#allocation2 + $0x8] sm:$0xff]  }
 0x242   : > { %v2246_v51 = vpop.eup %2245  ;;  %1966 = vst [vmem:[#allocation2 + $0x18] sm:$0xff] %v1942_v58   ;;  %v943_v30 = vadd.f32 %v2831_v33, %v921_v14  ;;  %v901_v53 = vmul.f32 %v2244_v63, %v2697_v25 }
 0x243   : > { %v902_v47 = vmul.f32 %v2246_v51, %v2700_v26  ;;  %2092 = vmatpush3.bf16.msra.mxu1 %v2781_v1  ;;  %v944_v36 = vadd.f32 %v2831_v33, %v922_v15 }
 0x244   : > { %v1947_v31 = vpack.c.bf16 %v943_v30, %v942_v29  ;;  %v923_v32 = vmul.f32 %v2824_v20, %v901_v53  ;;  %2085 = vmatprep.subr.bf16.mxu1 %v2787_v2 }
 0x245   : > { %v2248_v61 = vpop.eup %2247  ;;  %v924_v27 = vmul.f32 %v2824_v20, %v902_v47  ;;  %v2199_v46 = vld [vmem:[#allocation2 + $0x10] sm:$0xff]  }
 0x246   : > { %v2250_v48 = vpop.eup %2249  ;;  %1967 = vst [vmem:[#allocation2 + $0x20] sm:$0xff] %v1947_v31   ;;  %v945_v9 = vadd.f32 %v2831_v33, %v923_v32  ;;  %v903_v25 = vmul.f32 %v2248_v61, %v2713_v39  ;;  %1284 = vmatmul.mubr.bf16.gmra.mxu1 %v2198_v35 }
 0x247   : > { %v904_v26 = vmul.f32 %v2250_v48, %v2716_v16  ;;  %1293 = vmatprep.mubr.bf16.mxu1 %v2331_v60  ;;  %2093 = vmatpush3.bf16.msra.mxu1 %v2793_v3  ;;  %v946_v41 = vadd.f32 %v2831_v33, %v924_v27 }
 0x248   : > { %v1952_v40 = vpack.c.bf16 %v945_v9, %v944_v36  ;;  %v925_v1 = vmul.f32 %v2824_v20, %v903_v25  ;;  %2086 = vmatprep.subr.bf16.mxu1 %v2799_v5 }
 0x249   : > { %v2252_v2 = vpop.eup %2251  ;;  %v926_v39 = vmul.f32 %v2824_v20, %v904_v26 }
 0x24a   : > { %1968 = vst [vmem:[#allocation2 + $0x28] sm:$0xff] %v1952_v40   ;;  %v947_v42 = vadd.f32 %v2831_v33, %v925_v1  ;;  %v905_v16 = vmul.f32 %v2252_v2, %v2729_v21  ;;  %v2200_v21 = vld [vmem:[#allocation2 + $0x18] sm:$0xff]  }
 0x24b   : > { %2094 = vmatpush3.bf16.msra.mxu1 %v2805_v6  ;;  %v948_v3 = vadd.f32 %v2831_v33, %v926_v39 }
 0x24c   : > { %v1957_v44 = vpack.c.bf16 %v947_v42, %v946_v41  ;;  %v927_v54 = vmul.f32 %v2824_v20, %v905_v16  ;;  %2087 = vmatprep.subr.bf16.mxu1 %v2811_v43 }
 0x24d   : > { %v2201_v6 = vld [vmem:[#allocation2 + $0x20] sm:$0xff]  }
 0x24e   : > { %1969 = vst [vmem:[#allocation2 + $0x30] sm:$0xff] %v1957_v44   ;;  %v949_v5 = vadd.f32 %v2831_v33, %v927_v54  ;;  %1294 = vmatmul.mubr.bf16.gmra.mxu1 %v2199_v46 }
 0x24f   : > { %1303 = vmatprep.mubr.bf16.mxu1 %v2331_v60  ;;  %2095 = vmatpush3.bf16.msra.mxu1 %v2817_v8  ;;  %v2215_v8 = vld [vmem:[%s3048_s8 + $0x50] sm:$0xff]  }
 0x250   : > { %v1962_v56 = vpack.c.bf16 %v949_v5, %v948_v3  ;;  %1997 = vmatprep.subr.bf16.mxu0 %v2215_v8  ;;  %2088 = vmatprep.subr.bf16.mxu1 %v2215_v8 }
 0x251   : > { %v2202_v43 = vld [vmem:[#allocation2 + $0x28] sm:$0xff]   ;;  %1998 = vmatpush3.bf16.msra.mxu0 %v2216_v37 }
 0x252   : > { %1970 = vst [vmem:[#allocation2 + $0x38] sm:$0xff] %v1962_v56   ;;  %1999 = vmatprep.subr.bf16.mxu0 %v2217_v49 }
 0x253   : > { %2096 = vmatpush3.bf16.msra.mxu1 %v2216_v37 }
 0x254   : > { %2089 = vmatprep.subr.bf16.mxu1 %v2217_v49 }
 0x255   : > { %v2203_v20 = vld [vmem:[#allocation2 + $0x30] sm:$0xff]  }
 0x256   : > { %1304 = vmatmul.mubr.bf16.gmra.mxu1 %v2200_v21 }
 0x257   : > { %1313 = vmatprep.mubr.bf16.mxu1 %v2331_v60 }
 0x259   : > { %v2204_v33 = vld [vmem:[#allocation2 + $0x38] sm:$0xff]  }
 0x25e   : > { %1314 = vmatmul.mubr.bf16.gmra.mxu1 %v2201_v6 }
 0x25f   : > { %1323 = vmatprep.mubr.bf16.mxu1 %v2331_v60 }
 0x266   : > { %1324 = vmatmul.mubr.bf16.gmra.mxu1 %v2202_v43 }
 0x267   : > { %1333 = vmatprep.mubr.bf16.mxu1 %v2331_v60 }
 0x26e   : > { %1334 = vmatmul.mubr.bf16.gmra.mxu1 %v2203_v20 }
 0x26f   : > { %1343 = vmatprep.mubr.bf16.mxu1 %v2331_v60  ;;  %v2218_v60 = vld [vmem:[%s3048_s8 + $0x8] sm:$0xff]  }
 0x270   : > { %2000 = vmatpush3.bf16.msra.mxu0 %v2218_v60  ;;  %2097 = vmatpush3.bf16.msra.mxu1 %v2218_v60 }
 0x271   : > { %2001 = vmatprep.subr.bf16.mxu0 %v2219_v50  ;;  %2090 = vmatprep.subr.bf16.mxu1 %v2219_v50 }
 0x274   : > { %2002 = vmatpush3.bf16.msra.mxu0 %v2220_v34  ;;  %2098 = vmatpush3.bf16.msra.mxu1 %v2220_v34 }
 0x276   : > { %1344 = vmatmul.mubr.bf16.gmra.mxu1 %v2204_v33 }
 0x2fe   : > { %v1275_v38 = vpop.f32.mrf.mxu1 }
 0x2ff   : > { %v1276_v12 = vadd.f32 %v1275_v38, %v2918_v62 }
 0x300   : > { %v1277_v10 = vpop.f32.mrf.mxu1 }
 0x301   : > { %v1278_v45 = vadd.f32 %v1277_v10, %v2916_v59  ;;  %v1354_v24 = vmax.f32 %v1276_v12, 0.0 }
 0x302   : > { %v1279_v0 = vpop.f32.mrf.mxu1 }
 0x303   : > { %v1280_v11 = vadd.f32 %v1279_v0, %v2918_v62  ;;  %v1355_v19 = vmax.f32 %v1278_v45, 0.0 }
 0x304   : > { %v1281_v13 = vpop.f32.mrf.mxu1 }
 0x305   : > { %v1282_v4 = vadd.f32 %v1281_v13, %v2916_v59  ;;  %v1356_v17 = vmax.f32 %v1280_v11, 0.0 }
 0x306   : > { %v1285_v18 = vpop.f32.mrf.mxu1 }
 0x307   : > { %v1357_v22 = vmax.f32 %v1282_v4, 0.0  ;;  %v1402_v14 = vpack.c.bf16 %v1356_v17, %v1354_v24  ;;  %v1286_v30 = vadd.f32 %v1285_v18, %v2918_v62 }
 0x308   : > { %v1287_v7 = vpop.f32.mrf.mxu1 }
 0x309   : > { %v1403_v58 = vpack.c.bf16 %v1357_v22, %v1355_v19  ;;  %v1288_v51 = vadd.f32 %v1287_v7, %v2916_v59  ;;  %v1358_v35 = vmax.f32 %v1286_v30, 0.0 }
 0x30a   : > { %v1289_v63 = vpop.f32.mrf.mxu1 }
 0x30b   : > { %v1290_v29 = vadd.f32 %v1289_v63, %v2918_v62  ;;  %1578 = vmatprep.mubr.bf16.mxu0 %v1403_v58  ;;  %v1359_v32 = vmax.f32 %v1288_v51, 0.0 }
 0x30c   : > { %v1291_v15 = vpop.f32.mrf.mxu1  ;;  %1579 = vmatmul.mubr.bf16.vlgmr.msra.gmra.mxu0 %v1402_v14 }
 0x30d   : > { %v1292_v53 = vadd.f32 %v1291_v15, %v2916_v59  ;;  %v1360_v47 = vmax.f32 %v1290_v29, 0.0 }
 0x30e   : > { %v1295_v31 = vpop.f32.mrf.mxu1 }
 0x30f   : > { %v1361_v61 = vmax.f32 %v1292_v53, 0.0  ;;  %v1404_v9 = vpack.c.bf16 %v1360_v47, %v1358_v35  ;;  %v1296_v40 = vadd.f32 %v1295_v31, %v2918_v62 }
 0x310   : > { %v1297_v48 = vpop.f32.mrf.mxu1 }
 0x311   : > { %v1405_v36 = vpack.c.bf16 %v1361_v61, %v1359_v32  ;;  %v1298_v25 = vadd.f32 %v1297_v48, %v2916_v59  ;;  %v1362_v44 = vmax.f32 %v1296_v40, 0.0 }
 0x312   : > { %v1299_v27 = vpop.f32.mrf.mxu1 }
 0x313   : > { %v1300_v26 = vadd.f32 %v1299_v27, %v2918_v62  ;;  %1586 = vmatprep.mubr.bf16.mxu0 %v1405_v36  ;;  %v1363_v39 = vmax.f32 %v1298_v25, 0.0 }
 0x314   : > { %v1301_v1 = vpop.f32.mrf.mxu1  ;;  %1587 = vmatmul.mubr.bf16.gmra.mxu0 %v1404_v9 }
 0x315   : > { %v1302_v2 = vadd.f32 %v1301_v1, %v2916_v59  ;;  %v1364_v41 = vmax.f32 %v1300_v26, 0.0 }
 0x316   : > { %v1305_v42 = vpop.f32.mrf.mxu1 }
 0x317   : > { %v1365_v16 = vmax.f32 %v1302_v2, 0.0  ;;  %v1406_v3 = vpack.c.bf16 %v1364_v41, %v1362_v44  ;;  %v1306_v6 = vadd.f32 %v1305_v42, %v2918_v62 }
 0x318   : > { %v1307_v54 = vpop.f32.mrf.mxu1 }
 0x319   : > { %v1407_v46 = vpack.c.bf16 %v1365_v16, %v1363_v39  ;;  %v1308_v56 = vadd.f32 %v1307_v54, %v2916_v59  ;;  %v1366_v60 = vmax.f32 %v1306_v6, 0.0 }
 0x31a   : > { %v1309_v5 = vpop.f32.mrf.mxu1 }
 0x31b   : > { %v1310_v21 = vadd.f32 %v1309_v5, %v2918_v62  ;;  %1594 = vmatprep.mubr.bf16.mxu0 %v1407_v46  ;;  %v1367_v37 = vmax.f32 %v1308_v56, 0.0 }
 0x31c   : > { %v1311_v43 = vpop.f32.mrf.mxu1  ;;  %1595 = vmatmul.mubr.bf16.gmra.mxu0 %v1406_v3 }
 0x31d   : > { %v1312_v20 = vadd.f32 %v1311_v43, %v2916_v59  ;;  %v1368_v33 = vmax.f32 %v1310_v21, 0.0 }
 0x31e   : > { %v1315_v8 = vpop.f32.mrf.mxu1 }
 0x31f   : > { %v1369_v49 = vmax.f32 %v1312_v20, 0.0  ;;  %v1408_v52 = vpack.c.bf16 %v1368_v33, %v1366_v60  ;;  %v1316_v57 = vadd.f32 %v1315_v8, %v2918_v62 }
 0x320   : > { %v1317_v50 = vpop.f32.mrf.mxu1 }
 0x321   : > { %v1409_v34 = vpack.c.bf16 %v1369_v49, %v1367_v37  ;;  %v1318_v28 = vadd.f32 %v1317_v50, %v2916_v59  ;;  %v1370_v13 = vmax.f32 %v1316_v57, 0.0  ;;  %v1388_v57 = vld [vmem:[%s2519_s11 + $0x10] sm:$0xff] }
 0x322   : > { %v1319_v55 = vpop.f32.mrf.mxu1 }
 0x323   : > { %v1320_v23 = vadd.f32 %v1319_v55, %v2918_v62  ;;  %1602 = vmatprep.mubr.bf16.mxu0 %v1409_v34  ;;  %v1371_v11 = vmax.f32 %v1318_v28, 0.0  ;;  %v1387_v34 = vld [vmem:[%s2519_s11 + $0x8] sm:$0xff] }
 0x324   : > { %v1321_v38 = vpop.f32.mrf.mxu1  ;;  %1603 = vmatmul.mubr.bf16.gmra.mxu0 %v1408_v52 }
 0x325   : > { %v1322_v10 = vadd.f32 %v1321_v38, %v2916_v59  ;;  %v1372_v0 = vmax.f32 %v1320_v23, 0.0 }
 0x326   : > { %v1325_v45 = vpop.f32.mrf.mxu1 }
 0x327   : > { %v1373_v12 = vmax.f32 %v1322_v10, 0.0  ;;  %v1410_v18 = vpack.c.bf16 %v1372_v0, %v1370_v13  ;;  %v1326_v7 = vadd.f32 %v1325_v45, %v2918_v62 }
 0x328   : > { %v1327_v4 = vpop.f32.mrf.mxu1 }
 0x329   : > { %v1411_v17 = vpack.c.bf16 %v1373_v12, %v1371_v11  ;;  %v1328_v22 = vadd.f32 %v1327_v4, %v2916_v59  ;;  %v1374_v15 = vmax.f32 %v1326_v7, 0.0  ;;  %v1389_v11 = vld [vmem:[%s2519_s11 + $0x18] sm:$0xff] }
 0x32a   : > { %v1329_v19 = vpop.f32.mrf.mxu1 }
 0x32b   : > { %v1330_v24 = vadd.f32 %v1329_v19, %v2918_v62  ;;  %1610 = vmatprep.mubr.bf16.mxu0 %v1411_v17  ;;  %v1375_v29 = vmax.f32 %v1328_v22, 0.0 }
 0x32c   : > { %v1331_v58 = vpop.f32.mrf.mxu1  ;;  %1611 = vmatmul.mubr.bf16.gmra.mxu0 %v1410_v18  ;;  %v1390_v18 = vld [vmem:[%s2519_s11 + $0x20] sm:$0xff] }
 0x32d   : > { %v1332_v14 = vadd.f32 %v1331_v58, %v2916_v59  ;;  %v1376_v63 = vmax.f32 %v1330_v24, 0.0  ;;  %v1391_v58 = vld [vmem:[%s2519_s11 + $0x28] sm:$0xff] }
 0x32e   : > { %v1335_v51 = vpop.f32.mrf.mxu1 }
 0x32f   : > { %v1377_v30 = vmax.f32 %v1332_v14, 0.0  ;;  %v1412_v31 = vpack.c.bf16 %v1376_v63, %v1374_v15  ;;  %v1336_v48 = vadd.f32 %v1335_v51, %v2918_v62 }
 0x330   : > { %v1337_v53 = vpop.f32.mrf.mxu1 }
 0x331   : > { %v1413_v47 = vpack.c.bf16 %v1377_v30, %v1375_v29  ;;  %v1338_v61 = vadd.f32 %v1337_v53, %v2916_v59  ;;  %v1378_v1 = vmax.f32 %v1336_v48, 0.0  ;;  %v1392_v30 = vld [vmem:[%s2519_s11 + $0x30] sm:$0xff] }
 0x332   : > { %v1339_v32 = vpop.f32.mrf.mxu1 }
 0x333   : > { %v1340_v35 = vadd.f32 %v1339_v32, %v2918_v62  ;;  %1618 = vmatprep.mubr.bf16.mxu0 %v1413_v47  ;;  %v1379_v26 = vmax.f32 %v1338_v61, 0.0  ;;  %v1393_v32 = vld [vmem:[%s2519_s11 + $0x38] sm:$0xff] }
 0x334   : > { %v1341_v36 = vpop.f32.mrf.mxu1  ;;  %1619 = vmatmul.mubr.bf16.gmra.mxu0 %v1412_v31 }
 0x335   : > { %v1342_v9 = vadd.f32 %v1341_v36, %v2916_v59  ;;  %v1380_v27 = vmax.f32 %v1340_v35, 0.0 }
 0x336   : > { %v1345_v25 = vpop.f32.mrf.mxu1 }
 0x337   : > { %v1381_v40 = vmax.f32 %v1342_v9, 0.0  ;;  %v1414_v42 = vpack.c.bf16 %v1380_v27, %v1378_v1  ;;  %v1346_v54 = vadd.f32 %v1345_v25, %v2918_v62  ;;  %v1394_v9 = vld [vmem:[%s2519_s11 + $0x40] sm:$0xff]  ;;  %v1395_v1 = vld [vmem:[%s2519_s11 + $0x48] sm:$0xff] }
 0x338   : > { %v1347_v2 = vpop.f32.mrf.mxu1 }
 0x339   : > { %v1415_v41 = vpack.c.bf16 %v1381_v40, %v1379_v26  ;;  %v1348_v16 = vadd.f32 %v1347_v2, %v2916_v59  ;;  %v1382_v6 = vmax.f32 %v1346_v54, 0.0 }
 0x33a   : > { %v1349_v39 = vpop.f32.mrf.mxu1 }
 0x33b   : > { %v1350_v44 = vadd.f32 %v1349_v39, %v2918_v62  ;;  %1626 = vmatprep.mubr.bf16.mxu1 %v1415_v41  ;;  %v1383_v56 = vmax.f32 %v1348_v16, 0.0  ;;  %v1386_v62 = vld [vmem:[%s2519_s11] sm:$0xff]  ;;  %v1396_v16 = vld [vmem:[%s2519_s11 + $0x50] sm:$0xff] }
 0x33c   : > { %v1351_v46 = vpop.f32.mrf.mxu1  ;;  %1627 = vmatmul.mubr.bf16.vlgmr.msra.gmra.mxu1 %v1414_v42 }
 0x33d   : > { %v1352_v3 = vadd.f32 %v1351_v46, %v2916_v59  ;;  %v1384_v5 = vmax.f32 %v1350_v44, 0.0 }
 0x33f   : > { %v1385_v21 = vmax.f32 %v1352_v3, 0.0  ;;  %v1416_v20 = vpack.c.bf16 %v1384_v5, %v1382_v6  ;;  %v1397_v5 = vld [vmem:[%s2519_s11 + $0x58] sm:$0xff] }
 0x341   : > { %v1417_v43 = vpack.c.bf16 %v1385_v21, %v1383_v56 }
 0x343   : > { %1634 = vmatprep.mubr.bf16.mxu1 %v1417_v43 }
 0x344   : > { %1635 = vmatmul.mubr.bf16.gmra.mxu1 %v1416_v20  ;;  %v1398_v20 = vld [vmem:[%s2519_s11 + $0x60] sm:$0xff] }
 0x3cc   : > { %v2003_v33 = vpop.f32.mrf.mxu0 }
 0x3ce   : > { %v2004_v8 = vpop.f32.mrf.mxu0 }
 0x3cf   : > { %v2005_v37 = vadd.f32 %v2004_v8, %v2003_v33 }
 0x3d0   : > { %v2006_v49 = vpop.f32.mrf.mxu0 }
 0x3d1   : > { %v1643_v60 = vadd.f32 %v2005_v37, %v1386_v62 }
 0x3d2   : > { %v2007_v59 = vpop.f32.mrf.mxu0 }
 0x3d3   : > { %1659 = vst [vmem:[%s2519_s11] sm:$0xff] %v1643_v60  ;;  %v2008_v50 = vadd.f32 %v2007_v59, %v2006_v49  ;;  %v1399_v49 = vld [vmem:[%s2519_s11 + $0x68] sm:$0xff] }
 0x3d4   : > { %v2009_v52 = vpop.f32.mrf.mxu0 }
 0x3d5   : > { %v1644_v55 = vadd.f32 %v2008_v50, %v1387_v34 }
 0x3d6   : > { %v2010_v28 = vpop.f32.mrf.mxu0 }
 0x3d7   : > { %1660 = vst [vmem:[%s2519_s11 + $0x8] sm:$0xff] %v1644_v55  ;;  %v2011_v23 = vadd.f32 %v2010_v28, %v2009_v52  ;;  %v1400_v52 = vld [vmem:[%s2519_s11 + $0x70] sm:$0xff] }
 0x3d8   : > { %v2012_v38 = vpop.f32.mrf.mxu0 }
 0x3d9   : > { %v1645_v10 = vadd.f32 %v2011_v23, %v1388_v57 }
 0x3da   : > { %v2013_v0 = vpop.f32.mrf.mxu0 }
 0x3db   : > { %1661 = vst [vmem:[%s2519_s11 + $0x10] sm:$0xff] %v1645_v10  ;;  %v2014_v45 = vadd.f32 %v2013_v0, %v2012_v38  ;;  %v1401_v38 = vld [vmem:[%s2519_s11 + $0x78] sm:$0xff] }
 0x3dc   : > { %v2015_v12 = vpop.f32.mrf.mxu0 }
 0x3dd   : > { %v1646_v13 = vadd.f32 %v2014_v45, %v1389_v11 }
 0x3de   : > { %v2016_v4 = vpop.f32.mrf.mxu0 }
 0x3df   : > { %1662 = vst [vmem:[%s2519_s11 + $0x18] sm:$0xff] %v1646_v13  ;;  %v2017_v17 = vadd.f32 %v2016_v4, %v2015_v12 }
 0x3e0   : > { %v2018_v19 = vpop.f32.mrf.mxu0 }
 0x3e1   : > { %v1647_v22 = vadd.f32 %v2017_v17, %v1390_v18 }
 0x3e2   : > { %v2019_v24 = vpop.f32.mrf.mxu0 }
 0x3e3   : > { %1663 = vst [vmem:[%s2519_s11 + $0x20] sm:$0xff] %v1647_v22  ;;  %v2020_v7 = vadd.f32 %v2019_v24, %v2018_v19 }
 0x3e4   : > { %v2021_v14 = vpop.f32.mrf.mxu0 }
 0x3e5   : > { %v1648_v63 = vadd.f32 %v2020_v7, %v1391_v58 }
 0x3e6   : > { %v2022_v51 = vpop.f32.mrf.mxu0 }
 0x3e7   : > { %1664 = vst [vmem:[%s2519_s11 + $0x28] sm:$0xff] %v1648_v63  ;;  %v2023_v29 = vadd.f32 %v2022_v51, %v2021_v14 }
 0x3e8   : > { %v2024_v15 = vpop.f32.mrf.mxu0 }
 0x3e9   : > { %v1649_v53 = vadd.f32 %v2023_v29, %v1392_v30 }
 0x3ea   : > { %v2025_v47 = vpop.f32.mrf.mxu0 }
 0x3eb   : > { %1665 = vst [vmem:[%s2519_s11 + $0x30] sm:$0xff] %v1649_v53  ;;  %v2026_v31 = vadd.f32 %v2025_v47, %v2024_v15 }
 0x3ec   : > { %v2027_v61 = vpop.f32.mrf.mxu0 }
 0x3ed   : > { %v1650_v35 = vadd.f32 %v2026_v31, %v1393_v32 }
 0x3ee   : > { %v2028_v48 = vpop.f32.mrf.mxu0 }
 0x3ef   : > { %1666 = vst [vmem:[%s2519_s11 + $0x38] sm:$0xff] %v1650_v35  ;;  %v2029_v36 = vadd.f32 %v2028_v48, %v2027_v61 }
 0x3f0   : > { %v2030_v27 = vpop.f32.mrf.mxu0 }
 0x3f1   : > { %v1651_v25 = vadd.f32 %v2029_v36, %v1394_v9 }
 0x3f2   : > { %v2031_v26 = vpop.f32.mrf.mxu0 }
 0x3f3   : > { %1667 = vst [vmem:[%s2519_s11 + $0x40] sm:$0xff] %v1651_v25  ;;  %v2032_v40 = vadd.f32 %v2031_v26, %v2030_v27 }
 0x3f4   : > { %v2033_v2 = vpop.f32.mrf.mxu0 }
 0x3f5   : > { %v1652_v41 = vadd.f32 %v2032_v40, %v1395_v1 }
 0x3f6   : > { %v2034_v42 = vpop.f32.mrf.mxu0 }
 0x3f7   : > { %1668 = vst [vmem:[%s2519_s11 + $0x48] sm:$0xff] %v1652_v41  ;;  %v2035_v39 = vadd.f32 %v2034_v42, %v2033_v2 }
 0x3f8   : > { %v2036_v44 = vpop.f32.mrf.mxu0 }
 0x3f9   : > { %v1653_v54 = vadd.f32 %v2035_v39, %v1396_v16 }
 0x3fa   : > { %v2037_v46 = vpop.f32.mrf.mxu0 }
 0x3fb   : > { %1669 = vst [vmem:[%s2519_s11 + $0x50] sm:$0xff] %v1653_v54  ;;  %v2038_v3 = vadd.f32 %v2037_v46, %v2036_v44 }
 0x3fc   : > { %v2039_v56 = vpop.f32.mrf.mxu1 }
 0x3fd   : > { %v1654_v21 = vadd.f32 %v2038_v3, %v1397_v5 }
 0x3fe   : > { %v2040_v6 = vpop.f32.mrf.mxu1 }
 0x3ff   : > { %1670 = vst [vmem:[%s2519_s11 + $0x58] sm:$0xff] %v1654_v21  ;;  %v2041_v43 = vadd.f32 %v2040_v6, %v2039_v56 }
 0x400   : > { %v2042_v33 = vpop.f32.mrf.mxu1 }
 0x401   : > { %v1655_v8 = vadd.f32 %v2041_v43, %v1398_v20 }
 0x402   : > { %v2043_v37 = vpop.f32.mrf.mxu1 }
 0x403   : > { %1671 = vst [vmem:[%s2519_s11 + $0x60] sm:$0xff] %v1655_v8  ;;  %v2044_v62 = vadd.f32 %v2043_v37, %v2042_v33 }
 0x404   : > { %v2045_v60 = vpop.f32.mrf.mxu1 }
 0x405   : > { %v1656_v59 = vadd.f32 %v2044_v62, %v1399_v49 }
 0x406   : > { %v2046_v50 = vpop.f32.mrf.mxu1 }
 0x407   : > { %1672 = vst [vmem:[%s2519_s11 + $0x68] sm:$0xff] %v1656_v59  ;;  %v2047_v34 = vadd.f32 %v2046_v50, %v2045_v60 }
 0x408   : > { %v2048_v55 = vpop.f32.mrf.mxu1 }
 0x409   : > { %v1657_v28 = vadd.f32 %v2047_v34, %v1400_v52 }
 0x40a   : > { %v2049_v23 = vpop.f32.mrf.mxu1 }
 0x40b   : > { %1673 = vst [vmem:[%s2519_s11 + $0x70] sm:$0xff] %v1657_v28  ;;  %v2050_v57 = vadd.f32 %v2049_v23, %v2048_v55 }
 0x40d   : > { %v1658_v10 = vadd.f32 %v2050_v57, %v1401_v38 }
 0x40f   : > { %1674 = vst [vmem:[%s2519_s11 + $0x78] sm:$0xff] %v1658_v10 }
 0x410   : > { %2266 = shalt.err (!%p2263_p5)
}
 0x411   : > { %s2267_s11 = scalar_lea.hbm %s2988_s29, 2048  ;;  %s2271_s22 = scalar_lea.hbm %s3050_s10, 4096 }
 0x412   : > { %p2268_p6 = scmp.ne.s32.totalorder %s2988_s29, %s2267_s11  ;;  %p2272_p10 = scmp.lt.s32.totalorder %s2988_s29, %s3050_s10 }
 0x413   : > { %p2273_p11 = scmp.lt.s32.totalorder %s2271_s22, %s2267_s11 }
 0x414   : > { %p2269_p7 = pnand %p2268_p6, %p2430_p4 }
 0x415   : > { %p2274_p12 = por %p2273_p11, %p2272_p10 }
 0x416   : > { %p2270_p9 = pneg %p2269_p7 }
 0x418   : > { %p2275_p13 = pnand %p2274_p12, %p2270_p9 }
 0x41a   : > { %2278 = shalt.err (!%p2275_p13)
}
 0x41b   : > { %s2333_s16 = smov 128   ;;  %s2334_s20 = smov 8  }
 0x41c   : > { %2099 = dma.vmem_to_hbm [thread:$0]  (%p2430_p4), %s2990_s27, 2048, %s2988_s29, %s2995_s12, %s2333_s16, %s2333_s16, %s2334_s20  }
 0x41d PF: > { %p2105_p0 = scmp.ge.s32.totalorder %s2329_s18, 2  ;;  %s1704_s24 = sand.u32 1, %s2309_s13  }
 0x41e   : > { %s1705_s11 = scalar_lea.sflag [#allocation4], %s1704_s24 }
 0x41f   : > { %p2102_p1 = pnand %p2105_p0, %p2437_p8 }
 0x421   : > { %p2103_p2 = pneg %p2102_p1 }
 0x423   : > { %2304 = dma.done.wait (%p2103_p2), %s1705_s11, 2048  }
 0x424   : > { %2306 = vsyncadd (%p2103_p2), %s1705_s11, 4294965248  ;;  %s23_s18 = sadd.s32 1, %s2329_s18   ;;  %s3057_s13 = smov %s2313_s14 }
 0x425   : > { %p20_p3 = scmp.ge.s32.totalorder %s23_s18, 4   ;;  %s3058_s14 = smov %s2317_s15 }
 0x426   : > { %s3059_s15 = smov %s2443_s26  ;;  %s3060_s16 = smov %s2325_s17 }
 0x427   : > { %s3061_s17 = smov %s3063_s21  ;;  %22 = sbr.rel (!%p20_p3) target bundleno = 6 (0x6), region = 111 }
 0x42c   :  { %1710 = vsyncpa [#allocation4], 1 }
 0x42d   :  { %1712 = vsyncpa [#allocation4 + $0x1], 1 }

// kernel: encoder_layer.4
= control target key start
LH: loop header
LB: loop body
LE: loop exit
PB: predicated region body
PF: predicated region fallthrough
CT: control target
= control target key end

     0   :  { %s3737_s15 = smov 0   ;;  %s3739_s16 = smov 0   ;;  %s4998_s0 = inlined_call_operand.vmem [shape: bf16[2,128,128], index: 0, kind: input, shape index: {}]   ;;  %s4999_s1 = inlined_call_operand.vmem [shape: bf16[2,128,128], index: 1, kind: input, shape index: {}]   ;;  %s5000_s2 = inlined_call_operand.vmem [shape: bf16[2,128,128], index: 2, kind: input, shape index: {}]   ;;  %s5001_s3 = inlined_call_operand.vmem [shape: f32[2,1,128], index: 3, kind: input, shape index: {}]   ;;  %s5002_s4 = inlined_call_operand.vmem [shape: bf16[2,128,128], index: 4, kind: output, shape index: {}]  }
   0x1   :  { %s3741_s17 = smov 0  }
   0x2 LB: > { %s26_s18 = sadd.s32 1, %s3703_s16  ;;  %p2666_p0 = scmp.ge.s32.totalorder %s3707_s17, 1  ;;  %s3707_s17 = sphi %s3741_s17, %s14_s17   ;;  %s3703_s16 = sphi %s3739_s16, %s5115_s16   ;;  %s3699_s15 = sphi %s3737_s15, %s5114_s15  }
   0x3   : > { %p28_p1 = scmp.ge.s32.totalorder %s26_s18, 2  ;;  %p211_p2 = scmp.lt.s32.totalorder %s3707_s17, 3 }
   0x5   : > { %s5117_s18 = smov (%p28_p1, %s26_s18), 0  ;;  %p212_p3 = pnand %p2666_p0, %p211_p2 }
   0x7   : > { %215 = sbr.rel (%p212_p3) target bundleno = 2144 (0x860), region = 36 }
   0xc   : > { %p259_p4 = scmp.lt.s32.totalorder %s3699_s15, 1  ;;  %vm427_vm0 = vcmask 261120   ;;  %s3709_s23 = smov 96   ;;  %vm2428_vm1 = vcmask 523264   ;;  %vm2445_vm2 = vcmask 785408  }
   0xd   : > { %s3710_s7 = smov 64   ;;  %s3711_s8 = smov 32  }
   0xe   : > { %s5119_s15 = smov (!%p259_p4, %s3699_s15), 1 }
   0xf   : > { %s3758_s19 = sshll.u32 %s5119_s15, 6  ;;  %s3928_s6 = scalar_lea.vmem %s5001_s3, %s5119_s15 }
  0x10   : > { %s3764_s22 = scalar_lea.vmem %s4999_s1, %s3758_s19  ;;  %s3789_s26 = scalar_lea.vmem %s4998_s0, %s3758_s19  ;;  %v3931_v33 = vld [vmem:[%s3928_s6] ss:$0 sm:$0xff] }
  0x11   : > { %v3767_v0 = vld [vmem:[%s3764_s22 + $0x38] sm:$0xff]   ;;  %v3770_v1 = vld [vmem:[%s3764_s22 + $0x30] sm:$0xff]   ;;  %v3783_v3 = vld [vmem:[%s3764_s22 + $0x28] sm:$0xff]   ;;  %s3878_s29 = scalar_lea.vmem %s5000_s2, %s3758_s19  ;;  %s4899_s11 = scalar_lea.vmem %s5002_s4, %s3758_s19 }
  0x12   : > { %3201 = vmatprep.subr.msk.bf16.mxu0 %vm427_vm0, %v3767_v0  ;;  %v474_v2 = vsel %vm427_vm0, %v3767_v0, 0  ;;  %900 = vrot.lane.b32.xlu0 %v3767_v0, %s3709_s23  ;;  %v471_v4 = vsel %vm427_vm0, %v3770_v1, 0  ;;  %v3796_v5 = vld [vmem:[%s3789_s26] sm:$0xff]   ;;  %v468_v6 = vsel %vm427_vm0, %v3783_v3, 0  ;;  %v3812_v9 = vld [vmem:[%s3764_s22 + $0x18] sm:$0xff]   ;;  %v3819_v11 = vld [vmem:[%s3764_s22 + $0x10] sm:$0xff]  }
  0x13   : > { %2946 = vmatpush3.bf16.xpose.msra.mxu0 %v474_v2  ;;  %898 = vrot.lane.b32.xlu1 %v3770_v1, %s3709_s23  ;;  %v3805_v7 = vld [vmem:[%s3764_s22 + $0x20] sm:$0xff]   ;;  %v462_v10 = vsel %vm427_vm0, %v3812_v9, 0  ;;  %v459_v12 = vsel %vm427_vm0, %v3819_v11, 0  ;;  %v3826_v13 = vld [vmem:[%s3764_s22 + $0x8] sm:$0xff]   ;;  %v3843_v18 = vld [vmem:[%s3789_s26 + $0x10] sm:$0xff]  }
  0x14   : > { %3202 = vmatprep.subr.msk.bf16.mxu0 %vm427_vm0, %v3770_v1  ;;  %2961 = vmatprep.mubr.msk.bf16.mxu0 %vm427_vm0, %v3796_v5  ;;  %v465_v8 = vsel %vm427_vm0, %v3805_v7, 0  ;;  %v456_v14 = vsel %vm427_vm0, %v3826_v13, 0  ;;  %v3833_v15 = vld [vmem:[%s3764_s22] sm:$0xff]   ;;  %v3840_v17 = vld [vmem:[%s3789_s26 + $0x8] sm:$0xff]   ;;  %v3850_v19 = vld [vmem:[%s3789_s26 + $0x18] sm:$0xff]  }
  0x15   : > { %v453_v16 = vsel %vm427_vm0, %v3833_v15, 0  ;;  %v3853_v20 = vld [vmem:[%s3789_s26 + $0x20] sm:$0xff]   ;;  %v3860_v21 = vld [vmem:[%s3789_s26 + $0x28] sm:$0xff]   ;;  %v3863_v22 = vld [vmem:[%s3789_s26 + $0x30] sm:$0xff]  }
  0x16   : > { %896 = vrot.lane.b32.xlu0 %v3783_v3, %s3709_s23  ;;  %v3870_v23 = vld [vmem:[%s3789_s26 + $0x38] sm:$0xff]   ;;  %v3884_v25 = vld [vmem:[%s3878_s29 + $0x30] sm:$0xff]   ;;  %v3891_v26 = vld [vmem:[%s3878_s29 + $0x28] sm:$0xff]  }
  0x17   : > { %v3881_v24 = vld [vmem:[%s3878_s29 + $0x38] sm:$0xff]   ;;  %v3896_v27 = vld [vmem:[%s3878_s29 + $0x20] sm:$0xff]   ;;  %v3904_v29 = vld [vmem:[%s3878_s29 + $0x10] sm:$0xff]  }
  0x18   : > { %2977 = vmatprep.subr.bf16.mxu1 %v3881_v24  ;;  %v3901_v28 = vld [vmem:[%s3878_s29 + $0x18] sm:$0xff]   ;;  %v3910_v30 = vld [vmem:[%s3878_s29 + $0x8] sm:$0xff]   ;;  %v3915_v31 = vld [vmem:[%s3878_s29] sm:$0xff]  }
  0x19   : > { %2978 = vmatpush3.bf16.msra.mxu1 %v3881_v24 }
  0x1a   : > { %2979 = vmatprep.subr.bf16.mxu1 %v3884_v25 }
  0x1b   : > { %2948 = vmatpush3.bf16.xpose.msra.mxu0 %v471_v4 }
  0x1c   : > { %3203 = vmatprep.subr.msk.bf16.mxu0 %vm427_vm0, %v3783_v3 }
  0x1d   : > { %2980 = vmatpush3.bf16.msra.mxu1 %v3884_v25 }
  0x1e   : > { %2981 = vmatprep.subr.bf16.mxu1 %v3891_v26 }
  0x21   : > { %2982 = vmatpush3.bf16.msra.mxu1 %v3891_v26 }
  0x22   : > { %2983 = vmatprep.subr.bf16.mxu1 %v3896_v27 }
  0x23   : > { %2950 = vmatpush3.bf16.xpose.msra.mxu0 %v468_v6 }
  0x24   : > { %3204 = vmatprep.subr.msk.bf16.mxu0 %vm427_vm0, %v3805_v7 }
  0x25   : > { %2984 = vmatpush3.bf16.msra.mxu1 %v3896_v27 }
  0x26   : > { %2985 = vmatprep.subr.bf16.mxu1 %v3901_v28 }
  0x29   : > { %2986 = vmatpush3.bf16.msra.mxu1 %v3901_v28 }
  0x2a   : > { %2987 = vmatprep.subr.bf16.mxu1 %v3904_v29 }
  0x2b   : > { %2952 = vmatpush3.bf16.xpose.msra.mxu0 %v465_v8 }
  0x2c   : > { %3205 = vmatprep.subr.msk.bf16.mxu0 %vm427_vm0, %v3812_v9 }
  0x2d   : > { %2988 = vmatpush3.bf16.msra.mxu1 %v3904_v29 }
  0x2e   : > { %2989 = vmatprep.subr.bf16.mxu1 %v3910_v30 }
  0x31   : > { %2990 = vmatpush3.bf16.msra.mxu1 %v3910_v30 }
  0x32   : > { %2991 = vmatprep.subr.bf16.mxu1 %v3915_v31 }
  0x33   : > { %2954 = vmatpush3.bf16.xpose.msra.mxu0 %v462_v10 }
  0x34   : > { %3206 = vmatprep.subr.msk.bf16.mxu0 %vm427_vm0, %v3819_v11 }
  0x35   : > { %2992 = vmatpush3.bf16.msra.mxu1 %v3915_v31 }
  0x3b   : > { %2956 = vmatpush3.bf16.xpose.msra.mxu0 %v459_v12 }
  0x3c   : > { %3207 = vmatprep.subr.msk.bf16.mxu0 %vm427_vm0, %v3826_v13 }
  0x43   : > { %2958 = vmatpush3.bf16.xpose.msra.mxu0 %v456_v14 }
  0x44   : > { %3208 = vmatprep.subr.msk.bf16.mxu0 %vm427_vm0, %v3833_v15 }
  0x4b   : > { %2960 = vmatpush3.bf16.xpose.msra.mxu0 %v453_v16 }
  0x52   : > { %2962 = vmatmul.mubr.msk.bf16.vlgmr.msra.gmra.mxu0 %vm427_vm0, %v3840_v17 }
  0x53   : > { %2965 = vmatprep.mubr.msk.bf16.mxu0 %vm427_vm0, %v3843_v18 }
  0x5a   : > { %2966 = vmatmul.mubr.msk.bf16.gmra.mxu0 %vm427_vm0, %v3850_v19 }
  0x5b   : > { %2969 = vmatprep.mubr.msk.bf16.mxu0 %vm427_vm0, %v3853_v20 }
  0x62   : > { %2970 = vmatmul.mubr.msk.bf16.gmra.mxu0 %vm427_vm0, %v3860_v21 }
  0x63   : > { %2973 = vmatprep.mubr.msk.bf16.mxu0 %vm427_vm0, %v3863_v22 }
  0x6a   : > { %2974 = vmatmul.mubr.msk.bf16.gmra.mxu0 %vm427_vm0, %v3870_v23 }
  0x84   : > { %v3919_v32 = vpop.permute.xlu0 %900 }
  0x85   : > { %3209 = vmatprep.subr.msk.bf16.mxu1 %vm427_vm0, %v3919_v32  ;;  %v899_v6 = vpop.permute.xlu1 %898 }
  0x88   : > { %v897_v8 = vpop.permute.xlu0 %896 }
 0x112   : > { %v2963_v34 = vpop.f32.mrf.mxu0 }
 0x113   : > { %v3934_v35 = vadd.f32 %v2963_v34, %v3931_v33 }
 0x114   : > { %v510_v36 = vpop.f32.mrf.mxu0 }
 0x115   : > { %v3937_v37 = vadd.f32 %v3931_v33, %v510_v36  ;;  %577 = vmax.xlane.f32.xlu1 %v3934_v35 }
 0x116   : > { %v2964_v38 = vpop.f32.mrf.mxu0 }
 0x117   : > { %v3941_v39 = vadd.f32 %v2964_v38, %v3931_v33  ;;  %573 = vmax.xlane.f32.xlu0 %v3937_v37 }
 0x118   : > { %v513_v40 = vpop.f32.mrf.mxu0 }
 0x119   : > { %v3945_v41 = vadd.f32 %v3931_v33, %v513_v40  ;;  %579 = vmax.xlane.f32.xlu1 %v3941_v39 }
 0x11a   : > { %v2967_v42 = vpop.f32.mrf.mxu0 }
 0x11b   : > { %v3949_v43 = vadd.f32 %v2967_v42, %v3931_v33  ;;  %575 = vmax.xlane.f32.xlu0 %v3945_v41 }
 0x11c   : > { %v526_v44 = vpop.f32.mrf.mxu0 }
 0x11d   : > { %585 = vmax.xlane.f32.xlu1 %v3949_v43  ;;  %v3954_v45 = vadd.f32 %v3931_v33, %v526_v44 }
 0x11e   : > { %v2968_v46 = vpop.f32.mrf.mxu0 }
 0x11f   : > { %v3957_v48 = vadd.f32 %v2968_v46, %v3931_v33 }
 0x120   : > { %v529_v47 = vpop.f32.mrf.mxu0 }
 0x121   : > { %581 = vmax.xlane.f32.xlu1 %v3954_v45  ;;  %v3961_v51 = vadd.f32 %v3931_v33, %v529_v47 }
 0x122   : > { %v2971_v49 = vpop.f32.mrf.mxu0 }
 0x123   : > { %v3988_v63 = vadd.f32 %v2971_v49, %v3931_v33 }
 0x124   : > { %v542_v50 = vpop.f32.mrf.mxu0 }
 0x125   : > { %587 = vmax.xlane.f32.xlu1 %v3957_v48  ;;  %v3994_v2 = vadd.f32 %v3931_v33, %v542_v50 }
 0x126   : > { %v2972_v52 = vpop.f32.mrf.mxu0 }
 0x127   : > { %v4000_v4 = vadd.f32 %v2972_v52, %v3931_v33 }
 0x128   : > { %v545_v53 = vpop.f32.mrf.mxu0 }
 0x129   : > { %583 = vmax.xlane.f32.xlu1 %v3961_v51  ;;  %v3966_v54 = vadd.f32 %v3931_v33, %v545_v53 }
 0x12a   : > { %v2975_v55 = vpop.f32.mrf.mxu0 }
 0x12b   : > { %v3970_v56 = vadd.f32 %v2975_v55, %v3931_v33 }
 0x12c   : > { %v558_v57 = vpop.f32.mrf.mxu0 }
 0x12d   : > { %591 = vmax.xlane.f32.xlu1 %v3966_v54  ;;  %v3976_v58 = vadd.f32 %v3931_v33, %v558_v57 }
 0x12e   : > { %v2976_v59 = vpop.f32.mrf.mxu0 }
 0x12f   : > { %v3980_v60 = vadd.f32 %v2976_v59, %v3931_v33 }
 0x130   : > { %v561_v61 = vpop.f32.mrf.mxu0 }
 0x131   : > { %601 = vmax.xlane.f32.xlu1 %v3970_v56  ;;  %894 = vrot.lane.b32.xlu0 %v3805_v7, %s3709_s23  ;;  %v3984_v62 = vadd.f32 %v3931_v33, %v561_v61 }
 0x135   : > { %597 = vmax.xlane.f32.xlu1 %v3976_v58 }
 0x139   : > { %603 = vmax.xlane.f32.xlu1 %v3980_v60 }
 0x13d   : > { %599 = vmax.xlane.f32.xlu1 %v3984_v62 }
 0x14e   : > { %892 = vrot.lane.b32.xlu1 %v3812_v9, %s3709_s23 }
 0x150   : > { %593 = vmax.xlane.f32.xlu0 %v3988_v63 }
 0x152   : > { %872 = vrot.lane.b32.xlu1 %v3840_v17, %s3709_s23 }
 0x154   : > { %589 = vmax.xlane.f32.xlu0 %v3994_v2 }
 0x156   : > { %876 = vrot.lane.b32.xlu1 %v3850_v19, %s3709_s23 }
 0x158   : > { %595 = vmax.xlane.f32.xlu0 %v4000_v4 }
 0x15a   : > { %880 = vrot.lane.b32.xlu1 %v3860_v21, %s3709_s23 }
 0x15e   : > { %884 = vrot.lane.b32.xlu1 %v3870_v23, %s3709_s23 }
 0x162   : > { %1179 = vrot.lane.b32.xlu1 %v3884_v25, %s3709_s23 }
 0x166   : > { %1171 = vrot.lane.b32.xlu1 %v3904_v29, %s3709_s23 }
 0x16a   : > { %1167 = vrot.lane.b32.xlu1 %v3915_v31, %s3709_s23 }
 0x16e   : > { %890 = vrot.lane.b32.xlu0 %v3819_v11, %s3709_s23  ;;  %1348 = vrot.lane.b32.xlu1 %v3770_v1, %s3710_s7 }
 0x172   : > { %888 = vrot.lane.b32.xlu0 %v3826_v13, %s3709_s23 }
 0x176   : > { %886 = vrot.lane.b32.xlu0 %v3833_v15, %s3709_s23 }
 0x17a   : > { %870 = vrot.lane.b32.xlu0 %v3796_v5, %s3709_s23 }
 0x17e   : > { %874 = vrot.lane.b32.xlu0 %v3843_v18, %s3709_s23 }
 0x182   : > { %878 = vrot.lane.b32.xlu0 %v3853_v20, %s3709_s23 }
 0x186   : > { %882 = vrot.lane.b32.xlu0 %v3863_v22, %s3709_s23 }
 0x18a   : > { %1181 = vrot.lane.b32.xlu0 %v3881_v24, %s3709_s23 }
 0x18e   : > { %1177 = vrot.lane.b32.xlu0 %v3891_v26, %s3709_s23 }
 0x192   : > { %1175 = vrot.lane.b32.xlu0 %v3896_v27, %s3709_s23 }
 0x196   : > { %1173 = vrot.lane.b32.xlu0 %v3901_v28, %s3709_s23 }
 0x19a   : > { %1169 = vrot.lane.b32.xlu0 %v3910_v30, %s3709_s23 }
 0x19e   : > { %v578_v10 = vpop.xlane.xlu1 %577  ;;  %1350 = vrot.lane.b32.xlu0 %v3767_v0, %s3710_s7 }
 0x19f   : > { %v607_v16 = vsub.f32 %v3934_v35, %v578_v10 }
 0x1a0   : > { %v574_v12 = vpop.xlane.xlu0 %573 }
 0x1a1   : > { %v605_v14 = vsub.f32 %v3937_v37, %v574_v12  ;;  %v625_v46 = vmul.f32 1.442695, %v607_v16 }
 0x1a2   : > { %v580_v34 = vpop.xlane.xlu1 %579 }
 0x1a3   : > { %v621_v36 = vmul.f32 1.442695, %v605_v14  ;;  %v608_v38 = vsub.f32 %v3941_v39, %v580_v34 }
 0x1a4   : > { %v576_v40 = vpop.xlane.xlu0 %575 }
 0x1a5   : > { %v627_v42 = vmul.f32 1.442695, %v608_v38  ;;  %v606_v44 = vsub.f32 %v3945_v41, %v576_v40  ;;  %3404 = vpow2.f32 %v621_v36  ;;  %v945_v40 = vsel %vm427_vm0, %v899_v6, 0 }
 0x1a6   : > { %v586_v47 = vpop.xlane.xlu1 %585 }
 0x1a7   : > { %v623_v49 = vmul.f32 1.442695, %v606_v44  ;;  %3406 = vpow2.f32 %v627_v42  ;;  %v611_v53 = vsub.f32 %v3949_v43, %v586_v47 }
 0x1a9   : > { %3408 = vpow2.f32 %v623_v49  ;;  %v633_v61 = vmul.f32 1.442695, %v611_v53 }
 0x1aa   : > { %3410 = vpow2.f32 %v625_v46  ;;  %v582_v50 = vpop.xlane.xlu1 %581 }
 0x1ab   : > { %v609_v37 = vsub.f32 %v3954_v45, %v582_v50  ;;  %v895_v50 = vpop.permute.xlu0 %894 }
 0x1ad   : > { %v629_v39 = vmul.f32 1.442695, %v609_v37 }
 0x1ae   : > { %v588_v52 = vpop.xlane.xlu1 %587 }
 0x1af   : > { %v612_v35 = vsub.f32 %v3957_v48, %v588_v52  ;;  %3412 = vpow2.f32 %v629_v39 }
 0x1b1   : > { %v635_v55 = vmul.f32 1.442695, %v612_v35  ;;  %v939_v35 = vsel %vm427_vm0, %v895_v50, 0 }
 0x1b2   : > { %v584_v57 = vpop.xlane.xlu1 %583  ;;  %v4047_v59 = vpop.eup %3404 }
 0x1b3   : > { %v610_v41 = vsub.f32 %v3961_v51, %v584_v57  ;;  %3414 = vpow2.f32 %v635_v55  ;;  %v948_v51 = vsel %vm427_vm0, %v3919_v32, 0 }
 0x1b4   : > { %v4049_v10 = vpop.eup %3406 }
 0x1b5   : > { %v631_v12 = vmul.f32 1.442695, %v610_v41 }
 0x1b6   : > { %v4051_v14 = vpop.eup %3408  ;;  %v592_v45 = vpop.xlane.xlu1 %591 }
 0x1b7   : > { %v4053_v16 = vpop.eup %3410  ;;  %3416 = vpow2.f32 %v631_v12  ;;  %v685_v43 = vpack.c.bf16 %v4051_v14, %v4047_v59  ;;  %v614_v39 = vsub.f32 %v3966_v54, %v592_v45 }
 0x1b8   : > { %3418 = vpow2.f32 %v633_v61  ;;  %v686_v48 = vpack.c.bf16 %v4049_v10, %v4053_v16 }
 0x1b9   : > { %2993 = vmatprep.mubr.bf16.mxu1 %v685_v43 }
 0x1ba   : > { %2994 = vmatmul.mubr.bf16.vlgmr.msra.gmra.mxu1 %v686_v48  ;;  %v602_v34 = vpop.xlane.xlu1 %601 }
 0x1bb   : > { %3010 = vmatpush3.bf16.xpose.msra.mxu1 %v948_v51 }
 0x1bc   : > { %3210 = vmatprep.subr.msk.bf16.mxu1 %vm427_vm0, %v899_v6  ;;  %v4062_v38 = vpop.eup %3412  ;;  %v942_v6 = vsel %vm427_vm0, %v897_v8, 0 }
 0x1be   : > { %v598_v36 = vpop.xlane.xlu1 %597 }
 0x1bf   : > { %v617_v43 = vsub.f32 %v3976_v58, %v598_v36 }
 0x1c0   : > { %v4065_v42 = vpop.eup %3414 }
 0x1c1   : > { %v645_v45 = vmul.f32 1.442695, %v617_v43 }
 0x1c2   : > { %v604_v49 = vpop.xlane.xlu1 %603 }
 0x1c3   : > { %3012 = vmatpush3.bf16.xpose.msra.mxu1 %v945_v40 }
 0x1c4   : > { %v4067_v44 = vpop.eup %3416  ;;  %3211 = vmatprep.subr.msk.bf16.mxu1 %vm427_vm0, %v897_v8  ;;  %v639_v8 = vmul.f32 1.442695, %v614_v39 }
 0x1c5   : > { %v4070_v46 = vpop.eup %3418  ;;  %v687_v32 = vpack.c.bf16 %v4067_v44, %v4062_v38 }
 0x1c6   : > { %v688_v47 = vpack.c.bf16 %v4065_v42, %v4070_v46  ;;  %v600_v37 = vpop.xlane.xlu1 %599  ;;  %3420 = vpow2.f32 %v639_v8 }
 0x1c7   : > { %2997 = vmatprep.mubr.bf16.mxu1 %v687_v32  ;;  %v618_v57 = vsub.f32 %v3984_v62, %v600_v37 }
 0x1c8   : > { %2998 = vmatmul.mubr.bf16.gmra.mxu1 %v688_v47  ;;  %v620_v47 = vsub.f32 %v3980_v60, %v604_v49 }
 0x1c9   : > { %v647_v48 = vmul.f32 1.442695, %v618_v57 }
 0x1ca   : > { %v893_v52 = vpop.permute.xlu1 %892 }
 0x1cb   : > { %3014 = vmatpush3.bf16.xpose.msra.mxu1 %v942_v6  ;;  %v936_v53 = vsel %vm427_vm0, %v893_v52, 0  ;;  %v619_v6 = vsub.f32 %v3970_v56, %v602_v34 }
 0x1cc   : > { %3212 = vmatprep.subr.msk.bf16.mxu1 %vm427_vm0, %v895_v50 }
 0x1cd   : > { %v649_v50 = vmul.f32 1.442695, %v619_v6 }
 0x1ce   : > { %v873_v43 = vpop.permute.xlu1 %872 }
 0x1d3   : > { %3016 = vmatpush3.bf16.xpose.msra.mxu1 %v939_v35  ;;  %v4093_v49 = vpop.eup %3420 }
 0x1d4   : > { %3213 = vmatprep.subr.msk.bf16.mxu1 %vm427_vm0, %v893_v52 }
 0x1d9   : > { %v594_v55 = vpop.xlane.xlu0 %593 }
 0x1da   : > { %v615_v41 = vsub.f32 %v3988_v63, %v594_v55 }
 0x1db   : > { %3018 = vmatpush3.bf16.xpose.msra.mxu1 %v936_v53 }
 0x1dc   : > { %v641_v40 = vmul.f32 1.442695, %v615_v41 }
 0x1dd   : > { %v590_v61 = vpop.xlane.xlu0 %589 }
 0x1de   : > { %v613_v12 = vsub.f32 %v3994_v2, %v590_v61  ;;  %v651_v2 = vmul.f32 1.442695, %v620_v47 }
 0x1e0   : > { %v637_v51 = vmul.f32 1.442695, %v613_v12 }
 0x1e1   : > { %v596_v32 = vpop.xlane.xlu0 %595 }
 0x1e2   : > { %3422 = vpow2.f32 %v637_v51  ;;  %v616_v54 = vsub.f32 %v4000_v4, %v596_v32  ;;  %v877_v51 = vpop.permute.xlu1 %876 }
 0x1e3   : > { %3424 = vpow2.f32 %v647_v48 }
 0x1e4   : > { %v643_v62 = vmul.f32 1.442695, %v616_v54  ;;  %3426 = vpow2.f32 %v641_v40 }
 0x1e5   : > { %v891_v63 = vpop.permute.xlu0 %890 }
 0x1e6   : > { %3428 = vpow2.f32 %v643_v62  ;;  %3214 = vmatprep.subr.msk.bf16.mxu1 %vm427_vm0, %v891_v63  ;;  %v933_v58 = vsel %vm427_vm0, %v891_v63, 0  ;;  %v881_v32 = vpop.permute.xlu1 %880 }
 0x1e7   : > { %3430 = vpow2.f32 %v645_v45  ;;  %3020 = vmatpush3.bf16.xpose.msra.mxu1 %v933_v58 }
 0x1e8   : > { %3432 = vpow2.f32 %v651_v2 }
 0x1e9   : > { %v889_v36 = vpop.permute.xlu0 %888  ;;  %3434 = vpow2.f32 %v649_v50 }
 0x1ea   : > { %3215 = vmatprep.subr.msk.bf16.mxu1 %vm427_vm0, %v889_v36  ;;  %v930_v60 = vsel %vm427_vm0, %v889_v36, 0  ;;  %v885_v45 = vpop.permute.xlu1 %884 }
 0x1ed   : > { %v887_v4 = vpop.permute.xlu0 %886 }
 0x1ee   : > { %v927_v55 = vsel %vm427_vm0, %v887_v4, 0  ;;  %v1180_v62 = vpop.permute.xlu1 %1179 }
 0x1ef   : > { %v4095_v56 = vpop.eup %3422  ;;  %3022 = vmatpush3.bf16.xpose.msra.mxu1 %v930_v60 }
 0x1f0   : > { %v689_v34 = vpack.c.bf16 %v4093_v49, %v4095_v56  ;;  %3216 = vmatprep.subr.msk.bf16.mxu1 %vm427_vm0, %v887_v4  ;;  %v4100_v37 = vpop.eup %3424 }
 0x1f1   : > { %5008 = vst [vmem:[#allocation2_spill] sm:$0xff] %v4100_v37  ;;  %v4102_v52 = vpop.eup %3426  ;;  %v871_v12 = vpop.permute.xlu0 %870 }
 0x1f2   : > { %3001 = vmatprep.mubr.bf16.mxu1 %v689_v34  ;;  %v1172_v6 = vpop.permute.xlu1 %1171 }
 0x1f3   : > { %v4104_v35 = vpop.eup %3428 }
 0x1f4   : > { %5009 = vst [vmem:[#allocation3_spill] sm:$0xff] %v4104_v35  ;;  %v4106_v53 = vpop.eup %3430  ;;  %v690_v39 = vpack.c.bf16 %v4104_v35, %v4102_v52 }
 0x1f5   : > { %5010 = vst [vmem:[#allocation4_spill] sm:$0xff] %v4106_v53  ;;  %v691_v57 = vpack.c.bf16 %v4100_v37, %v4106_v53  ;;  %v4113_v8 = vpop.eup %3432  ;;  %v875_v48 = vpop.permute.xlu0 %874 }
 0x1f6   : > { %3002 = vmatmul.mubr.bf16.gmra.mxu1 %v690_v39  ;;  %5011 = vst [vmem:[#allocation5_spill] sm:$0xff] %v4113_v8  ;;  %v4115_v41 = vpop.eup %3434  ;;  %v1168_v2 = vpop.permute.xlu1 %1167 }
 0x1f7   : > { %3005 = vmatprep.mubr.bf16.mxu1 %v691_v57  ;;  %3024 = vmatpush3.bf16.xpose.msra.mxu1 %v927_v55  ;;  %5012 = vst [vmem:[#allocation6_spill] sm:$0xff] %v4115_v41  ;;  %v692_v61 = vpack.c.bf16 %v4113_v8, %v4115_v41 }
 0x1f9   : > { %v879_v40 = vpop.permute.xlu0 %878 }
 0x1fd   : > { %v883_v54 = vpop.permute.xlu0 %882 }
 0x1fe   : > { %3006 = vmatmul.mubr.bf16.gmra.mxu1 %v692_v61 }
 0x1ff   : > { %3025 = vmatprep.mubr.msk.bf16.mxu1 %vm427_vm0, %v871_v12 }
 0x201   : > { %v1182_v47 = vpop.permute.xlu0 %1181 }
 0x202   : > { %3041 = vmatprep.subr.bf16.mxu0 %v1182_v47 }
 0x203   : > { %3042 = vmatpush3.bf16.msra.mxu0 %v1182_v47 }
 0x204   : > { %3043 = vmatprep.subr.bf16.mxu0 %v1180_v62 }
 0x205   : > { %v1178_v63 = vpop.permute.xlu0 %1177 }
 0x206   : > { %3026 = vmatmul.mubr.msk.bf16.vlgmr.msra.gmra.mxu1 %vm427_vm0, %v873_v43 }
 0x207   : > { %3029 = vmatprep.mubr.msk.bf16.mxu1 %vm427_vm0, %v875_v48  ;;  %3044 = vmatpush3.bf16.msra.mxu0 %v1180_v62 }
 0x208   : > { %3045 = vmatprep.subr.bf16.mxu0 %v1178_v63 }
 0x209   : > { %v1176_v1 = vpop.permute.xlu0 %1175 }
 0x20b   : > { %3046 = vmatpush3.bf16.msra.mxu0 %v1178_v63 }
 0x20c   : > { %3047 = vmatprep.subr.bf16.mxu0 %v1176_v1 }
 0x20d   : > { %v1174_v0 = vpop.permute.xlu0 %1173 }
 0x20e   : > { %3030 = vmatmul.mubr.msk.bf16.gmra.mxu1 %vm427_vm0, %v877_v51 }
 0x20f   : > { %3033 = vmatprep.mubr.msk.bf16.mxu1 %vm427_vm0, %v879_v40  ;;  %3048 = vmatpush3.bf16.msra.mxu0 %v1176_v1 }
 0x210   : > { %3049 = vmatprep.subr.bf16.mxu0 %v1174_v0 }
 0x211   : > { %v1170_v58 = vpop.permute.xlu0 %1169 }
 0x213   : > { %3050 = vmatpush3.bf16.msra.mxu0 %v1174_v0 }
 0x214   : > { %3051 = vmatprep.subr.bf16.mxu0 %v1172_v6 }
 0x215   : > { %v4133_v50 = vpop.permute.xlu0 %1350 }
 0x216   : > { %3034 = vmatmul.mubr.msk.bf16.gmra.mxu1 %vm427_vm0, %v881_v32 }
 0x217   : > { %3037 = vmatprep.mubr.msk.bf16.mxu1 %vm427_vm0, %v883_v54  ;;  %3052 = vmatpush3.bf16.msra.mxu0 %v1172_v6 }
 0x218   : > { %3053 = vmatprep.subr.bf16.mxu0 %v1170_v58 }
 0x21b   : > { %3054 = vmatpush3.bf16.msra.mxu0 %v1170_v58 }
 0x21c   : > { %3055 = vmatprep.subr.bf16.mxu0 %v1168_v2 }
 0x21e   : > { %3038 = vmatmul.mubr.msk.bf16.gmra.mxu1 %vm427_vm0, %v885_v45 }
 0x21f   : > { %3056 = vmatpush3.bf16.msra.mxu0 %v1168_v2 }
 0x220   : > { %3217 = vmatprep.subr.msk.bf16.mxu0 %vm427_vm0, %v4133_v50 }
 0x27a   : > { %v4131_v36 = vpop.f32.mrf.mxu1 }
 0x27b   : > { %5013 = vst [vmem:[#allocation7_spill] sm:$0xff] %v4131_v36 }
 0x27c   : > { %v4135_v60 = vpop.f32.mrf.mxu1 }
 0x27d   : > { %5014 = vst [vmem:[#allocation8_spill] sm:$0xff] %v4135_v60 }
 0x27e   : > { %v4139_v4 = vpop.f32.mrf.mxu1 }
 0x27f   : > { %5015 = vst [vmem:[#allocation9_spill] sm:$0xff] %v4139_v4 }
 0x280   : > { %v4141_v34 = vpop.f32.mrf.mxu1 }
 0x281   : > { %5016 = vst [vmem:[#allocation10_spill] sm:$0xff] %v4141_v34 }
 0x288   : > { %v4143_v39 = vpop.f32.mrf.mxu1 }
 0x289   : > { %5017 = vst [vmem:[#allocation11_spill] sm:$0xff] %v4143_v39 }
 0x28a   : > { %v4145_v55 = vpop.f32.mrf.mxu1 }
 0x28b   : > { %5018 = vst [vmem:[#allocation12_spill] sm:$0xff] %v4145_v55 }
 0x28c   : > { %v4147_v57 = vpop.f32.mrf.mxu1 }
 0x28d   : > { %5019 = vst [vmem:[#allocation13_spill] sm:$0xff] %v4147_v57 }
 0x28e   : > { %v4149_v61 = vpop.f32.mrf.mxu1 }
 0x28f   : > { %5020 = vst [vmem:[#allocation14_spill] sm:$0xff] %v4149_v61 }
 0x2b6   : > { %v4151_v12 = vpop.f32.mrf.mxu1 }
 0x2b7   : > { %5021 = vst [vmem:[#allocation15_spill] sm:$0xff] %v4151_v12 }
 0x2b8   : > { %v4153_v43 = vpop.f32.mrf.mxu1 }
 0x2b9   : > { %5022 = vst [vmem:[#allocation16_spill] sm:$0xff] %v4153_v43 }
 0x2ba   : > { %v4155_v48 = vpop.f32.mrf.mxu1 }
 0x2bb   : > { %5023 = vst [vmem:[#allocation17_spill] sm:$0xff] %v4155_v48 }
 0x2bc   : > { %v4157_v51 = vpop.f32.mrf.mxu1 }
 0x2bd   : > { %5024 = vst [vmem:[#allocation18_spill] sm:$0xff] %v4157_v51 }
 0x2be   : > { %v4159_v40 = vpop.f32.mrf.mxu1 }
 0x2bf   : > { %5025 = vst [vmem:[#allocation19_spill] sm:$0xff] %v4159_v40 }
 0x2c0   : > { %v4161_v32 = vpop.f32.mrf.mxu1 }
 0x2c1   : > { %5026 = vst [vmem:[#allocation20_spill] sm:$0xff] %v4161_v32 }
 0x2c2   : > { %v4163_v54 = vpop.f32.mrf.mxu1 }
 0x2c3   : > { %5027 = vst [vmem:[#allocation21_spill] sm:$0xff] %v4163_v54 }
 0x2c4   : > { %v4165_v45 = vpop.f32.mrf.mxu1 }
 0x2c5   : > { %5028 = vst [vmem:[#allocation22_spill] sm:$0xff] %v4165_v45 }
 0x2c6   : > { %v3027_v47 = vpop.f32.mrf.mxu1 }
 0x2c7   : > { %v4168_v62 = vadd.f32 %v3027_v47, %v3931_v33 }
 0x2c8   : > { %v984_v63 = vpop.f32.mrf.mxu1 }
 0x2c9   : > { %v4171_v1 = vadd.f32 %v3931_v33, %v984_v63  ;;  %1051 = vmax.xlane.f32.xlu1 %v4168_v62 }
 0x2ca   : > { %v3028_v0 = vpop.f32.mrf.mxu1 }
 0x2cb   : > { %v4175_v6 = vadd.f32 %v3028_v0, %v3931_v33  ;;  %1047 = vmax.xlane.f32.xlu0 %v4171_v1 }
 0x2cc   : > { %v987_v58 = vpop.f32.mrf.mxu1 }
 0x2cd   : > { %1053 = vmax.xlane.f32.xlu1 %v4175_v6  ;;  %v4180_v2 = vadd.f32 %v3931_v33, %v987_v58 }
 0x2ce   : > { %v3031_v47 = vpop.f32.mrf.mxu1 }
 0x2cf   : > { %v4190_v12 = vadd.f32 %v3031_v47, %v3931_v33 }
 0x2d0   : > { %v1000_v45 = vpop.f32.mrf.mxu1 }
 0x2d1   : > { %1049 = vmax.xlane.f32.xlu1 %v4180_v2 }
 0x2d2   : > { %v3032_v63 = vpop.f32.mrf.mxu1 }
 0x2d4   : > { %v1003_v0 = vpop.f32.mrf.mxu1 }
 0x2d5   : > { %v4205_v57 = vadd.f32 %v3931_v33, %v1003_v0 }
 0x2d6   : > { %v3035_v32 = vpop.f32.mrf.mxu1 }
 0x2d8   : > { %v1016_v54 = vpop.f32.mrf.mxu1 }
 0x2d9   : > { %v4214_v47 = vadd.f32 %v3931_v33, %v1016_v54 }
 0x2da   : > { %v3036_v40 = vpop.f32.mrf.mxu1 }
 0x2dc   : > { %v1019_v58 = vpop.f32.mrf.mxu1 }
 0x2de   : > { %v3039_v51 = vpop.f32.mrf.mxu1 }
 0x2e0   : > { %v1032_v43 = vpop.f32.mrf.mxu1 }
 0x2e1   : > { %1344 = vrot.lane.b32.xlu0 %v3805_v7, %s3710_s7  ;;  %v4193_v7 = vadd.f32 %v3931_v33, %v1000_v45  ;;  %v4209_v45 = vadd.f32 %v3035_v32, %v3931_v33  ;;  %v4227_v32 = vadd.f32 %v3039_v51, %v3931_v33 }
 0x2e2   : > { %1346 = vrot.lane.b32.xlu1 %v3783_v3, %s3710_s7  ;;  %v3040_v48 = vpop.f32.mrf.mxu1  ;;  %v4197_v3 = vadd.f32 %v3032_v63, %v3931_v33  ;;  %v4222_v63 = vadd.f32 %v3931_v33, %v1019_v58 }
 0x2e4   : > { %v1035_v61 = vpop.f32.mrf.mxu1 }
 0x2e5   : > { %1342 = vrot.lane.b32.xlu0 %v3812_v9, %s3710_s7  ;;  %v4201_v9 = vadd.f32 %v3931_v33, %v1035_v61  ;;  %v4218_v61 = vadd.f32 %v3036_v40, %v3931_v33  ;;  %v4234_v40 = vadd.f32 %v3931_v33, %v1032_v43 }
 0x304   : > { %1059 = vmax.xlane.f32.xlu0 %v4190_v12 }
 0x306   : > { %1055 = vmax.xlane.f32.xlu1 %v4193_v7 }
 0x308   : > { %1061 = vmax.xlane.f32.xlu0 %v4197_v3 }
 0x30a   : > { %1073 = vmax.xlane.f32.xlu1 %v4201_v9 }
 0x30c   : > { %1057 = vmax.xlane.f32.xlu0 %v4205_v57 }
 0x310   : > { %1067 = vmax.xlane.f32.xlu0 %v4209_v45 }
 0x314   : > { %1063 = vmax.xlane.f32.xlu0 %v4214_v47 }
 0x318   : > { %1069 = vmax.xlane.f32.xlu0 %v4218_v61 }
 0x31b   : > { %1340 = vrot.lane.b32.xlu1 %v3819_v11, %s3710_s7  ;;  %v4240_v11 = vadd.f32 %v3040_v48, %v3931_v33 }
 0x31c   : > { %1065 = vmax.xlane.f32.xlu0 %v4222_v63 }
 0x31f   : > { %1326 = vrot.lane.b32.xlu1 %v3850_v19, %s3710_s7  ;;  %v1349_v19 = vpop.permute.xlu1 %1348 }
 0x320   : > { %1075 = vmax.xlane.f32.xlu0 %v4227_v32 }
 0x323   : > { %1330 = vrot.lane.b32.xlu1 %v3860_v21, %s3710_s7 }
 0x324   : > { %1071 = vmax.xlane.f32.xlu0 %v4234_v40 }
 0x327   : > { %1334 = vrot.lane.b32.xlu1 %v3870_v23, %s3710_s7 }
 0x328   : > { %1077 = vmax.xlane.f32.xlu0 %v4240_v11 }
 0x32b   : > { %1629 = vrot.lane.b32.xlu1 %v3884_v25, %s3710_s7 }
 0x32f   : > { %1621 = vrot.lane.b32.xlu1 %v3904_v29, %s3710_s7 }
 0x333   : > { %1617 = vrot.lane.b32.xlu1 %v3915_v31, %s3710_s7 }
 0x33e   : > { %1338 = vrot.lane.b32.xlu0 %v3826_v13, %s3710_s7 }
 0x342   : > { %1336 = vrot.lane.b32.xlu0 %v3833_v15, %s3710_s7 }
 0x346   : > { %1320 = vrot.lane.b32.xlu0 %v3796_v5, %s3710_s7 }
 0x34a   : > { %1322 = vrot.lane.b32.xlu0 %v3840_v17, %s3710_s7 }
 0x34e   : > { %1324 = vrot.lane.b32.xlu0 %v3843_v18, %s3710_s7 }
 0x352   : > { %v1052_v21 = vpop.xlane.xlu1 %1051  ;;  %1328 = vrot.lane.b32.xlu0 %v3853_v20, %s3710_s7 }
 0x353   : > { %v1081_v15 = vsub.f32 %v4168_v62, %v1052_v21 }
 0x354   : > { %v1048_v23 = vpop.xlane.xlu0 %1047 }
 0x355   : > { %v1079_v13 = vsub.f32 %v4171_v1, %v1048_v23  ;;  %v1099_v20 = vmul.f32 1.442695, %v1081_v15 }
 0x356   : > { %v1054_v25 = vpop.xlane.xlu1 %1053  ;;  %1332 = vrot.lane.b32.xlu0 %v3863_v22, %s3710_s7 }
 0x357   : > { %v1082_v5 = vsub.f32 %v4175_v6, %v1054_v25  ;;  %v1095_v17 = vmul.f32 1.442695, %v1079_v13 }
 0x358   : > { %v1345_v62 = vpop.permute.xlu0 %1344 }
 0x359   : > { %v1101_v29 = vmul.f32 1.442695, %v1082_v5  ;;  %3436 = vpow2.f32 %v1095_v17  ;;  %v1389_v1 = vsel %vm427_vm0, %v1345_v62, 0 }
 0x35a   : > { %v1050_v31 = vpop.xlane.xlu1 %1049  ;;  %1631 = vrot.lane.b32.xlu0 %v3881_v24, %s3710_s7 }
 0x35b   : > { %v1080_v18 = vsub.f32 %v4180_v2, %v1050_v31  ;;  %3438 = vpow2.f32 %v1101_v29 }
 0x35c   : > { %v1343_v6 = vpop.permute.xlu0 %1342 }
 0x35d   : > { %v1097_v33 = vmul.f32 1.442695, %v1080_v18  ;;  %v1386_v58 = vsel %vm427_vm0, %v1343_v6, 0 }
 0x35e   : > { %1627 = vrot.lane.b32.xlu0 %v3891_v26, %s3710_s7  ;;  %v1347_v51 = vpop.permute.xlu1 %1346 }
 0x35f   : > { %3440 = vpow2.f32 %v1097_v33  ;;  %v1392_v54 = vsel %vm427_vm0, %v1347_v51, 0 }
 0x360   : > { %3442 = vpow2.f32 %v1099_v20 }
 0x362   : > { %1625 = vrot.lane.b32.xlu0 %v3896_v27, %s3710_s7 }
 0x366   : > { %1623 = vrot.lane.b32.xlu0 %v3901_v28, %s3710_s7  ;;  %v4277_v22 = vpop.eup %3436  ;;  %v1398_v28 = vsel %vm427_vm0, %v4133_v50, 0 }
 0x368   : > { %v4281_v24 = vpop.eup %3438 }
 0x36a   : > { %1619 = vrot.lane.b32.xlu0 %v3910_v30, %s3710_s7  ;;  %v1395_v30 = vsel %vm427_vm0, %v1349_v19, 0 }
 0x36c   : > { %v4283_v43 = vpop.eup %3440 }
 0x36d   : > { %v4285_v48 = vpop.eup %3442  ;;  %v1159_v26 = vpack.c.bf16 %v4283_v43, %v4277_v22 }
 0x36e   : > { %v1160_v27 = vpack.c.bf16 %v4281_v24, %v4285_v48 }
 0x36f   : > { %3057 = vmatprep.mubr.bf16.mxu0 %v1159_v26 }
 0x370   : > { %3058 = vmatmul.mubr.bf16.vlgmr.msra.gmra.mxu0 %v1160_v27 }
 0x371   : > { %3074 = vmatpush3.bf16.xpose.msra.mxu0 %v1398_v28 }
 0x372   : > { %3218 = vmatprep.subr.msk.bf16.mxu0 %vm427_vm0, %v1349_v19 }
 0x379   : > { %3076 = vmatpush3.bf16.xpose.msra.mxu0 %v1395_v30 }
 0x37a   : > { %3219 = vmatprep.subr.msk.bf16.mxu0 %vm427_vm0, %v1347_v51 }
 0x381   : > { %3078 = vmatpush3.bf16.xpose.msra.mxu0 %v1392_v54 }
 0x382   : > { %3220 = vmatprep.subr.msk.bf16.mxu0 %vm427_vm0, %v1345_v62 }
 0x389   : > { %3080 = vmatpush3.bf16.xpose.msra.mxu0 %v1389_v1 }
 0x38a   : > { %3221 = vmatprep.subr.msk.bf16.mxu0 %vm427_vm0, %v1343_v6 }
 0x38d   : > { %v1060_v50 = vpop.xlane.xlu0 %1059 }
 0x38e   : > { %v1085_v23 = vsub.f32 %v4190_v12, %v1060_v50 }
 0x38f   : > { %v1056_v2 = vpop.xlane.xlu1 %1055 }
 0x390   : > { %v1083_v0 = vsub.f32 %v4193_v7, %v1056_v2  ;;  %v1107_v29 = vmul.f32 1.442695, %v1085_v23 }
 0x391   : > { %3082 = vmatpush3.bf16.xpose.msra.mxu0 %v1386_v58  ;;  %v1062_v19 = vpop.xlane.xlu0 %1061 }
 0x392   : > { %v1086_v21 = vsub.f32 %v4197_v3, %v1062_v19  ;;  %v1103_v25 = vmul.f32 1.442695, %v1083_v0 }
 0x393   : > { %v1074_v13 = vpop.xlane.xlu1 %1073 }
 0x394   : > { %v1109_v5 = vmul.f32 1.442695, %v1086_v21  ;;  %3444 = vpow2.f32 %v1103_v25 }
 0x395   : > { %v1058_v15 = vpop.xlane.xlu0 %1057 }
 0x396   : > { %v1084_v17 = vsub.f32 %v4205_v57, %v1058_v15  ;;  %3446 = vpow2.f32 %v1109_v5 }
 0x397   : > { %v1341_v31 = vpop.permute.xlu1 %1340 }
 0x398   : > { %v1105_v18 = vmul.f32 1.442695, %v1084_v17  ;;  %3222 = vmatprep.subr.msk.bf16.mxu0 %vm427_vm0, %v1341_v31  ;;  %v1383_v7 = vsel %vm427_vm0, %v1341_v31, 0 }
 0x399   : > { %v1068_v20 = vpop.xlane.xlu0 %1067  ;;  %3084 = vmatpush3.bf16.xpose.msra.mxu0 %v1383_v7 }
 0x39a   : > { %3448 = vpow2.f32 %v1105_v18  ;;  %v1089_v57 = vsub.f32 %v4209_v45, %v1068_v20  ;;  %v1092_v45 = vsub.f32 %v4201_v9, %v1074_v13 }
 0x39b   : > { %3450 = vpow2.f32 %v1107_v29 }
 0x39c   : > { %v1115_v6 = vmul.f32 1.442695, %v1089_v57 }
 0x39d   : > { %v1064_v12 = vpop.xlane.xlu0 %1063 }
 0x39e   : > { %v1087_v3 = vsub.f32 %v4214_v47, %v1064_v12 }
 0x3a0   : > { %v1111_v27 = vmul.f32 1.442695, %v1087_v3 }
 0x3a1   : > { %v1070_v33 = vpop.xlane.xlu0 %1069  ;;  %v4310_v28 = vpop.eup %3444 }
 0x3a2   : > { %v1090_v26 = vsub.f32 %v4218_v61, %v1070_v33  ;;  %3452 = vpow2.f32 %v1111_v27 }
 0x3a3   : > { %v4312_v54 = vpop.eup %3446 }
 0x3a4   : > { %v1117_v30 = vmul.f32 1.442695, %v1090_v26 }
 0x3a5   : > { %v1066_v51 = vpop.xlane.xlu0 %1065 }
 0x3a6   : > { %v1088_v62 = vsub.f32 %v4222_v63, %v1066_v51  ;;  %3454 = vpow2.f32 %v1117_v30  ;;  %v1121_v63 = vmul.f32 1.442695, %v1092_v45 }
 0x3a7   : > { %v4315_v1 = vpop.eup %3448 }
 0x3a8   : > { %v4317_v50 = vpop.eup %3450  ;;  %v1113_v47 = vmul.f32 1.442695, %v1088_v62  ;;  %v1161_v61 = vpack.c.bf16 %v4315_v1, %v4310_v28 }
 0x3a9   : > { %v1076_v2 = vpop.xlane.xlu0 %1075  ;;  %v1162_v0 = vpack.c.bf16 %v4312_v54, %v4317_v50 }
 0x3aa   : > { %3456 = vpow2.f32 %v1113_v47  ;;  %3061 = vmatprep.mubr.bf16.mxu0 %v1161_v61  ;;  %v1093_v58 = vsub.f32 %v4227_v32, %v1076_v2 }
 0x3ab   : > { %3458 = vpow2.f32 %v1115_v6  ;;  %3062 = vmatmul.mubr.bf16.gmra.mxu0 %v1162_v0  ;;  %v1327_v6 = vpop.permute.xlu1 %1326  ;;  %v3660_v0 = vld [vmem:[%s3764_s22 + $0x38] sm:$0xff]  }
 0x3ac   : > { %3460 = vpow2.f32 %v1121_v63  ;;  %v1123_v25 = vmul.f32 1.442695, %v1093_v58  ;;  %1800 = vrot.lane.b32.xlu0 %v3660_v0, %s3711_s8  ;;  %v3661_v63 = vld [vmem:[%s3764_s22 + $0x28] sm:$0xff]   ;;  %v3662_v58 = vld [vmem:[%s3764_s22 + $0x30] sm:$0xff]  }
 0x3ad   : > { %v1072_v19 = vpop.xlane.xlu0 %1071  ;;  %1796 = vrot.lane.b32.xlu1 %v3661_v63, %s3711_s8 }
 0x3ae   : > { %v1091_v21 = vsub.f32 %v4234_v40, %v1072_v19  ;;  %v3663_v19 = vld [vmem:[%s3764_s22 + $0x20] sm:$0xff]  }
 0x3af   : > { %v4327_v15 = vpop.eup %3452  ;;  %v1331_v61 = vpop.permute.xlu1 %1330 }
 0x3b0   : > { %v1119_v23 = vmul.f32 1.442695, %v1091_v21  ;;  %1798 = vrot.lane.b32.xlu0 %v3662_v58, %s3711_s8 }
 0x3b1   : > { %v1078_v5 = vpop.xlane.xlu0 %1077 }
 0x3b2   : > { %3462 = vpow2.f32 %v1119_v23  ;;  %v1094_v9 = vsub.f32 %v4240_v11, %v1078_v5 }
 0x3b3   : > { %3464 = vpow2.f32 %v1123_v25  ;;  %v4329_v29 = vpop.eup %3454  ;;  %v1335_v2 = vpop.permute.xlu1 %1334 }
 0x3b4   : > { %v1125_v13 = vmul.f32 1.442695, %v1094_v9  ;;  %1794 = vrot.lane.b32.xlu0 %v3663_v19, %s3711_s8 }
 0x3b5   : > { %v1339_v17 = vpop.permute.xlu0 %1338 }
 0x3b6   : > { %3466 = vpow2.f32 %v1125_v13  ;;  %3223 = vmatprep.subr.msk.bf16.mxu0 %vm427_vm0, %v1339_v17  ;;  %v1380_v32 = vsel %vm427_vm0, %v1339_v17, 0 }
 0x3b7   : > { %v4333_v40 = vpop.eup %3456  ;;  %3086 = vmatpush3.bf16.xpose.msra.mxu0 %v1380_v32  ;;  %v1630_v23 = vpop.permute.xlu1 %1629 }
 0x3b8   : > { %v4335_v31 = vpop.eup %3458  ;;  %v1163_v11 = vpack.c.bf16 %v4333_v40, %v4327_v15 }
 0x3b9   : > { %v1164_v18 = vpack.c.bf16 %v4329_v29, %v4335_v31  ;;  %v1337_v7 = vpop.permute.xlu0 %1336  ;;  %v4343_v12 = vpop.eup %3460 }
 0x3ba   : > { %3065 = vmatprep.mubr.bf16.mxu0 %v1163_v11  ;;  %3224 = vmatprep.subr.msk.bf16.mxu0 %vm427_vm0, %v1337_v7  ;;  %v1377_v20 = vsel %vm427_vm0, %v1337_v7, 0 }
 0x3bb   : > { %3066 = vmatmul.mubr.bf16.gmra.mxu0 %v1164_v18  ;;  %v1622_v13 = vpop.permute.xlu1 %1621 }
 0x3bd   : > { %v1321_v57 = vpop.permute.xlu0 %1320 }
 0x3bf   : > { %v4345_v3 = vpop.eup %3462  ;;  %3088 = vmatpush3.bf16.xpose.msra.mxu0 %v1377_v20  ;;  %v1618_v32 = vpop.permute.xlu1 %1617 }
 0x3c0   : > { %v1165_v33 = vpack.c.bf16 %v4343_v12, %v4345_v3  ;;  %v4349_v26 = vpop.eup %3464 }
 0x3c1   : > { %v1323_v51 = vpop.permute.xlu0 %1322 }
 0x3c2   : > { %3069 = vmatprep.mubr.bf16.mxu0 %v1165_v33 }
 0x3c3   : > { %v4351_v27 = vpop.eup %3466 }
 0x3c4   : > { %v1166_v30 = vpack.c.bf16 %v4351_v27, %v4349_v26 }
 0x3c5   : > { %v1325_v62 = vpop.permute.xlu0 %1324 }
 0x3c6   : > { %3070 = vmatmul.mubr.bf16.gmra.mxu0 %v1166_v30 }
 0x3c7   : > { %3089 = vmatprep.mubr.msk.bf16.mxu0 %vm427_vm0, %v1321_v57 }
 0x3c9   : > { %v1329_v47 = vpop.permute.xlu0 %1328 }
 0x3cd   : > { %v1333_v45 = vpop.permute.xlu0 %1332 }
 0x3ce   : > { %3090 = vmatmul.mubr.msk.bf16.vlgmr.msra.gmra.mxu0 %vm427_vm0, %v1323_v51 }
 0x3cf   : > { %3093 = vmatprep.mubr.msk.bf16.mxu0 %vm427_vm0, %v1325_v62 }
 0x3d1   : > { %v1632_v21 = vpop.permute.xlu0 %1631 }
 0x3d2   : > { %3105 = vmatprep.subr.bf16.mxu1 %v1632_v21 }
 0x3d3   : > { %3106 = vmatpush3.bf16.msra.mxu1 %v1632_v21  ;;  %v4408_v21 = vld [vmem:[%s3928_s6] ss:$0 sm:$0xff] }
 0x3d4   : > { %3107 = vmatprep.subr.bf16.mxu1 %v1630_v23 }
 0x3d5   : > { %v1628_v25 = vpop.permute.xlu0 %1627 }
 0x3d6   : > { %3094 = vmatmul.mubr.msk.bf16.gmra.mxu0 %vm427_vm0, %v1327_v6 }
 0x3d7   : > { %3097 = vmatprep.mubr.msk.bf16.mxu0 %vm427_vm0, %v1329_v47  ;;  %3108 = vmatpush3.bf16.msra.mxu1 %v1630_v23 }
 0x3d8   : > { %3109 = vmatprep.subr.bf16.mxu1 %v1628_v25 }
 0x3d9   : > { %v1626_v5 = vpop.permute.xlu0 %1625 }
 0x3db   : > { %3110 = vmatpush3.bf16.msra.mxu1 %v1628_v25 }
 0x3dc   : > { %3111 = vmatprep.subr.bf16.mxu1 %v1626_v5 }
 0x3dd   : > { %v1624_v9 = vpop.permute.xlu0 %1623 }
 0x3de   : > { %3098 = vmatmul.mubr.msk.bf16.gmra.mxu0 %vm427_vm0, %v1331_v61 }
 0x3df   : > { %3101 = vmatprep.mubr.msk.bf16.mxu0 %vm427_vm0, %v1333_v45  ;;  %3112 = vmatpush3.bf16.msra.mxu1 %v1626_v5 }
 0x3e0   : > { %3113 = vmatprep.subr.bf16.mxu1 %v1624_v9 }
 0x3e1   : > { %v1620_v17 = vpop.permute.xlu0 %1619 }
 0x3e3   : > { %3114 = vmatpush3.bf16.msra.mxu1 %v1624_v9 }
 0x3e4   : > { %3115 = vmatprep.subr.bf16.mxu1 %v1622_v13 }
 0x3e6   : > { %3102 = vmatmul.mubr.msk.bf16.gmra.mxu0 %vm427_vm0, %v1335_v2 }
 0x3e7   : > { %3116 = vmatpush3.bf16.msra.mxu1 %v1622_v13 }
 0x3e8   : > { %3117 = vmatprep.subr.bf16.mxu1 %v1620_v17 }
 0x3eb   : > { %3118 = vmatpush3.bf16.msra.mxu1 %v1620_v17 }
 0x3ec   : > { %3119 = vmatprep.subr.bf16.mxu1 %v1618_v32 }
 0x3ef   : > { %3120 = vmatpush3.bf16.msra.mxu1 %v1618_v32 }
 0x41e   : > { %v4375_v7 = vpop.permute.xlu0 %1800 }
 0x41f   : > { %3225 = vmatprep.subr.msk.bf16.mxu1 %vm427_vm0, %v4375_v7 }
 0x430   : > { %v4371_v11 = vpop.f32.mrf.mxu0 }
 0x431   : > { %5029 = vst [vmem:[#allocation23_spill] sm:$0xff] %v4371_v11 }
 0x432   : > { %v4373_v18 = vpop.f32.mrf.mxu0 }
 0x433   : > { %5030 = vst [vmem:[#allocation24_spill] sm:$0xff] %v4373_v18 }
 0x434   : > { %v4377_v20 = vpop.f32.mrf.mxu0 }
 0x435   : > { %5031 = vst [vmem:[#allocation25_spill] sm:$0xff] %v4377_v20 }
 0x436   : > { %v4381_v33 = vpop.f32.mrf.mxu0 }
 0x437   : > { %5032 = vst [vmem:[#allocation26_spill] sm:$0xff] %v4381_v33 }
 0x46b   : > { %v4383_v57 = vpop.f32.mrf.mxu0 }
 0x46c   : > { %5033 = vst [vmem:[#allocation27_spill] sm:$0xff] %v4383_v57  ;;  %v4508_v57 = vpop.permute.xlu0 %1798 }
 0x46d   : > { %v4385_v30 = vpop.f32.mrf.mxu0 }
 0x46e   : > { %5034 = vst [vmem:[#allocation28_spill] sm:$0xff] %v4385_v30 }
 0x46f   : > { %v4387_v51 = vpop.f32.mrf.mxu0 }
 0x470   : > { %5035 = vst [vmem:[#allocation29_spill] sm:$0xff] %v4387_v51  ;;  %v3677_v51 = vld [vmem:[%s3789_s26 + $0x38] sm:$0xff]  }
 0x471   : > { %v4389_v62 = vpop.f32.mrf.mxu0 }
 0x472   : > { %5036 = vst [vmem:[#allocation30_spill] sm:$0xff] %v4389_v62 }
 0x47b   : > { %v4391_v6 = vpop.f32.mrf.mxu0 }
 0x47c   : > { %5037 = vst [vmem:[#allocation31_spill] sm:$0xff] %v4391_v6  ;;  %v3668_v6 = vld [vmem:[%s3789_s26] sm:$0xff]  }
 0x47d   : > { %v4393_v47 = vpop.f32.mrf.mxu0 }
 0x47e   : > { %5038 = vst [vmem:[#allocation32_spill] sm:$0xff] %v4393_v47  ;;  %v3672_v47 = vld [vmem:[%s3789_s26 + $0x20] sm:$0xff]  }
 0x47f   : > { %v4395_v61 = vpop.f32.mrf.mxu0 }
 0x480   : > { %5039 = vst [vmem:[#allocation33_spill] sm:$0xff] %v4395_v61 }
 0x481   : > { %v4397_v45 = vpop.f32.mrf.mxu0 }
 0x482   : > { %5040 = vst [vmem:[#allocation34_spill] sm:$0xff] %v4397_v45  ;;  %v3670_v45 = vld [vmem:[%s3789_s26 + $0x10] sm:$0xff]  }
 0x486   : > { %v4399_v2 = vpop.f32.mrf.mxu0 }
 0x487   : > { %5041 = vst [vmem:[#allocation35_spill] sm:$0xff] %v4399_v2  ;;  %v3665_v2 = vld [vmem:[%s3764_s22 + $0x10] sm:$0xff]  }
 0x488   : > { %v4401_v0 = vpop.f32.mrf.mxu0 }
 0x489   : > { %5042 = vst [vmem:[#allocation36_spill] sm:$0xff] %v4401_v0 }
 0x48a   : > { %v4403_v63 = vpop.f32.mrf.mxu0 }
 0x48b   : > { %5043 = vst [vmem:[#allocation37_spill] sm:$0xff] %v4403_v63 }
 0x48c   : > { %v4405_v58 = vpop.f32.mrf.mxu0 }
 0x48d   : > { %5044 = vst [vmem:[#allocation38_spill] sm:$0xff] %v4405_v58 }
 0x48e   : > { %v3091_v19 = vpop.f32.mrf.mxu0 }
 0x48f   : > { %v4411_v23 = vadd.f32 %v4408_v21, %v3091_v19 }
 0x490   : > { %v1434_v25 = vpop.f32.mrf.mxu0 }
 0x491   : > { %v4414_v5 = vadd.f32 %v4408_v21, %v1434_v25  ;;  %1501 = vmax.xlane.f32.xlu1 %v4411_v23 }
 0x492   : > { %v3092_v9 = vpop.f32.mrf.mxu0 }
 0x493   : > { %v4418_v13 = vadd.f32 %v4408_v21, %v3092_v9  ;;  %1497 = vmax.xlane.f32.xlu0 %v4414_v5 }
 0x494   : > { %v1437_v17 = vpop.f32.mrf.mxu0 }
 0x495   : > { %1503 = vmax.xlane.f32.xlu1 %v4418_v13  ;;  %v4423_v39 = vadd.f32 %v4408_v21, %v1437_v17 }
 0x496   : > { %v3095_v32 = vpop.f32.mrf.mxu0 }
 0x497   : > { %v4426_v19 = vadd.f32 %v4408_v21, %v3095_v32 }
 0x498   : > { %v1450_v25 = vpop.f32.mrf.mxu0 }
 0x499   : > { %1499 = vmax.xlane.f32.xlu1 %v4423_v39  ;;  %1509 = vmax.xlane.f32.xlu0 %v4426_v19  ;;  %v4431_v9 = vadd.f32 %v4408_v21, %v1450_v25 }
 0x49a   : > { %v3096_v55 = vpop.f32.mrf.mxu0 }
 0x49b   : > { %v4438_v17 = vadd.f32 %v4408_v21, %v3096_v55 }
 0x49c   : > { %v1453_v34 = vpop.f32.mrf.mxu0 }
 0x49d   : > { %v4434_v4 = vadd.f32 %v4408_v21, %v1453_v34  ;;  %1505 = vmax.xlane.f32.xlu1 %v4431_v9 }
 0x49e   : > { %v3099_v32 = vpop.f32.mrf.mxu0 }
 0x49f   : > { %1507 = vmax.xlane.f32.xlu0 %v4434_v4  ;;  %v4442_v36 = vadd.f32 %v4408_v21, %v3099_v32 }
 0x4a0   : > { %v1466_v25 = vpop.f32.mrf.mxu0 }
 0x4a1   : > { %1511 = vmax.xlane.f32.xlu1 %v4438_v17  ;;  %v4447_v34 = vadd.f32 %v4408_v21, %v1466_v25  ;;  %v3666_v25 = vld [vmem:[%s3764_s22 + $0x18] sm:$0xff]  }
 0x4a2   : > { %v3100_v60 = vpop.f32.mrf.mxu0 }
 0x4a3   : > { %v4451_v55 = vadd.f32 %v4408_v21, %v3100_v60 }
 0x4a4   : > { %v1469_v63 = vpop.f32.mrf.mxu0 }
 0x4a5   : > { %1517 = vmax.xlane.f32.xlu1 %v4442_v36  ;;  %v4455_v32 = vadd.f32 %v4408_v21, %v1469_v63 }
 0x4a6   : > { %v3103_v58 = vpop.f32.mrf.mxu0 }
 0x4a7   : > { %v4463_v60 = vadd.f32 %v4408_v21, %v3103_v58 }
 0x4a8   : > { %v1482_v0 = vpop.f32.mrf.mxu0 }
 0x4a9   : > { %1513 = vmax.xlane.f32.xlu1 %v4447_v34  ;;  %v4467_v63 = vadd.f32 %v4408_v21, %v1482_v0  ;;  %v3667_v0 = vld [vmem:[%s3764_s22 + $0x8] sm:$0xff]  }
 0x4aa   : > { %v3104_v61 = vpop.f32.mrf.mxu0 }
 0x4ac   : > { %v1485_v58 = vpop.f32.mrf.mxu0 }
 0x4ad   : > { %1519 = vmax.xlane.f32.xlu1 %v4451_v55 }
 0x4b1   : > { %1515 = vmax.xlane.f32.xlu1 %v4455_v32 }
 0x4b5   : > { %1790 = vrot.lane.b32.xlu0 %v3665_v2, %s3711_s8  ;;  %v4471_v2 = vadd.f32 %v4408_v21, %v3104_v61  ;;  %v3669_v61 = vld [vmem:[%s3764_s22] sm:$0xff]  }
 0x4c2   : > { %1792 = vrot.lane.b32.xlu1 %v3666_v25, %s3711_s8  ;;  %v4475_v25 = vadd.f32 %v4408_v21, %v1485_v58  ;;  %v3671_v58 = vld [vmem:[%s3789_s26 + $0x8] sm:$0xff]  }
 0x4d4   : > { %1525 = vmax.xlane.f32.xlu0 %v4463_v60 }
 0x4d8   : > { %1521 = vmax.xlane.f32.xlu0 %v4467_v63 }
 0x4dc   : > { %1527 = vmax.xlane.f32.xlu0 %v4471_v2 }
 0x4e6   : > { %1523 = vmax.xlane.f32.xlu1 %v4475_v25 }
 0x4f2   : > { %1788 = vrot.lane.b32.xlu0 %v3667_v0, %s3711_s8  ;;  %v3673_v0 = vld [vmem:[%s3789_s26 + $0x18] sm:$0xff]  }
 0x4f6   : > { %1770 = vrot.lane.b32.xlu0 %v3668_v6, %s3711_s8  ;;  %v3674_v6 = vld [vmem:[%s3789_s26 + $0x30] sm:$0xff]  }
 0x4f7   : > { %1786 = vrot.lane.b32.xlu1 %v3669_v61, %s3711_s8  ;;  %v3675_v61 = vld [vmem:[%s3789_s26 + $0x28] sm:$0xff]  }
 0x4fa   : > { %1774 = vrot.lane.b32.xlu0 %v3670_v45, %s3711_s8  ;;  %v3676_v45 = vld [vmem:[%s3878_s29 + $0x30] sm:$0xff]  }
 0x4fb   : > { %1772 = vrot.lane.b32.xlu1 %v3671_v58, %s3711_s8  ;;  %v3678_v58 = vld [vmem:[%s3878_s29 + $0x20] sm:$0xff]  }
 0x4fe   : > { %1778 = vrot.lane.b32.xlu0 %v3672_v47, %s3711_s8  ;;  %v3679_v47 = vld [vmem:[%s3878_s29 + $0x38] sm:$0xff]  }
 0x4ff   : > { %1776 = vrot.lane.b32.xlu1 %v3673_v0, %s3711_s8  ;;  %v3680_v0 = vld [vmem:[%s3878_s29 + $0x10] sm:$0xff]  }
 0x502   : > { %1782 = vrot.lane.b32.xlu0 %v3674_v6, %s3711_s8  ;;  %v3681_v6 = vld [vmem:[%s3878_s29 + $0x28] sm:$0xff]  }
 0x503   : > { %1780 = vrot.lane.b32.xlu1 %v3675_v61, %s3711_s8  ;;  %v3682_v61 = vld [vmem:[%s3878_s29 + $0x18] sm:$0xff]  }
 0x506   : > { %2079 = vrot.lane.b32.xlu0 %v3676_v45, %s3711_s8  ;;  %v4512_v45 = vpop.permute.xlu1 %1796 }
 0x507   : > { %1784 = vrot.lane.b32.xlu1 %v3677_v51, %s3711_s8  ;;  %v4514_v51 = vpop.permute.xlu0 %1794 }
 0x50a   : > { %2075 = vrot.lane.b32.xlu0 %v3678_v58, %s3711_s8 }
 0x50b   : > { %2081 = vrot.lane.b32.xlu1 %v3679_v47, %s3711_s8 }
 0x50e   : > { %2071 = vrot.lane.b32.xlu0 %v3680_v0, %s3711_s8 }
 0x50f   : > { %2077 = vrot.lane.b32.xlu1 %v3681_v6, %s3711_s8 }
 0x513   : > { %2073 = vrot.lane.b32.xlu1 %v3682_v61, %s3711_s8 }
 0x51a   : > { %v1502_v62 = vpop.xlane.xlu1 %1501 }
 0x51b   : > { %v1531_v0 = vsub.f32 %v4411_v23, %v1502_v62 }
 0x51c   : > { %v1498_v58 = vpop.xlane.xlu0 %1497 }
 0x51d   : > { %v1529_v30 = vsub.f32 %v4414_v5, %v1498_v58  ;;  %v1549_v61 = vmul.f32 1.442695, %v1531_v0 }
 0x51e   : > { %v1504_v47 = vpop.xlane.xlu1 %1503 }
 0x51f   : > { %v1532_v20 = vsub.f32 %v4418_v13, %v1504_v47  ;;  %v1545_v11 = vmul.f32 1.442695, %v1529_v30 }
 0x521   : > { %v1551_v6 = vmul.f32 1.442695, %v1532_v20  ;;  %3468 = vpow2.f32 %v1545_v11 }
 0x522   : > { %v1500_v33 = vpop.xlane.xlu1 %1499  ;;  %v1510_v8 = vpop.xlane.xlu0 %1509 }
 0x523   : > { %v1530_v18 = vsub.f32 %v4423_v39, %v1500_v33  ;;  %3470 = vpow2.f32 %v1551_v6  ;;  %v1535_v37 = vsub.f32 %v4426_v19, %v1510_v8  ;;  %v1848_v6 = vsel %vm427_vm0, %v4375_v7, 0 }
 0x525   : > { %v1547_v41 = vmul.f32 1.442695, %v1530_v18  ;;  %v1557_v20 = vmul.f32 1.442695, %v1535_v37 }
 0x526   : > { %v1506_v53 = vpop.xlane.xlu1 %1505 }
 0x527   : > { %3472 = vpow2.f32 %v1547_v41  ;;  %v1533_v5 = vsub.f32 %v4431_v9, %v1506_v53 }
 0x528   : > { %3474 = vpow2.f32 %v1549_v61  ;;  %v1508_v13 = vpop.xlane.xlu0 %1507 }
 0x529   : > { %v1553_v58 = vmul.f32 1.442695, %v1533_v5  ;;  %v1534_v30 = vsub.f32 %v4434_v4, %v1508_v13 }
 0x52a   : > { %v1512_v62 = vpop.xlane.xlu1 %1511 }
 0x52b   : > { %v1555_v23 = vmul.f32 1.442695, %v1534_v30  ;;  %v1536_v39 = vsub.f32 %v4438_v17, %v1512_v62  ;;  %3476 = vpow2.f32 %v1553_v58 }
 0x52d   : > { %3478 = vpow2.f32 %v1555_v23  ;;  %v1559_v11 = vmul.f32 1.442695, %v1536_v39  ;;  %v1845_v39 = vsel %vm427_vm0, %v4508_v57, 0 }
 0x52e   : > { %3480 = vpow2.f32 %v1557_v20  ;;  %v1518_v18 = vpop.xlane.xlu1 %1517  ;;  %v4524_v8 = vpop.eup %3468 }
 0x52f   : > { %3482 = vpow2.f32 %v1559_v11  ;;  %v1539_v0 = vsub.f32 %v4442_v36, %v1518_v18 }
 0x530   : > { %v4526_v53 = vpop.eup %3470 }
 0x531   : > { %v1565_v7 = vmul.f32 1.442695, %v1539_v0 }
 0x532   : > { %v1514_v41 = vpop.xlane.xlu1 %1513 }
 0x533   : > { %v1537_v37 = vsub.f32 %v4447_v34, %v1514_v41 }
 0x534   : > { %v4528_v33 = vpop.eup %3472 }
 0x535   : > { %v4530_v19 = vpop.eup %3474  ;;  %v1609_v4 = vpack.c.bf16 %v4528_v33, %v4524_v8  ;;  %v1561_v5 = vmul.f32 1.442695, %v1537_v37 }
 0x536   : > { %v1520_v9 = vpop.xlane.xlu1 %1519  ;;  %v1610_v17 = vpack.c.bf16 %v4526_v53, %v4530_v19 }
 0x537   : > { %v1540_v47 = vsub.f32 %v4451_v55, %v1520_v9  ;;  %3121 = vmatprep.mubr.bf16.mxu1 %v1609_v4  ;;  %3484 = vpow2.f32 %v1561_v5 }
 0x538   : > { %3122 = vmatmul.mubr.bf16.vlgmr.msra.gmra.mxu1 %v1610_v17  ;;  %v4541_v61 = vpop.eup %3476 }
 0x539   : > { %3138 = vmatpush3.bf16.xpose.msra.mxu1 %v1848_v6  ;;  %v1567_v13 = vmul.f32 1.442695, %v1540_v47  ;;  %v1791_v47 = vpop.permute.xlu0 %1790 }
 0x53a   : > { %v4543_v34 = vpop.eup %3478  ;;  %3226 = vmatprep.subr.msk.bf16.mxu1 %vm427_vm0, %v4508_v57  ;;  %v1516_v58 = vpop.xlane.xlu1 %1515  ;;  %v1833_v6 = vsel %vm427_vm0, %v1791_v47, 0 }
 0x53b   : > { %v4547_v30 = vpop.eup %3480  ;;  %v1538_v55 = vsub.f32 %v4455_v32, %v1516_v58  ;;  %v1611_v36 = vpack.c.bf16 %v4543_v34, %v4541_v61  ;;  %3486 = vpow2.f32 %v1567_v13  ;;  %v1842_v32 = vsel %vm427_vm0, %v4512_v45, 0 }
 0x53c   : > { %v4552_v20 = vpop.eup %3482 }
 0x53d   : > { %v1563_v62 = vmul.f32 1.442695, %v1538_v55  ;;  %3125 = vmatprep.mubr.bf16.mxu1 %v1611_v36  ;;  %v1612_v23 = vpack.c.bf16 %v4552_v20, %v4547_v30 }
 0x53e   : > { %v1793_v9 = vpop.permute.xlu1 %1792 }
 0x53f   : > { %3488 = vpow2.f32 %v1563_v62  ;;  %v1836_v17 = vsel %vm427_vm0, %v1793_v9, 0 }
 0x540   : > { %3490 = vpow2.f32 %v1565_v7  ;;  %3126 = vmatmul.mubr.bf16.gmra.mxu1 %v1612_v23 }
 0x541   : > { %3140 = vmatpush3.bf16.xpose.msra.mxu1 %v1845_v39 }
 0x542   : > { %3227 = vmatprep.subr.msk.bf16.mxu1 %vm427_vm0, %v4512_v45  ;;  %v1839_v45 = vsel %vm427_vm0, %v4514_v51, 0 }
 0x544   : > { %v4562_v11 = vpop.eup %3484 }
 0x548   : > { %v4566_v18 = vpop.eup %3486 }
 0x549   : > { %3142 = vmatpush3.bf16.xpose.msra.mxu1 %v1842_v32 }
 0x54a   : > { %3228 = vmatprep.subr.msk.bf16.mxu1 %vm427_vm0, %v4514_v51 }
 0x54c   : > { %v4568_v41 = vpop.eup %3488 }
 0x54d   : > { %v4570_v37 = vpop.eup %3490  ;;  %v1613_v57 = vpack.c.bf16 %v4568_v41, %v4562_v11 }
 0x54e   : > { %v1614_v4 = vpack.c.bf16 %v4566_v18, %v4570_v37 }
 0x54f   : > { %3129 = vmatprep.mubr.bf16.mxu1 %v1613_v57 }
 0x550   : > { %3130 = vmatmul.mubr.bf16.gmra.mxu1 %v1614_v4 }
 0x551   : > { %3144 = vmatpush3.bf16.xpose.msra.mxu1 %v1839_v45 }
 0x552   : > { %3229 = vmatprep.subr.msk.bf16.mxu1 %vm427_vm0, %v1793_v9 }
 0x559   : > { %3146 = vmatpush3.bf16.xpose.msra.mxu1 %v1836_v17 }
 0x55a   : > { %3230 = vmatprep.subr.msk.bf16.mxu1 %vm427_vm0, %v1791_v47 }
 0x55d   : > { %v1526_v0 = vpop.xlane.xlu0 %1525 }
 0x55e   : > { %v1543_v7 = vsub.f32 %v4463_v60, %v1526_v0 }
 0x560   : > { %v1573_v57 = vmul.f32 1.442695, %v1543_v7 }
 0x561   : > { %3148 = vmatpush3.bf16.xpose.msra.mxu1 %v1833_v6  ;;  %v1522_v5 = vpop.xlane.xlu0 %1521 }
 0x562   : > { %v1541_v55 = vsub.f32 %v4467_v63, %v1522_v5 }
 0x564   : > { %v1569_v62 = vmul.f32 1.442695, %v1541_v55 }
 0x565   : > { %v1528_v13 = vpop.xlane.xlu0 %1527 }
 0x566   : > { %v1544_v36 = vsub.f32 %v4471_v2, %v1528_v13  ;;  %3492 = vpow2.f32 %v1569_v62 }
 0x568   : > { %v1575_v23 = vmul.f32 1.442695, %v1544_v36 }
 0x569   : > { %v1789_v58 = vpop.permute.xlu0 %1788 }
 0x56a   : > { %3231 = vmatprep.subr.msk.bf16.mxu1 %vm427_vm0, %v1789_v58  ;;  %v1830_v51 = vsel %vm427_vm0, %v1789_v58, 0  ;;  %3494 = vpow2.f32 %v1575_v23 }
 0x56b   : > { %3150 = vmatpush3.bf16.xpose.msra.mxu1 %v1830_v51 }
 0x56d   : > { %v1771_v0 = vpop.permute.xlu0 %1770 }
 0x56f   : > { %v1524_v39 = vpop.xlane.xlu1 %1523 }
 0x570   : > { %v1542_v32 = vsub.f32 %v4475_v25, %v1524_v39 }
 0x571   : > { %v1775_v5 = vpop.permute.xlu0 %1774 }
 0x572   : > { %v1571_v4 = vmul.f32 1.442695, %v1542_v32 }
 0x573   : > { %v1787_v45 = vpop.permute.xlu1 %1786  ;;  %v4590_v2 = vpop.eup %3492 }
 0x574   : > { %3496 = vpow2.f32 %v1571_v4  ;;  %3232 = vmatprep.subr.msk.bf16.mxu1 %vm427_vm0, %v1787_v45  ;;  %v1827_v63 = vsel %vm427_vm0, %v1787_v45, 0 }
 0x575   : > { %3498 = vpow2.f32 %v1573_v57  ;;  %3152 = vmatpush3.bf16.xpose.msra.mxu1 %v1827_v63  ;;  %v1779_v58 = vpop.permute.xlu0 %1778 }
 0x577   : > { %v4592_v60 = vpop.eup %3494  ;;  %v1773_v6 = vpop.permute.xlu1 %1772 }
 0x579   : > { %v1783_v51 = vpop.permute.xlu0 %1782 }
 0x57b   : > { %v1777_v13 = vpop.permute.xlu1 %1776 }
 0x57d   : > { %v2080_v62 = vpop.permute.xlu0 %2079 }
 0x57f   : > { %v1781_v55 = vpop.permute.xlu1 %1780 }
 0x581   : > { %v4594_v9 = vpop.eup %3496  ;;  %v2076_v39 = vpop.permute.xlu0 %2075 }
 0x582   : > { %v4596_v17 = vpop.eup %3498  ;;  %v1615_v25 = vpack.c.bf16 %v4594_v9, %v4590_v2 }
 0x583   : > { %v1616_v47 = vpack.c.bf16 %v4592_v60, %v4596_v17  ;;  %v1785_v36 = vpop.permute.xlu1 %1784 }
 0x584   : > { %3133 = vmatprep.mubr.bf16.mxu1 %v1615_v25 }
 0x585   : > { %3134 = vmatmul.mubr.bf16.gmra.mxu1 %v1616_v47  ;;  %v2072_v63 = vpop.permute.xlu0 %2071 }
 0x586   : > { %3153 = vmatprep.mubr.msk.bf16.mxu1 %vm427_vm0, %v1771_v0 }
 0x587   : > { %v2082_v7 = vpop.permute.xlu1 %2081 }
 0x588   : > { %3169 = vmatprep.subr.bf16.mxu0 %v2082_v7 }
 0x589   : > { %3170 = vmatpush3.bf16.msra.mxu0 %v2082_v7 }
 0x58a   : > { %3171 = vmatprep.subr.bf16.mxu0 %v2080_v62 }
 0x58b   : > { %v2078_v23 = vpop.permute.xlu1 %2077 }
 0x58d   : > { %3154 = vmatmul.mubr.msk.bf16.vlgmr.msra.gmra.mxu1 %vm427_vm0, %v1773_v6  ;;  %3172 = vmatpush3.bf16.msra.mxu0 %v2080_v62 }
 0x58e   : > { %3157 = vmatprep.mubr.msk.bf16.mxu1 %vm427_vm0, %v1775_v5  ;;  %3173 = vmatprep.subr.bf16.mxu0 %v2078_v23 }
 0x58f   : > { %v2074_v32 = vpop.permute.xlu1 %2073 }
 0x591   : > { %3174 = vmatpush3.bf16.msra.mxu0 %v2078_v23 }
 0x592   : > { %3175 = vmatprep.subr.bf16.mxu0 %v2076_v39 }
 0x595   : > { %3158 = vmatmul.mubr.msk.bf16.gmra.mxu1 %vm427_vm0, %v1777_v13  ;;  %3176 = vmatpush3.bf16.msra.mxu0 %v2076_v39 }
 0x596   : > { %3161 = vmatprep.mubr.msk.bf16.mxu1 %vm427_vm0, %v1779_v58  ;;  %3177 = vmatprep.subr.bf16.mxu0 %v2074_v32 }
 0x599   : > { %3178 = vmatpush3.bf16.msra.mxu0 %v2074_v32 }
 0x59a   : > { %3179 = vmatprep.subr.bf16.mxu0 %v2072_v63 }
 0x59d   : > { %3162 = vmatmul.mubr.msk.bf16.gmra.mxu1 %vm427_vm0, %v1781_v55  ;;  %3180 = vmatpush3.bf16.msra.mxu0 %v2072_v63 }
 0x59e   : > { %3165 = vmatprep.mubr.msk.bf16.mxu1 %vm427_vm0, %v1783_v51 }
 0x5a5   : > { %3166 = vmatmul.mubr.msk.bf16.gmra.mxu1 %vm427_vm0, %v1785_v36 }
 0x5f8   : > { %v4610_v57 = vpop.f32.mrf.mxu1 }
 0x5f9   : > { %5045 = vst [vmem:[#allocation39_spill] sm:$0xff] %v4610_v57 }
 0x5fa   : > { %v4612_v4 = vpop.f32.mrf.mxu1 }
 0x5fb   : > { %5046 = vst [vmem:[#allocation40_spill] sm:$0xff] %v4612_v4 }
 0x5fc   : > { %v4614_v45 = vpop.f32.mrf.mxu1 }
 0x5fd   : > { %5047 = vst [vmem:[#allocation41_spill] sm:$0xff] %v4614_v45 }
 0x5fe   : > { %v4616_v25 = vpop.f32.mrf.mxu1 }
 0x5ff   : > { %5048 = vst [vmem:[#allocation42_spill] sm:$0xff] %v4616_v25 }
 0x600   : > { %v4618_v47 = vpop.f32.mrf.mxu1 }
 0x601   : > { %5049 = vst [vmem:[#allocation43_spill] sm:$0xff] %v4618_v47 }
 0x602   : > { %v4620_v0 = vpop.f32.mrf.mxu1 }
 0x603   : > { %5050 = vst [vmem:[#allocation44_spill] sm:$0xff] %v4620_v0 }
 0x604   : > { %v4622_v6 = vpop.f32.mrf.mxu1 }
 0x605   : > { %5051 = vst [vmem:[#allocation45_spill] sm:$0xff] %v4622_v6 }
 0x606   : > { %v4624_v5 = vpop.f32.mrf.mxu1 }
 0x607   : > { %5052 = vst [vmem:[#allocation46_spill] sm:$0xff] %v4624_v5 }
 0x610   : > { %v4626_v13 = vpop.f32.mrf.mxu1 }
 0x611   : > { %5053 = vst [vmem:[#allocation47_spill] sm:$0xff] %v4626_v13 }
 0x612   : > { %v4628_v58 = vpop.f32.mrf.mxu1 }
 0x613   : > { %5054 = vst [vmem:[#allocation48_spill] sm:$0xff] %v4628_v58 }
 0x614   : > { %v4630_v55 = vpop.f32.mrf.mxu1 }
 0x615   : > { %5055 = vst [vmem:[#allocation49_spill] sm:$0xff] %v4630_v55 }
 0x616   : > { %v4632_v51 = vpop.f32.mrf.mxu1 }
 0x617   : > { %5056 = vst [vmem:[#allocation50_spill] sm:$0xff] %v4632_v51 }
 0x645   : > { %v4634_v36 = vpop.f32.mrf.mxu1 }
 0x646   : > { %5057 = vst [vmem:[#allocation51_spill] sm:$0xff] %v4634_v36 }
 0x647   : > { %v4636_v7 = vpop.f32.mrf.mxu1 }
 0x648   : > { %5058 = vst [vmem:[#allocation52_spill] sm:$0xff] %v4636_v7 }
 0x649   : > { %v4638_v62 = vpop.f32.mrf.mxu1 }
 0x64a   : > { %5059 = vst [vmem:[#allocation53_spill] sm:$0xff] %v4638_v62 }
 0x64b   : > { %v4640_v23 = vpop.f32.mrf.mxu1 }
 0x64c   : > { %5060 = vst [vmem:[#allocation54_spill] sm:$0xff] %v4640_v23 }
 0x64d   : > { %v3155_v39 = vpop.f32.mrf.mxu1 }
 0x64e   : > { %v4643_v32 = vadd.f32 %v4408_v21, %v3155_v39 }
 0x64f   : > { %v1884_v63 = vpop.f32.mrf.mxu1 }
 0x650   : > { %1951 = vmax.xlane.f32.xlu0 %v4643_v32  ;;  %v4647_v55 = vadd.f32 %v4408_v21, %v1884_v63 }
 0x651   : > { %v3156_v13 = vpop.f32.mrf.mxu1 }
 0x652   : > { %v4654_v23 = vadd.f32 %v4408_v21, %v3156_v13 }
 0x653   : > { %v1887_v51 = vpop.f32.mrf.mxu1 }
 0x654   : > { %v4650_v36 = vadd.f32 %v4408_v21, %v1887_v51  ;;  %1947 = vmax.xlane.f32.xlu0 %v4647_v55 }
 0x655   : > { %v3159_v62 = vpop.f32.mrf.mxu1 }
 0x656   : > { %v4657_v39 = vadd.f32 %v4408_v21, %v3159_v62  ;;  %1949 = vmax.xlane.f32.xlu1 %v4650_v36 }
 0x657   : > { %v1900_v7 = vpop.f32.mrf.mxu1 }
 0x658   : > { %1953 = vmax.xlane.f32.xlu0 %v4654_v23  ;;  %v4666_v6 = vadd.f32 %v4408_v21, %v1900_v7 }
 0x659   : > { %v3160_v63 = vpop.f32.mrf.mxu1 }
 0x65a   : > { %v4662_v58 = vadd.f32 %v4408_v21, %v3160_v63  ;;  %1959 = vmax.xlane.f32.xlu1 %v4657_v39 }
 0x65b   : > { %v1903_v51 = vpop.f32.mrf.mxu1 }
 0x65c   : > { %1961 = vmax.xlane.f32.xlu0 %v4662_v58  ;;  %v4670_v62 = vadd.f32 %v4408_v21, %v1903_v51 }
 0x65d   : > { %v3163_v13 = vpop.f32.mrf.mxu1 }
 0x65e   : > { %v4673_v47 = vadd.f32 %v4408_v21, %v3163_v13  ;;  %1955 = vmax.xlane.f32.xlu1 %v4666_v6 }
 0x65f   : > { %v1916_v5 = vpop.f32.mrf.mxu1 }
 0x660   : > { %1957 = vmax.xlane.f32.xlu0 %v4670_v62  ;;  %v4682_v45 = vadd.f32 %v4408_v21, %v1916_v5 }
 0x661   : > { %v3164_v63 = vpop.f32.mrf.mxu1 }
 0x662   : > { %v4678_v0 = vadd.f32 %v4408_v21, %v3164_v63  ;;  %1967 = vmax.xlane.f32.xlu1 %v4673_v47 }
 0x663   : > { %v1919_v7 = vpop.f32.mrf.mxu1 }
 0x664   : > { %1969 = vmax.xlane.f32.xlu0 %v4678_v0  ;;  %v4686_v13 = vadd.f32 %v4408_v21, %v1919_v7 }
 0x665   : > { %v3167_v51 = vpop.f32.mrf.mxu1 }
 0x666   : > { %v4689_v57 = vadd.f32 %v4408_v21, %v3167_v51  ;;  %1963 = vmax.xlane.f32.xlu1 %v4682_v45  ;;  %v3683_v51 = vld [vmem:[%s3878_s29 + $0x8] sm:$0xff]  }
 0x667   : > { %v1932_v63 = vpop.f32.mrf.mxu1 }
 0x668   : > { %1965 = vmax.xlane.f32.xlu0 %v4686_v13  ;;  %v4698_v35 = vadd.f32 %v4408_v21, %v1932_v63 }
 0x669   : > { %v3168_v25 = vpop.f32.mrf.mxu1 }
 0x66a   : > { %v4694_v5 = vadd.f32 %v4408_v21, %v3168_v25  ;;  %1975 = vmax.xlane.f32.xlu1 %v4689_v57  ;;  %v3684_v25 = vld [vmem:[%s3878_s29] sm:$0xff]  }
 0x66b   : > { %v1935_v4 = vpop.f32.mrf.mxu1 }
 0x66c   : > { %1977 = vmax.xlane.f32.xlu0 %v4694_v5  ;;  %v4702_v7 = vadd.f32 %v4408_v21, %v1935_v4 }
 0x66e   : > { %1971 = vmax.xlane.f32.xlu1 %v4698_v35 }
 0x670   : > { %1973 = vmax.xlane.f32.xlu0 %v4702_v7 }
 0x67f   : > { %2069 = vrot.lane.b32.xlu1 %v3683_v51, %s3711_s8 }
 0x686   : > { %2067 = vrot.lane.b32.xlu0 %v3684_v25, %s3711_s8 }
 0x6a3   : > { %1127 = vadd.xlane.f32.xlu1 %v4277_v22 }
 0x6a5   : > { %1129 = vadd.xlane.f32.xlu0 %v4283_v43 }
 0x6a7   : > { %1131 = vadd.xlane.f32.xlu1 %v4285_v48 }
 0x6a9   : > { %1133 = vadd.xlane.f32.xlu0 %v4281_v24 }
 0x6ab   : > { %1135 = vadd.xlane.f32.xlu1 %v4310_v28 }
 0x6ad   : > { %1137 = vadd.xlane.f32.xlu0 %v4315_v1 }
 0x6af   : > { %1139 = vadd.xlane.f32.xlu1 %v4317_v50 }
 0x6b1   : > { %1141 = vadd.xlane.f32.xlu0 %v4312_v54 }
 0x6b3   : > { %1143 = vadd.xlane.f32.xlu1 %v4327_v15 }
 0x6b5   : > { %1145 = vadd.xlane.f32.xlu0 %v4333_v40 }
 0x6b7   : > { %1147 = vadd.xlane.f32.xlu1 %v4335_v31 }
 0x6b9   : > { %1149 = vadd.xlane.f32.xlu0 %v4329_v29 }
 0x6bb   : > { %1151 = vadd.xlane.f32.xlu1 %v4345_v3 }
 0x6bd   : > { %1153 = vadd.xlane.f32.xlu0 %v4343_v12 }
 0x6bf   : > { %1155 = vadd.xlane.f32.xlu1 %v4349_v26 }
 0x6c1   : > { %1157 = vadd.xlane.f32.xlu0 %v4351_v27 }
 0x6c3   : > { %1577 = vadd.xlane.f32.xlu1 %v4524_v8 }
 0x6c5   : > { %1579 = vadd.xlane.f32.xlu0 %v4528_v33 }
 0x6c7   : > { %1581 = vadd.xlane.f32.xlu1 %v4530_v19 }
 0x6c9   : > { %1583 = vadd.xlane.f32.xlu0 %v4526_v53 }
 0x6cb   : > { %1585 = vadd.xlane.f32.xlu1 %v4541_v61 }
 0x6cd   : > { %1587 = vadd.xlane.f32.xlu0 %v4543_v34 }
 0x6cf   : > { %1589 = vadd.xlane.f32.xlu1 %v4547_v30 }
 0x6d1   : > { %1591 = vadd.xlane.f32.xlu0 %v4552_v20 }
 0x6d3   : > { %1593 = vadd.xlane.f32.xlu1 %v4562_v11 }
 0x6d5   : > { %1595 = vadd.xlane.f32.xlu0 %v4568_v41 }
 0x6d7   : > { %1597 = vadd.xlane.f32.xlu1 %v4570_v37 }
 0x6d9   : > { %1599 = vadd.xlane.f32.xlu0 %v4566_v18  ;;  %v1952_v22 = vpop.xlane.xlu0 %1951 }
 0x6da   : > { %v1981_v1 = vsub.f32 %v4643_v32, %v1952_v22 }
 0x6db   : > { %1601 = vadd.xlane.f32.xlu1 %v4590_v2 }
 0x6dc   : > { %v1999_v12 = vmul.f32 1.442695, %v1981_v1 }
 0x6dd   : > { %1603 = vadd.xlane.f32.xlu0 %v4594_v9  ;;  %v1948_v24 = vpop.xlane.xlu0 %1947 }
 0x6de   : > { %v1979_v43 = vsub.f32 %v4647_v55, %v1948_v24 }
 0x6df   : > { %v1950_v48 = vpop.xlane.xlu1 %1949  ;;  %1605 = vadd.xlane.f32.xlu1 %v4596_v17 }
 0x6e0   : > { %v1995_v28 = vmul.f32 1.442695, %v1979_v43  ;;  %v1980_v54 = vsub.f32 %v4650_v36, %v1950_v48 }
 0x6e1   : > { %1607 = vadd.xlane.f32.xlu0 %v4592_v60  ;;  %v1954_v50 = vpop.xlane.xlu0 %1953 }
 0x6e2   : > { %v1997_v15 = vmul.f32 1.442695, %v1980_v54  ;;  %v1982_v29 = vsub.f32 %v4654_v23, %v1954_v50  ;;  %3500 = vpow2.f32 %v1995_v28 }
 0x6e3   : > { %v1960_v40 = vpop.xlane.xlu1 %1959  ;;  %653 = vadd.xlane.f32.xlu1 %v4047_v59 }
 0x6e4   : > { %3502 = vpow2.f32 %v1997_v15  ;;  %v2001_v31 = vmul.f32 1.442695, %v1982_v29  ;;  %v1985_v21 = vsub.f32 %v4657_v39, %v1960_v40 }
 0x6e5   : > { %655 = vadd.xlane.f32.xlu0 %v4051_v14  ;;  %v1962_v3 = vpop.xlane.xlu0 %1961 }
 0x6e6   : > { %3504 = vpow2.f32 %v2001_v31  ;;  %v1986_v26 = vsub.f32 %v4662_v58, %v1962_v3  ;;  %v2007_v14 = vmul.f32 1.442695, %v1985_v21  ;;  %v5061_v31 = vld [vmem:[#allocation3_spill] sm:$0xff]  ;;  %v5062_v3 = vld [vmem:[#allocation4_spill] sm:$0xff]  ;;  %v5065_v21 = vld [vmem:[#allocation5_spill] sm:$0xff] }
 0x6e7   : > { %v1956_v27 = vpop.xlane.xlu1 %1955  ;;  %657 = vadd.xlane.f32.xlu1 %v4053_v16  ;;  %3506 = vpow2.f32 %v1999_v12 }
 0x6e8   : > { %v2009_v53 = vmul.f32 1.442695, %v1986_v26  ;;  %v1983_v19 = vsub.f32 %v4666_v6, %v1956_v27  ;;  %v5063_v26 = vld [vmem:[#allocation2_spill] sm:$0xff] }
 0x6e9   : > { %659 = vadd.xlane.f32.xlu0 %v4049_v10  ;;  %v1958_v8 = vpop.xlane.xlu0 %1957  ;;  %v5064_v27 = vld [vmem:[#allocation6_spill] sm:$0xff] }
 0x6ea   : > { %v1984_v59 = vsub.f32 %v4670_v62, %v1958_v8  ;;  %3508 = vpow2.f32 %v2009_v53  ;;  %v2003_v11 = vmul.f32 1.442695, %v1983_v19 }
 0x6eb   : > { %v1968_v33 = vpop.xlane.xlu1 %1967  ;;  %661 = vadd.xlane.f32.xlu1 %v4062_v38  ;;  %3510 = vpow2.f32 %v2007_v14 }
 0x6ec   : > { %v2005_v16 = vmul.f32 1.442695, %v1984_v59  ;;  %v1989_v18 = vsub.f32 %v4673_v47, %v1968_v33 }
 0x6ed   : > { %663 = vadd.xlane.f32.xlu0 %v4067_v44  ;;  %v1970_v61 = vpop.xlane.xlu0 %1969 }
 0x6ee   : > { %v1990_v34 = vsub.f32 %v4678_v0, %v1970_v61  ;;  %3512 = vpow2.f32 %v2005_v16 }
 0x6ef   : > { %v1964_v30 = vpop.xlane.xlu1 %1963  ;;  %665 = vadd.xlane.f32.xlu1 %v4070_v46  ;;  %v3501_v10 = vpop.eup %3500  ;;  %3514 = vpow2.f32 %v2003_v11  ;;  %v2015_v46 = vmul.f32 1.442695, %v1989_v18 }
 0x6f0   : > { %v2017_v44 = vmul.f32 1.442695, %v1990_v34  ;;  %v1987_v9 = vsub.f32 %v4682_v45, %v1964_v30  ;;  %v5066_v30 = vld [vmem:[#allocation24_spill] sm:$0xff] }
 0x6f1   : > { %v3503_v20 = vpop.eup %3502  ;;  %667 = vadd.xlane.f32.xlu0 %v4065_v42  ;;  %v1966_v38 = vpop.xlane.xlu0 %1965 }
 0x6f2   : > { %v2059_v41 = vpack.c.bf16 %v3503_v20, %v3501_v10  ;;  %v1988_v2 = vsub.f32 %v4686_v13, %v1966_v38  ;;  %3516 = vpow2.f32 %v2017_v44  ;;  %v2011_v6 = vmul.f32 1.442695, %v1987_v9 }
 0x6f3   : > { %v3505_v37 = vpop.eup %3504  ;;  %v1976_v60 = vpop.xlane.xlu1 %1975  ;;  %669 = vadd.xlane.f32.xlu1 %v4095_v56  ;;  %3518 = vpow2.f32 %v2015_v46  ;;  %v5069_v46 = vld [vmem:[#allocation25_spill] sm:$0xff] }
 0x6f4   : > { %3185 = vmatprep.mubr.bf16.mxu0 %v2059_v41  ;;  %v3507_v4 = vpop.eup %3506  ;;  %v2013_v42 = vmul.f32 1.442695, %v1988_v2  ;;  %v1993_v58 = vsub.f32 %v4689_v57, %v1976_v60  ;;  %v5068_v2 = vld [vmem:[#allocation23_spill] sm:$0xff] }
 0x6f5   : > { %2033 = vadd.xlane.f32.xlu0 %v3505_v37  ;;  %v1978_v17 = vpop.xlane.xlu0 %1977  ;;  %v2060_v51 = vpack.c.bf16 %v3505_v37, %v3507_v4 }
 0x6f6   : > { %v1994_v47 = vsub.f32 %v4694_v5, %v1978_v17  ;;  %3520 = vpow2.f32 %v2013_v42  ;;  %v2023_v32 = vmul.f32 1.442695, %v1993_v58 }
 0x6f7   : > { %v1972_v0 = vpop.xlane.xlu1 %1971  ;;  %2031 = vadd.xlane.f32.xlu1 %v3507_v4  ;;  %v3509_v23 = vpop.eup %3508  ;;  %3522 = vpow2.f32 %v2011_v6  ;;  %v5070_v6 = vld [vmem:[#allocation28_spill] sm:$0xff] }
 0x6f8   : > { %v2025_v55 = vmul.f32 1.442695, %v1994_v47  ;;  %v1991_v39 = vsub.f32 %v4698_v35, %v1972_v0  ;;  %v3511_v13 = vpop.eup %3510 }
 0x6f9   : > { %2029 = vadd.xlane.f32.xlu0 %v3503_v20  ;;  %v1974_v56 = vpop.xlane.xlu0 %1973  ;;  %v2062_v48 = vpack.c.bf16 %v3509_v23, %v3511_v13  ;;  %v5067_v20 = vld [vmem:[#allocation26_spill] sm:$0xff] }
 0x6fa   : > { %v1992_v36 = vsub.f32 %v4702_v7, %v1974_v56  ;;  %3524 = vpow2.f32 %v2025_v55  ;;  %v2019_v5 = vmul.f32 1.442695, %v1991_v39  ;;  %v5071_v56 = vld [vmem:[#allocation30_spill] sm:$0xff] }
 0x6fb   : > { %v2070_v45 = vpop.permute.xlu1 %2069  ;;  %2027 = vadd.xlane.f32.xlu1 %v3501_v10  ;;  %v3513_v63 = vpop.eup %3512  ;;  %3526 = vpow2.f32 %v2023_v32 }
 0x6fc   : > { %3181 = vmatprep.subr.bf16.mxu0 %v2070_v45  ;;  %v2021_v57 = vmul.f32 1.442695, %v1992_v36  ;;  %v3515_v7 = vpop.eup %3514 }
 0x6fd   : > { %3182 = vmatpush3.bf16.msra.mxu0 %v2070_v45  ;;  %2041 = vadd.xlane.f32.xlu0 %v3509_v23  ;;  %v2068_v62 = vpop.permute.xlu0 %2067  ;;  %v2061_v25 = vpack.c.bf16 %v3513_v63, %v3515_v7 }
 0x6fe   : > { %3183 = vmatprep.subr.bf16.mxu0 %v2068_v62  ;;  %3528 = vpow2.f32 %v2021_v57  ;;  %v5073_v57 = vld [vmem:[#allocation29_spill] sm:$0xff] }
 0x6ff   : > { %2039 = vadd.xlane.f32.xlu1 %v3511_v13  ;;  %v3517_v22 = vpop.eup %3516  ;;  %3530 = vpow2.f32 %v2019_v5 }
 0x700   : > { %v3519_v35 = vpop.eup %3518 }
 0x701   : > { %2037 = vadd.xlane.f32.xlu0 %v3513_v63  ;;  %3184 = vmatpush3.bf16.msra.mxu0 %v2068_v62  ;;  %v2064_v29 = vpack.c.bf16 %v3517_v22, %v3519_v35  ;;  %v5072_v62 = vld [vmem:[#allocation27_spill] sm:$0xff] }
 0x703   : > { %2035 = vadd.xlane.f32.xlu1 %v3515_v7  ;;  %v3521_v24 = vpop.eup %3520 }
 0x704   : > { %3186 = vmatmul.mubr.bf16.vlgmr.msra.gmra.mxu0 %v2060_v51  ;;  %v3523_v43 = vpop.eup %3522 }
 0x705   : > { %2049 = vadd.xlane.f32.xlu0 %v3517_v22  ;;  %3189 = vmatprep.mubr.bf16.mxu0 %v2061_v25  ;;  %v2063_v28 = vpack.c.bf16 %v3521_v24, %v3523_v43 }
 0x707   : > { %2047 = vadd.xlane.f32.xlu1 %v3519_v35  ;;  %v3525_v54 = vpop.eup %3524  ;;  %v5074_v35 = vld [vmem:[#allocation32_spill] sm:$0xff] }
 0x708   : > { %v3527_v1 = vpop.eup %3526 }
 0x709   : > { %2045 = vadd.xlane.f32.xlu0 %v3521_v24  ;;  %v2066_v12 = vpack.c.bf16 %v3525_v54, %v3527_v1 }
 0x70b   : > { %2043 = vadd.xlane.f32.xlu1 %v3523_v43  ;;  %v3529_v50 = vpop.eup %3528  ;;  %v5075_v43 = vld [vmem:[#allocation34_spill] sm:$0xff] }
 0x70c   : > { %3190 = vmatmul.mubr.bf16.gmra.mxu0 %v2062_v48  ;;  %v3531_v15 = vpop.eup %3530 }
 0x70d   : > { %2057 = vadd.xlane.f32.xlu0 %v3525_v54  ;;  %3193 = vmatprep.mubr.bf16.mxu0 %v2063_v28  ;;  %v2065_v40 = vpack.c.bf16 %v3529_v50, %v3531_v15 }
 0x70f   : > { %2055 = vadd.xlane.f32.xlu1 %v3527_v1 }
 0x711   : > { %2053 = vadd.xlane.f32.xlu0 %v3529_v50 }
 0x713   : > { %2051 = vadd.xlane.f32.xlu1 %v3531_v15 }
 0x714   : > { %3194 = vmatmul.mubr.bf16.gmra.mxu0 %v2064_v29  ;;  %v5076_v29 = vld [vmem:[#allocation31_spill] sm:$0xff] }
 0x715   : > { %671 = vadd.xlane.f32.xlu0 %v4093_v49  ;;  %3197 = vmatprep.mubr.bf16.mxu0 %v2065_v40 }
 0x717   : > { %673 = vadd.xlane.f32.xlu1 %v4102_v52 }
 0x719   : > { %675 = vadd.xlane.f32.xlu0 %v5061_v31  ;;  %v5077_v31 = vld [vmem:[#allocation33_spill] sm:$0xff] }
 0x71b   : > { %677 = vadd.xlane.f32.xlu1 %v5062_v3 }
 0x71c   : > { %3198 = vmatmul.mubr.bf16.gmra.mxu0 %v2066_v12 }
 0x71d   : > { %679 = vadd.xlane.f32.xlu0 %v5063_v26 }
 0x71f   : > { %681 = vadd.xlane.f32.xlu1 %v5064_v27 }
 0x721   : > { %683 = vadd.xlane.f32.xlu0 %v5065_v21 }
 0x72c   : > { %v1128_v8 = vpop.xlane.xlu1 %1127 }
 0x72d   : > { %3532 = vrcp.f32 %v1128_v8 }
 0x72e   : > { %v1130_v53 = vpop.xlane.xlu0 %1129 }
 0x72f   : > { %3534 = vrcp.f32 %v1130_v53  ;;  %v5078_v53 = vld [vmem:[#allocation36_spill] sm:$0xff] }
 0x730   : > { %v1132_v49 = vpop.xlane.xlu1 %1131 }
 0x731   : > { %3536 = vrcp.f32 %v1132_v49 }
 0x732   : > { %v1134_v59 = vpop.xlane.xlu0 %1133 }
 0x733   : > { %3538 = vrcp.f32 %v1134_v59  ;;  %v5079_v59 = vld [vmem:[#allocation38_spill] sm:$0xff] }
 0x734   : > { %v1136_v52 = vpop.xlane.xlu1 %1135 }
 0x735   : > { %3540 = vrcp.f32 %v1136_v52 }
 0x736   : > { %v1138_v33 = vpop.xlane.xlu0 %1137 }
 0x737   : > { %3542 = vrcp.f32 %v1138_v33 }
 0x738   : > { %v1140_v14 = vpop.xlane.xlu1 %1139 }
 0x739   : > { %3544 = vrcp.f32 %v1140_v14 }
 0x73a   : > { %v3533_v19 = vpop.eup %3532  ;;  %v1142_v61 = vpop.xlane.xlu0 %1141 }
 0x73b   : > { %3546 = vrcp.f32 %v1142_v61  ;;  %v1304_v10 = vmul.f32 %v3533_v19, %v5066_v30 }
 0x73c   : > { %v3535_v16 = vpop.eup %3534  ;;  %v1144_v34 = vpop.xlane.xlu1 %1143 }
 0x73d   : > { %3548 = vrcp.f32 %v1144_v34  ;;  %v1305_v11 = vmul.f32 %v3535_v16, %v5067_v20  ;;  %v5080_v34 = vld [vmem:[#allocation35_spill] sm:$0xff] }
 0x73e   : > { %v3537_v18 = vpop.eup %3536  ;;  %v1146_v38 = vpop.xlane.xlu0 %1145 }
 0x73f   : > { %3550 = vrcp.f32 %v1146_v38  ;;  %v3260_v41 = vpack.i.bf16 %v1305_v11, %v1304_v10  ;;  %v1306_v60 = vmul.f32 %v3537_v18, %v5068_v2  ;;  %v5081_v10 = vld [vmem:[#allocation37_spill] sm:$0xff] }
 0x740   : > { %v3539_v37 = vpop.eup %3538  ;;  %v1148_v44 = vpop.xlane.xlu1 %1147 }
 0x741   : > { %3552 = vrcp.f32 %v1148_v44  ;;  %3261 = vrot.lane.b32.xlu1 %v3260_v41, %s3711_s8  ;;  %v1307_v9 = vmul.f32 %v3539_v37, %v5069_v46  ;;  %v5082_v44 = vld [vmem:[#allocation40_spill] sm:$0xff] }
 0x742   : > { %v3541_v17 = vpop.eup %3540  ;;  %v1150_v4 = vpop.xlane.xlu0 %1149 }
 0x743   : > { %3554 = vrcp.f32 %v1150_v4  ;;  %v3265_v42 = vpack.i.bf16 %v1307_v9, %v1306_v60  ;;  %v1308_v58 = vmul.f32 %v3541_v17, %v5070_v6  ;;  %v5083_v60 = vld [vmem:[#allocation42_spill] sm:$0xff] }
 0x744   : > { %v3543_v47 = vpop.eup %3542  ;;  %v1152_v0 = vpop.xlane.xlu1 %1151 }
 0x745   : > { %3556 = vrcp.f32 %v1152_v0  ;;  %3266 = vrot.lane.b32.xlu0 %v3265_v42, %s3711_s8  ;;  %v1309_v55 = vmul.f32 %v3543_v47, %v5071_v56  ;;  %v5084_v0 = vld [vmem:[#allocation39_spill] sm:$0xff] }
 0x746   : > { %v3545_v36 = vpop.eup %3544  ;;  %v1154_v45 = vpop.xlane.xlu0 %1153 }
 0x747   : > { %3558 = vrcp.f32 %v1154_v45  ;;  %v3270_v23 = vpack.i.bf16 %v1309_v55, %v1308_v58  ;;  %v1310_v13 = vmul.f32 %v3545_v36, %v5072_v62  ;;  %v5085_v58 = vld [vmem:[#allocation41_spill] sm:$0xff] }
 0x748   : > { %v3547_v32 = vpop.eup %3546  ;;  %v1156_v39 = vpop.xlane.xlu1 %1155 }
 0x749   : > { %3560 = vrcp.f32 %v1156_v39  ;;  %3271 = vrot.lane.b32.xlu1 %v3270_v23, %s3711_s8  ;;  %v1311_v63 = vmul.f32 %v3547_v32, %v5073_v57  ;;  %v5086_v39 = vld [vmem:[#allocation44_spill] sm:$0xff] }
 0x74a   : > { %v3549_v5 = vpop.eup %3548  ;;  %v1158_v7 = vpop.xlane.xlu0 %1157 }
 0x74b   : > { %3562 = vrcp.f32 %v1158_v7  ;;  %v3275_v51 = vpack.i.bf16 %v1311_v63, %v1310_v13  ;;  %v1312_v24 = vmul.f32 %v3549_v5, %v5074_v35  ;;  %v5087_v13 = vld [vmem:[#allocation46_spill] sm:$0xff] }
 0x74c   : > { %v3551_v25 = vpop.eup %3550  ;;  %v1578_v22 = vpop.xlane.xlu1 %1577 }
 0x74d   : > { %3564 = vrcp.f32 %v1578_v22  ;;  %3276 = vrot.lane.b32.xlu1 %v3275_v51, %s3711_s8  ;;  %v1313_v48 = vmul.f32 %v3551_v25, %v5075_v43  ;;  %v5088_v22 = vld [vmem:[#allocation43_spill] sm:$0xff] }
 0x74e   : > { %v3553_v28 = vpop.eup %3552  ;;  %v1580_v54 = vpop.xlane.xlu0 %1579 }
 0x74f   : > { %3566 = vrcp.f32 %v1580_v54  ;;  %v3280_v1 = vpack.i.bf16 %v1313_v48, %v1312_v24  ;;  %v1314_v40 = vmul.f32 %v3553_v28, %v5076_v29  ;;  %v5089_v24 = vld [vmem:[#allocation45_spill] sm:$0xff]  ;;  %v5091_v29 = vld [vmem:[#allocation50_spill] sm:$0xff] }
 0x750   : > { %v3555_v50 = vpop.eup %3554  ;;  %v1582_v15 = vpop.xlane.xlu1 %1581 }
 0x751   : > { %3568 = vrcp.f32 %v1582_v15  ;;  %3281 = vrot.lane.b32.xlu0 %v3280_v1, %s3711_s8  ;;  %v1315_v12 = vmul.f32 %v3555_v50, %v5077_v31  ;;  %v5090_v50 = vld [vmem:[#allocation48_spill] sm:$0xff] }
 0x752   : > { %v3557_v3 = vpop.eup %3556  ;;  %v1584_v26 = vpop.xlane.xlu0 %1583 }
 0x753   : > { %3570 = vrcp.f32 %v1584_v26  ;;  %v3285_v27 = vpack.i.bf16 %v1315_v12, %v1314_v40  ;;  %v1316_v49 = vmul.f32 %v3557_v3, %v5078_v53  ;;  %v5092_v26 = vld [vmem:[#allocation47_spill] sm:$0xff] }
 0x754   : > { %v3559_v21 = vpop.eup %3558  ;;  %v1586_v8 = vpop.xlane.xlu1 %1585 }
 0x755   : > { %3572 = vrcp.f32 %v1586_v8  ;;  %3286 = vrot.lane.b32.xlu1 %v3285_v27, %s3711_s8  ;;  %v1317_v52 = vmul.f32 %v3559_v21, %v5079_v59  ;;  %v5093_v21 = vld [vmem:[#allocation49_spill] sm:$0xff] }
 0x756   : > { %v3561_v33 = vpop.eup %3560  ;;  %v1588_v14 = vpop.xlane.xlu0 %1587 }
 0x757   : > { %3574 = vrcp.f32 %v1588_v14  ;;  %v3290_v19 = vpack.i.bf16 %v1317_v52, %v1316_v49  ;;  %v1318_v30 = vmul.f32 %v3561_v33, %v5080_v34  ;;  %v5094_v52 = vld [vmem:[#allocation52_spill] sm:$0xff]  ;;  %v5095_v14 = vld [vmem:[#allocation54_spill] sm:$0xff] }
 0x758   : > { %v3563_v61 = vpop.eup %3562  ;;  %v1590_v16 = vpop.xlane.xlu1 %1589 }
 0x759   : > { %3576 = vrcp.f32 %v1590_v16  ;;  %3291 = vrot.lane.b32.xlu0 %v3290_v19, %s3711_s8  ;;  %v1319_v20 = vmul.f32 %v3563_v61, %v5081_v10 }
 0x75a   : > { %v3565_v11 = vpop.eup %3564  ;;  %v1592_v18 = vpop.xlane.xlu0 %1591 }
 0x75b   : > { %3578 = vrcp.f32 %v1592_v18  ;;  %v3295_v38 = vpack.i.bf16 %v1319_v20, %v1318_v30  ;;  %v1754_v2 = vmul.f32 %v3565_v11, %v5082_v44  ;;  %v5096_v30 = vld [vmem:[#allocation51_spill] sm:$0xff]  ;;  %v5097_v20 = vld [vmem:[#allocation53_spill] sm:$0xff] }
 0x75c   : > { %v3567_v41 = vpop.eup %3566  ;;  %v1594_v37 = vpop.xlane.xlu1 %1593 }
 0x75d   : > { %3580 = vrcp.f32 %v1594_v37  ;;  %3296 = vrot.lane.b32.xlu1 %v3295_v38, %s3711_s8  ;;  %v1755_v46 = vmul.f32 %v3567_v41, %v5083_v60 }
 0x75e   : > { %v3569_v9 = vpop.eup %3568  ;;  %v1596_v17 = vpop.xlane.xlu0 %1595 }
 0x75f   : > { %3582 = vrcp.f32 %v1596_v17  ;;  %v3300_v4 = vpack.i.bf16 %v1755_v46, %v1754_v2  ;;  %v1756_v6 = vmul.f32 %v3569_v9, %v5084_v0 }
 0x760   : > { %v3571_v42 = vpop.eup %3570  ;;  %v1598_v47 = vpop.xlane.xlu1 %1597 }
 0x761   : > { %3584 = vrcp.f32 %v1598_v47  ;;  %3301 = vrot.lane.b32.xlu0 %v3300_v4, %s3710_s7  ;;  %v1757_v56 = vmul.f32 %v3571_v42, %v5085_v58 }
 0x762   : > { %v3573_v55 = vpop.eup %3572  ;;  %v1600_v36 = vpop.xlane.xlu0 %1599 }
 0x763   : > { %3586 = vrcp.f32 %v1600_v36  ;;  %v3305_v45 = vpack.i.bf16 %v1757_v56, %v1756_v6  ;;  %v1758_v62 = vmul.f32 %v3573_v55, %v5086_v39 }
 0x764   : > { %v3575_v23 = vpop.eup %3574  ;;  %v1602_v32 = vpop.xlane.xlu1 %1601 }
 0x765   : > { %3588 = vrcp.f32 %v1602_v32  ;;  %3306 = vrot.lane.b32.xlu1 %v3305_v45, %s3710_s7  ;;  %v1759_v57 = vmul.f32 %v3575_v23, %v5087_v13 }
 0x766   : > { %v3577_v63 = vpop.eup %3576  ;;  %v1604_v5 = vpop.xlane.xlu0 %1603 }
 0x767   : > { %3590 = vrcp.f32 %v1604_v5  ;;  %v3310_v7 = vpack.i.bf16 %v1759_v57, %v1758_v62  ;;  %v1760_v35 = vmul.f32 %v3577_v63, %v5088_v22 }
 0x768   : > { %v3579_v51 = vpop.eup %3578  ;;  %v1606_v25 = vpop.xlane.xlu1 %1605 }
 0x769   : > { %3592 = vrcp.f32 %v1606_v25  ;;  %3311 = vrot.lane.b32.xlu0 %v3310_v7, %s3710_s7  ;;  %v1761_v43 = vmul.f32 %v3579_v51, %v5089_v24 }
 0x76a   : > { %v3581_v48 = vpop.eup %3580  ;;  %v1608_v28 = vpop.xlane.xlu0 %1607 }
 0x76b   : > { %3594 = vrcp.f32 %v1608_v28  ;;  %v3315_v54 = vpack.i.bf16 %v1761_v43, %v1760_v35  ;;  %v1762_v15 = vmul.f32 %v3581_v48, %v5090_v50 }
 0x76c   : > { %v3583_v1 = vpop.eup %3582  ;;  %v4822_v38 = vpop.xlane.xlu1 %653 }
 0x76d   : > { %3316 = vrot.lane.b32.xlu1 %v3315_v54, %s3710_s7  ;;  %v1763_v40 = vmul.f32 %v3583_v1, %v5091_v29 }
 0x76e   : > { %v3585_v31 = vpop.eup %3584  ;;  %v4824_v41 = vpop.xlane.xlu0 %655 }
 0x76f   : > { %v3320_v12 = vpack.i.bf16 %v1763_v40, %v1762_v15  ;;  %v1764_v27 = vmul.f32 %v3585_v31, %v5092_v26 }
 0x770   : > { %v3587_v3 = vpop.eup %3586  ;;  %v4826_v37 = vpop.xlane.xlu1 %657 }
 0x771   : > { %3321 = vrot.lane.b32.xlu0 %v3320_v12, %s3710_s7  ;;  %v1765_v8 = vmul.f32 %v3587_v3, %v5093_v21 }
 0x772   : > { %v3589_v53 = vpop.eup %3588  ;;  %v4828_v44 = vpop.xlane.xlu0 %659 }
 0x773   : > { %v3325_v49 = vpack.i.bf16 %v1765_v8, %v1764_v27  ;;  %v1766_v33 = vmul.f32 %v3589_v53, %v5094_v52 }
 0x774   : > { %v3591_v59 = vpop.eup %3590  ;;  %v4830_v2 = vpop.xlane.xlu1 %661 }
 0x775   : > { %3326 = vrot.lane.b32.xlu1 %v3325_v49, %s3710_s7  ;;  %v1767_v19 = vmul.f32 %v3591_v59, %v5095_v14 }
 0x776   : > { %v3593_v61 = vpop.eup %3592  ;;  %v4832_v60 = vpop.xlane.xlu0 %663 }
 0x777   : > { %v3330_v16 = vpack.i.bf16 %v1767_v19, %v1766_v33  ;;  %v1768_v10 = vmul.f32 %v3593_v61, %v5096_v30 }
 0x778   : > { %v3595_v34 = vpop.eup %3594  ;;  %v4834_v46 = vpop.xlane.xlu1 %665 }
 0x779   : > { %3331 = vrot.lane.b32.xlu0 %v3330_v16, %s3710_s7  ;;  %v1769_v11 = vmul.f32 %v3595_v34, %v5097_v20 }
 0x77a   : > { %v4836_v9 = vpop.xlane.xlu0 %667 }
 0x77b   : > { %v3335_v18 = vpack.i.bf16 %v1769_v11, %v1768_v10 }
 0x77c   : > { %v4838_v17 = vpop.xlane.xlu1 %669 }
 0x77d   : > { %3336 = vrot.lane.b32.xlu1 %v3335_v18, %s3710_s7 }
 0x77e   : > { %v2034_v4 = vpop.xlane.xlu0 %2033 }
 0x77f   : > { %3596 = vrcp.f32 %v2034_v4 }
 0x780   : > { %v2032_v42 = vpop.xlane.xlu1 %2031 }
 0x781   : > { %3598 = vrcp.f32 %v2032_v42 }
 0x782   : > { %v2030_v47 = vpop.xlane.xlu0 %2029 }
 0x783   : > { %3600 = vrcp.f32 %v2030_v47 }
 0x784   : > { %v2028_v0 = vpop.xlane.xlu1 %2027 }
 0x785   : > { %3602 = vrcp.f32 %v2028_v0 }
 0x786   : > { %v2042_v6 = vpop.xlane.xlu0 %2041 }
 0x787   : > { %3604 = vrcp.f32 %v2042_v6 }
 0x788   : > { %v2040_v58 = vpop.xlane.xlu1 %2039 }
 0x789   : > { %3606 = vrcp.f32 %v2040_v58 }
 0x78a   : > { %v2038_v56 = vpop.xlane.xlu0 %2037 }
 0x78b   : > { %3608 = vrcp.f32 %v2038_v56 }
 0x78c   : > { %v2036_v55 = vpop.xlane.xlu1 %2035  ;;  %v3597_v13 = vpop.eup %3596 }
 0x78d   : > { %3610 = vrcp.f32 %v2036_v55 }
 0x78e   : > { %v2050_v36 = vpop.xlane.xlu0 %2049  ;;  %v3599_v57 = vpop.eup %3598 }
 0x78f   : > { %3612 = vrcp.f32 %v2050_v36 }
 0x790   : > { %v2048_v45 = vpop.xlane.xlu1 %2047  ;;  %v3601_v5 = vpop.eup %3600 }
 0x791   : > { %3614 = vrcp.f32 %v2048_v45 }
 0x792   : > { %v2046_v32 = vpop.xlane.xlu0 %2045  ;;  %v3603_v25 = vpop.eup %3602 }
 0x793   : > { %3616 = vrcp.f32 %v2046_v32 }
 0x794   : > { %v2044_v39 = vpop.xlane.xlu1 %2043  ;;  %v3605_v15 = vpop.eup %3604 }
 0x795   : > { %3618 = vrcp.f32 %v2044_v39 }
 0x796   : > { %v2058_v35 = vpop.xlane.xlu0 %2057  ;;  %v3607_v29 = vpop.eup %3606 }
 0x797   : > { %3620 = vrcp.f32 %v2058_v35 }
 0x798   : > { %v2056_v28 = vpop.xlane.xlu1 %2055  ;;  %v3609_v31 = vpop.eup %3608 }
 0x799   : > { %3622 = vrcp.f32 %v2056_v28 }
 0x79a   : > { %v2054_v12 = vpop.xlane.xlu0 %2053  ;;  %v3611_v27 = vpop.eup %3610 }
 0x79b   : > { %3624 = vrcp.f32 %v2054_v12 }
 0x79c   : > { %v2052_v21 = vpop.xlane.xlu1 %2051  ;;  %v3613_v19 = vpop.eup %3612 }
 0x79d   : > { %3626 = vrcp.f32 %v2052_v21 }
 0x79e   : > { %v3615_v61 = vpop.eup %3614  ;;  %3628 = vrcp.f32 %v4822_v38 }
 0x79f   : > { %3630 = vrcp.f32 %v4826_v37 }
 0x7a0   : > { %v3617_v34 = vpop.eup %3616  ;;  %3632 = vrcp.f32 %v4828_v44 }
 0x7a1   : > { %3634 = vrcp.f32 %v4824_v41 }
 0x7a2   : > { %v3619_v20 = vpop.eup %3618  ;;  %3636 = vrcp.f32 %v4830_v2 }
 0x7a3   : > { %3638 = vrcp.f32 %v4834_v46 }
 0x7a4   : > { %v3621_v58 = vpop.eup %3620  ;;  %3640 = vrcp.f32 %v4836_v9 }
 0x7a5   : > { %3642 = vrcp.f32 %v4832_v60 }
 0x7a6   : > { %v3623_v56 = vpop.eup %3622  ;;  %3644 = vrcp.f32 %v4838_v17  ;;  %v5098_v17 = vld [vmem:[#allocation8_spill] sm:$0xff] }
 0x7a8   : > { %v3625_v36 = vpop.eup %3624 }
 0x7aa   : > { %v3627_v32 = vpop.eup %3626 }
 0x7ab   : > { %v3629_v37 = vpop.eup %3628 }
 0x7ac   : > { %v3631_v44 = vpop.eup %3630 }
 0x7c4   : > { %v3187_v23 = vpop.f32.mrf.mxu0 }
 0x7c5   : > { %v2206_v7 = vmul.f32 %v3599_v57, %v3187_v23 }
 0x7c6   : > { %v2125_v62 = vpop.f32.mrf.mxu0 }
 0x7c7   : > { %v2204_v24 = vmul.f32 %v3603_v25, %v2125_v62 }
 0x7c8   : > { %v3188_v63 = vpop.f32.mrf.mxu0 }
 0x7c9   : > { %v2207_v51 = vmul.f32 %v3597_v13, %v3188_v63 }
 0x7ca   : > { %v2128_v22 = vpop.f32.mrf.mxu0 }
 0x7cb   : > { %v3340_v43 = vpack.i.bf16 %v2207_v51, %v2206_v7  ;;  %v2205_v48 = vmul.f32 %v3601_v5, %v2128_v22  ;;  %v674_v5 = vpop.xlane.xlu1 %673  ;;  %v672_v7 = vpop.xlane.xlu0 %671 }
 0x7cc   : > { %v3191_v54 = vpop.f32.mrf.mxu0  ;;  %3646 = vrcp.f32 %v672_v7 }
 0x7cd   : > { %v3345_v1 = vpack.i.bf16 %v2205_v48, %v2204_v24  ;;  %3341 = vrot.lane.b32.xlu1 %v3340_v43, %s3709_s23  ;;  %v2210_v3 = vmul.f32 %v3607_v29, %v3191_v54  ;;  %3648 = vrcp.f32 %v674_v5 }
 0x7ce   : > { %v2141_v50 = vpop.f32.mrf.mxu0 }
 0x7cf   : > { %3346 = vrot.lane.b32.xlu0 %v3345_v1, %s3709_s23  ;;  %v2208_v53 = vmul.f32 %v3611_v27, %v2141_v50  ;;  %v678_v51 = vpop.xlane.xlu1 %677  ;;  %v676_v25 = vpop.xlane.xlu0 %675 }
 0x7d0   : > { %v3192_v40 = vpop.f32.mrf.mxu0  ;;  %3650 = vrcp.f32 %v676_v25 }
 0x7d1   : > { %v2211_v26 = vmul.f32 %v3605_v15, %v3192_v40  ;;  %3652 = vrcp.f32 %v678_v51 }
 0x7d2   : > { %v2144_v8 = vpop.f32.mrf.mxu0 }
 0x7d3   : > { %v3350_v49 = vpack.i.bf16 %v2211_v26, %v2210_v3  ;;  %v2209_v59 = vmul.f32 %v3609_v31, %v2144_v8  ;;  %v682_v22 = vpop.xlane.xlu1 %681  ;;  %v4848_v24 = vpop.xlane.xlu0 %679 }
 0x7d4   : > { %v3195_v52 = vpop.f32.mrf.mxu0  ;;  %v3633_v26 = vpop.eup %3632  ;;  %3654 = vrcp.f32 %v682_v22 }
 0x7d5   : > { %v3355_v33 = vpack.i.bf16 %v2209_v59, %v2208_v53  ;;  %3351 = vrot.lane.b32.xlu1 %v3350_v49, %s3709_s23  ;;  %v2214_v30 = vmul.f32 %v3615_v61, %v3195_v52  ;;  %v3635_v46 = vpop.eup %3634  ;;  %v854_v59 = vmul.f32 %v3629_v37, %v5098_v17  ;;  %v5099_v52 = vld [vmem:[#allocation7_spill] sm:$0xff]  ;;  %v5101_v61 = vld [vmem:[#allocation10_spill] sm:$0xff] }
 0x7d6   : > { %v2157_v14 = vpop.f32.mrf.mxu0 }
 0x7d7   : > { %3356 = vrot.lane.b32.xlu0 %v3355_v33, %s3709_s23  ;;  %v2212_v18 = vmul.f32 %v3619_v20, %v2157_v14  ;;  %v3262_v35 = vpop.permute.xlu1 %3261  ;;  %v4852_v48 = vpop.xlane.xlu0 %683  ;;  %v856_v33 = vmul.f32 %v3631_v44, %v5099_v52  ;;  %v5100_v14 = vld [vmem:[#allocation9_spill] sm:$0xff]  ;;  %v5102_v44 = vld [vmem:[#allocation12_spill] sm:$0xff] }
 0x7d8   : > { %v3196_v16 = vpop.f32.mrf.mxu0  ;;  %v3264_v60 = vunpack.i.h.bf16 %v3262_v35  ;;  %v3263_v21 = vunpack.i.l.bf16 %v3262_v35  ;;  %3656 = vrcp.f32 %v4852_v48 }
 0x7d9   : > { %v2215_v10 = vmul.f32 %v3613_v19, %v3196_v16  ;;  %v857_v19 = vmul.f32 %v3633_v26, %v5100_v14  ;;  %v855_v16 = vmul.f32 %v3635_v46, %v5101_v61  ;;  %v5103_v46 = vld [vmem:[#allocation11_spill] sm:$0xff]  ;;  %3658 = vrcp.f32 %v4848_v24 }
 0x7da   : > { %v2160_v11 = vpop.f32.mrf.mxu0 }
 0x7db   : > { %v3360_v4 = vpack.i.bf16 %v2215_v10, %v2214_v30  ;;  %v2213_v42 = vmul.f32 %v3617_v34, %v2160_v11  ;;  %v4850_v43 = vpop.permute.xlu1 %3271  ;;  %v3267_v54 = vpop.permute.xlu0 %3266 }
 0x7dc   : > { %v3199_v47 = vpop.f32.mrf.mxu0  ;;  %v3269_v27 = vunpack.i.h.bf16 %v3267_v54  ;;  %v3268_v9 = vunpack.i.l.bf16 %v3267_v54  ;;  %v3273_v35 = vunpack.i.l.bf16 %v4850_v43 }
 0x7dd   : > { %v3365_v0 = vpack.i.bf16 %v2213_v42, %v2212_v18  ;;  %3361 = vrot.lane.b32.xlu1 %v3360_v4, %s3709_s23  ;;  %v2218_v45 = vmul.f32 %v3623_v56, %v3199_v47  ;;  %v3637_v42 = vpop.eup %3636  ;;  %v2412_v47 = vsel %vm427_vm0, %v854_v59, %v3263_v21  ;;  %v5105_v21 = vld [vmem:[#allocation14_spill] sm:$0xff] }
 0x7de   : > { %v2173_v6 = vpop.f32.mrf.mxu0  ;;  %v2415_v20 = vsel %vm427_vm0, %v857_v19, %v3269_v27  ;;  %v2414_v11 = vsel %vm427_vm0, %v856_v33, %v3268_v9  ;;  %v858_v26 = vmul.f32 %v3637_v42, %v5102_v44  ;;  %v5104_v27 = vld [vmem:[#allocation13_spill] sm:$0xff] }
 0x7df   : > { %3366 = vrot.lane.b32.xlu0 %v3365_v0, %s3709_s23  ;;  %v2216_v62 = vmul.f32 %v3627_v32, %v2173_v6  ;;  %v4854_v28 = vpop.permute.xlu1 %3276  ;;  %v4858_v50 = vpop.permute.xlu0 %3281  ;;  %v2413_v0 = vsel %vm427_vm0, %v855_v16, %v3264_v60 }
 0x7e0   : > { %v3200_v55 = vpop.f32.mrf.mxu0  ;;  %v3279_v7 = vunpack.i.h.bf16 %v4854_v28  ;;  %v3278_v51 = vunpack.i.l.bf16 %v4854_v28  ;;  %v2416_v19 = vsel %vm427_vm0, %v858_v26, %v3273_v35 }
 0x7e1   : > { %v2219_v23 = vmul.f32 %v3621_v58, %v3200_v55  ;;  %v3639_v55 = vpop.eup %3638 }
 0x7e2   : > { %v2176_v39 = vpop.f32.mrf.mxu0  ;;  %v860_v28 = vmul.f32 %v3639_v55, %v5103_v46 }
 0x7e3   : > { %v3375_v13 = vpack.i.bf16 %v2219_v23, %v2218_v45  ;;  %v2217_v57 = vmul.f32 %v3625_v36, %v2176_v39  ;;  %v4856_v1 = vpop.permute.xlu1 %3286  ;;  %v4864_v29 = vpop.permute.xlu0 %3291 }
 0x7e4   : > { %v3641_v39 = vpop.eup %3640  ;;  %v2418_v48 = vsel %vm427_vm0, %v860_v28, %v3278_v51 }
 0x7e5   : > { %v3370_v63 = vpack.i.bf16 %v2217_v57, %v2216_v62  ;;  %3376 = vrot.lane.b32.xlu1 %v3375_v13, %s3709_s23  ;;  %v3274_v62 = vunpack.i.h.bf16 %v4850_v43  ;;  %v3643_v5 = vpop.eup %3642  ;;  %v861_v9 = vmul.f32 %v3641_v39, %v5104_v27  ;;  %v5106_v39 = vld [vmem:[#allocation15_spill] sm:$0xff] }
 0x7e6   : > { %v3645_v37 = vpop.eup %3644  ;;  %v859_v43 = vmul.f32 %v3643_v5, %v5105_v21 }
 0x7e7   : > { %3371 = vrot.lane.b32.xlu0 %v3370_v63, %s3709_s23  ;;  %v4860_v15 = vpop.permute.xlu1 %3296  ;;  %v3302_v31 = vpop.permute.xlu0 %3301  ;;  %v2419_v59 = vsel %vm427_vm0, %v861_v9, %v3279_v7  ;;  %v5109_v7 = vld [vmem:[#allocation18_spill] sm:$0xff] }
 0x7e8   : > { %v3304_v34 = vunpack.i.h.bf16 %v3302_v31  ;;  %v3303_v30 = vunpack.i.l.bf16 %v3302_v31  ;;  %v3647_v60 = vpop.eup %3646  ;;  %v2417_v24 = vsel %vm427_vm0, %v859_v43, %v3274_v62 }
 0x7e9   : > { %v3649_v17 = vpop.eup %3648 }
 0x7ea   : > { %v2430_v13 = vsel %vm2428_vm1, %v2413_v0, %v3304_v34  ;;  %v2429_v57 = vsel %vm2428_vm1, %v2412_v47, %v3303_v30  ;;  %v3651_v14 = vpop.eup %3650  ;;  %v864_v62 = vmul.f32 %v3649_v17, %v5106_v39  ;;  %v3298_v17 = vunpack.i.l.bf16 %v4860_v15 }
 0x7eb   : > { %v3307_v40 = vpop.permute.xlu1 %3306  ;;  %v4872_v3 = vpop.permute.xlu0 %3311 }
 0x7ec   : > { %v3309_v8 = vunpack.i.h.bf16 %v3307_v40  ;;  %v3308_v53 = vunpack.i.l.bf16 %v3307_v40 }
 0x7ee   : > { %v2431_v6 = vsel %vm2428_vm1, %v2414_v11, %v3308_v53  ;;  %v2432_v58 = vsel %vm2428_vm1, %v2415_v20, %v3309_v8  ;;  %v3314_v8 = vunpack.i.h.bf16 %v4872_v3  ;;  %v3653_v11 = vpop.eup %3652 }
 0x7ef   : > { %v4868_v12 = vpop.permute.xlu1 %3316  ;;  %v4879_v41 = vpop.permute.xlu0 %3321 }
 0x7f0   : > { %v3319_v54 = vunpack.i.h.bf16 %v4868_v12  ;;  %v3318_v40 = vunpack.i.l.bf16 %v4868_v12  ;;  %v3313_v12 = vunpack.i.l.bf16 %v4872_v3  ;;  %v3655_v0 = vpop.eup %3654  ;;  %v3324_v51 = vunpack.i.h.bf16 %v4879_v41 }
 0x7f1   : > { %v3657_v9 = vpop.eup %3656 }
 0x7f2   : > { %v2435_v61 = vsel %vm2428_vm1, %v2418_v48, %v3318_v40  ;;  %v2436_v16 = vsel %vm2428_vm1, %v2419_v59, %v3319_v54  ;;  %v2433_v42 = vsel %vm2428_vm1, %v2416_v19, %v3313_v12  ;;  %v3659_v12 = vpop.eup %3658 }
 0x7f3   : > { %v4876_v38 = vpop.permute.xlu1 %3326  ;;  %v4883_v49 = vpop.permute.xlu0 %3331 }
 0x7f7   : > { %v4881_v2 = vpop.permute.xlu1 %3336 }
 0x83f   : > { %v3342_v10 = vpop.permute.xlu1 %3341 }
 0x840   : > { %v3344_v18 = vunpack.i.h.bf16 %v3342_v10  ;;  %v3343_v4 = vunpack.i.l.bf16 %v3342_v10 }
 0x841   : > { %v3347_v56 = vpop.permute.xlu0 %3346 }
 0x842   : > { %v2448_v36 = vsel %vm2445_vm2, %v2431_v6, %v3343_v4  ;;  %v2449_v45 = vsel %vm2445_vm2, %v2432_v58, %v3344_v18  ;;  %v3349_v23 = vunpack.i.h.bf16 %v3347_v56  ;;  %v3348_v32 = vunpack.i.l.bf16 %v3347_v56 }
 0x843   : > { %v2778_v63 = vpack.c.bf16 %v2449_v45, %v2448_v36  ;;  %v3284_v18 = vunpack.i.h.bf16 %v4858_v50  ;;  %v2434_v4 = vsel %vm2428_vm1, %v2417_v24, %v3314_v8  ;;  %v3289_v6 = vunpack.i.h.bf16 %v4856_v1  ;;  %v5110_v24 = vld [vmem:[#allocation19_spill] sm:$0xff] }
 0x844   : > { %v2446_v25 = vsel %vm2445_vm2, %v2429_v57, %v3348_v32  ;;  %v2447_v22 = vsel %vm2445_vm2, %v2430_v13, %v3349_v23  ;;  %v3288_v58 = vunpack.i.l.bf16 %v4856_v1  ;;  %v3283_v36 = vunpack.i.l.bf16 %v4858_v50  ;;  %v5107_v13 = vld [vmem:[#allocation17_spill] sm:$0xff] }
 0x845   : > { %2810 = vst [vmem:[%s4899_s11 + $0x8] sm:$0xff] %v2778_v63   ;;  %v2773_v31 = vpack.c.bf16 %v2447_v22, %v2446_v25  ;;  %v3329_v45 = vunpack.i.h.bf16 %v4876_v38  ;;  %v3328_v23 = vunpack.i.l.bf16 %v4876_v38  ;;  %v865_v57 = vmul.f32 %v3651_v14, %v5107_v13  ;;  %v5108_v63 = vld [vmem:[#allocation16_spill] sm:$0xff] }
 0x846   : > { %v862_v5 = vmul.f32 %v3645_v37, %v5108_v63  ;;  %v863_v1 = vmul.f32 %v3647_v60, %v5109_v7  ;;  %v3323_v25 = vunpack.i.l.bf16 %v4879_v41  ;;  %v2422_v22 = vsel %vm427_vm0, %v864_v62, %v3288_v58 }
 0x847   : > { %2774 = vst [vmem:[%s4899_s11] sm:$0xff] %v2773_v31   ;;  %v3352_v53 = vpop.permute.xlu1 %3351  ;;  %v2423_v38 = vsel %vm427_vm0, %v865_v57, %v3289_v6  ;;  %v2439_v37 = vsel %vm2428_vm1, %v2422_v22, %v3328_v23  ;;  %v3294_v60 = vunpack.i.h.bf16 %v4864_v29  ;;  %v3338_v14 = vunpack.i.l.bf16 %v4881_v2 }
 0x848   : > { %v3354_v52 = vunpack.i.h.bf16 %v3352_v53  ;;  %v3353_v33 = vunpack.i.l.bf16 %v3352_v53  ;;  %v2421_v40 = vsel %vm427_vm0, %v863_v1, %v3284_v18  ;;  %v2420_v31 = vsel %vm427_vm0, %v862_v5, %v3283_v36 }
 0x849   : > { %v3357_v34 = vpop.permute.xlu0 %3356  ;;  %v2440_v44 = vsel %vm2428_vm1, %v2423_v38, %v3329_v45  ;;  %v2437_v21 = vsel %vm2428_vm1, %v2420_v31, %v3323_v25  ;;  %v2438_v43 = vsel %vm2428_vm1, %v2421_v40, %v3324_v51  ;;  %v3299_v53 = vunpack.i.h.bf16 %v4860_v15 }
 0x84a   : > { %v2453_v3 = vsel %vm2445_vm2, %v2436_v16, %v3354_v52  ;;  %v2452_v30 = vsel %vm2445_vm2, %v2435_v61, %v3353_v33  ;;  %v3359_v10 = vunpack.i.h.bf16 %v3357_v34  ;;  %v3358_v20 = vunpack.i.l.bf16 %v3357_v34  ;;  %v5111_v16 = vld [vmem:[#allocation21_spill] sm:$0xff] }
 0x84b   : > { %v2788_v47 = vpack.c.bf16 %v2453_v3, %v2452_v30  ;;  %v3293_v52 = vunpack.i.l.bf16 %v4864_v29  ;;  %v3339_v33 = vunpack.i.h.bf16 %v4881_v2  ;;  %v868_v61 = vmul.f32 %v3655_v0, %v5110_v24  ;;  %v5112_v3 = vld [vmem:[#allocation20_spill] sm:$0xff] }
 0x84c   : > { %v2450_v56 = vsel %vm2445_vm2, %v2433_v42, %v3358_v20  ;;  %v2451_v55 = vsel %vm2445_vm2, %v2434_v4, %v3359_v10  ;;  %v869_v34 = vmul.f32 %v3657_v9, %v5111_v16  ;;  %v866_v30 = vmul.f32 %v3653_v11, %v5112_v3  ;;  %v5113_v10 = vld [vmem:[#allocation22_spill] sm:$0xff] }
 0x84d   : > { %2812 = vst [vmem:[%s4899_s11 + $0x18] sm:$0xff] %v2788_v47   ;;  %v2783_v32 = vpack.c.bf16 %v2451_v55, %v2450_v56  ;;  %v867_v15 = vmul.f32 %v3659_v12, %v5113_v10  ;;  %v3334_v20 = vunpack.i.h.bf16 %v4883_v49  ;;  %v3333_v18 = vunpack.i.l.bf16 %v4883_v49 }
 0x84e   : > { %v2426_v4 = vsel %vm427_vm0, %v868_v61, %v3298_v17  ;;  %v2427_v2 = vsel %vm427_vm0, %v869_v34, %v3299_v53  ;;  %v2424_v11 = vsel %vm427_vm0, %v866_v30, %v3293_v52 }
 0x84f   : > { %2811 = vst [vmem:[%s4899_s11 + $0x10] sm:$0xff] %v2783_v32   ;;  %v3362_v50 = vpop.permute.xlu1 %3361  ;;  %v2425_v0 = vsel %vm427_vm0, %v867_v15, %v3294_v60  ;;  %v2443_v6 = vsel %vm2428_vm1, %v2426_v4, %v3338_v14  ;;  %v2444_v58 = vsel %vm2428_vm1, %v2427_v2, %v3339_v33  ;;  %v2441_v23 = vsel %vm2428_vm1, %v2424_v11, %v3333_v18 }
 0x850   : > { %v3364_v35 = vunpack.i.h.bf16 %v3362_v50  ;;  %v3363_v54 = vunpack.i.l.bf16 %v3362_v50  ;;  %v2442_v32 = vsel %vm2428_vm1, %v2425_v0, %v3334_v20 }
 0x851   : > { %v3367_v26 = vpop.permute.xlu0 %3366 }
 0x852   : > { %v2456_v46 = vsel %vm2445_vm2, %v2439_v37, %v3363_v54  ;;  %v2457_v41 = vsel %vm2445_vm2, %v2440_v44, %v3364_v35  ;;  %v3369_v28 = vunpack.i.h.bf16 %v3367_v26  ;;  %v3368_v27 = vunpack.i.l.bf16 %v3367_v26 }
 0x853   : > { %v2798_v8 = vpack.c.bf16 %v2457_v41, %v2456_v46 }
 0x854   : > { %v2454_v48 = vsel %vm2445_vm2, %v2437_v21, %v3368_v27  ;;  %v2455_v59 = vsel %vm2445_vm2, %v2438_v43, %v3369_v28 }
 0x855   : > { %2814 = vst [vmem:[%s4899_s11 + $0x28] sm:$0xff] %v2798_v8   ;;  %v2793_v19 = vpack.c.bf16 %v2455_v59, %v2454_v48 }
 0x857   : > { %2813 = vst [vmem:[%s4899_s11 + $0x20] sm:$0xff] %v2793_v19   ;;  %v3377_v29 = vpop.permute.xlu1 %3376 }
 0x858   : > { %v3379_v42 = vunpack.i.h.bf16 %v3377_v29  ;;  %v3378_v47 = vunpack.i.l.bf16 %v3377_v29 }
 0x859   : > { %v3372_v56 = vpop.permute.xlu0 %3371 }
 0x85a   : > { %v2460_v49 = vsel %vm2445_vm2, %v2443_v6, %v3378_v47  ;;  %v2461_v55 = vsel %vm2445_vm2, %v2444_v58, %v3379_v42  ;;  %v3374_v36 = vunpack.i.h.bf16 %v3372_v56  ;;  %v3373_v45 = vunpack.i.l.bf16 %v3372_v56 }
 0x85b   : > { %v2808_v39 = vpack.c.bf16 %v2461_v55, %v2460_v49 }
 0x85c   : > { %v2458_v62 = vsel %vm2445_vm2, %v2441_v23, %v3373_v45  ;;  %v2459_v13 = vsel %vm2445_vm2, %v2442_v32, %v3374_v36 }
 0x85d   : > { %2816 = vst [vmem:[%s4899_s11 + $0x38] sm:$0xff] %v2808_v39   ;;  %v2803_v57 = vpack.c.bf16 %v2459_v13, %v2458_v62 }
 0x85f   : > { %2815 = vst [vmem:[%s4899_s11 + $0x30] sm:$0xff] %v2803_v57  }
 0x860 PF: > { %s14_s17 = sadd.s32 1, %s3707_s17   ;;  %s5114_s15 = smov %s3703_s16 }
 0x861   : > { %p11_p5 = scmp.ge.s32.totalorder %s14_s17, 4   ;;  %s5115_s16 = smov %s5117_s18 }
 0x863   :  { %13 = sbr.rel (!%p11_p5) target bundleno = 2 (0x2), region = 75 }

</bundles_post_ra>
